<compile_context>
chip_gen: v5e
topology: v5e:2x2
jax: 0.10.0
libtpu: 0.0.40
codegen_flags: <defaults>
</compile_context>

<pallas_src>
import jax
import jax.numpy as jnp
from jax.experimental import pallas as pl
from jax.experimental.pallas import tpu as pltpu

# Scoped-VMEM budget: above the v5e/v6e defaults, safely below v7x physical.
VMEM_LIMIT = 48 * 1024 * 1024


def _round_up(x, m):
    return (x + m - 1) // m * m


# ---------------------------------------------------------------------------
# Hoisted input projection:  out = x @ W + b   (single big GEMM, N-tiled)
# x: (M, K) f32,  W: (K, N) bf16,  b: (1, N) f32  ->  (M, N) f32
# ---------------------------------------------------------------------------
def _proj_kernel(x_ref, w_ref, b_ref, o_ref):
    o_ref[...] = (
        jnp.dot(x_ref[...].astype(jnp.bfloat16), w_ref[...],
                preferred_element_type=jnp.float32)
        + b_ref[...]
    )


def input_proj(x, w_bf16, b, *, tn=512):
    M, K = x.shape
    N = w_bf16.shape[1]
    tn = min(tn, N)
    assert N % tn == 0
    return pl.pallas_call(
        _proj_kernel,
        out_shape=jax.ShapeDtypeStruct((M, N), jnp.float32),
        grid_spec=pltpu.PrefetchScalarGridSpec(
            num_scalar_prefetch=0,
            grid=(N // tn,),
            in_specs=[
                pl.BlockSpec((M, K), lambda j: (0, 0)),
                pl.BlockSpec((K, tn), lambda j: (0, j)),
                pl.BlockSpec((1, tn), lambda j: (0, j)),
            ],
            out_specs=pl.BlockSpec((M, tn), lambda j: (0, j)),
        ),
        compiler_params=pltpu.CompilerParams(
            dimension_semantics=("parallel",),
            vmem_limit_bytes=VMEM_LIMIT,
        ),
    )(x, w_bf16, b)


# ---------------------------------------------------------------------------
# Split-K input projection (avoids concatenating fw/bw hidden sequences):
#   out = a1 @ W_a + a2 @ W_b + bias
# ---------------------------------------------------------------------------
def _proj2_kernel(a1_ref, a2_ref, wa_ref, wb_ref, b_ref, o_ref):
    o_ref[...] = (
        jnp.dot(a1_ref[...].astype(jnp.bfloat16), wa_ref[...],
                preferred_element_type=jnp.float32)
        + jnp.dot(a2_ref[...].astype(jnp.bfloat16), wb_ref[...],
                  preferred_element_type=jnp.float32)
        + b_ref[...]
    )


def input_proj2(a1, a2, wa_bf16, wb_bf16, b, *, tn=512):
    M, K1 = a1.shape
    _, K2 = a2.shape
    N = wa_bf16.shape[1]
    tn = min(tn, N)
    assert N % tn == 0
    return pl.pallas_call(
        _proj2_kernel,
        out_shape=jax.ShapeDtypeStruct((M, N), jnp.float32),
        grid_spec=pltpu.PrefetchScalarGridSpec(
            num_scalar_prefetch=0,
            grid=(N // tn,),
            in_specs=[
                pl.BlockSpec((M, K1), lambda j: (0, 0)),
                pl.BlockSpec((M, K2), lambda j: (0, 0)),
                pl.BlockSpec((K1, tn), lambda j: (0, j)),
                pl.BlockSpec((K2, tn), lambda j: (0, j)),
                pl.BlockSpec((1, tn), lambda j: (0, j)),
            ],
            out_specs=pl.BlockSpec((M, tn), lambda j: (0, j)),
        ),
        compiler_params=pltpu.CompilerParams(
            dimension_semantics=("parallel",),
            vmem_limit_bytes=VMEM_LIMIT,
        ),
    )(a1, a2, wa_bf16, wb_bf16, b)


# ---------------------------------------------------------------------------
# Fused bidirectional LSTM recurrence.  The grid iterates over time (T);
# the forward direction processes timestep t and the backward direction
# processes timestep T-1-t (handled by the index_maps -- no array reversal).
# Inputs are the PRECOMPUTED input projections gates_in = x @ W_ih + b.
# PyTorch gate order: i, f, g, o ;  c' = f*c + i*g ; h' = o*tanh(c')
# ---------------------------------------------------------------------------
def _lstm_step(gin, h_scr, c_scr, whh_ref):
    """One LSTM cell update.  gin: (B, 4H) f32 = x@W_ih + b (precomputed)."""
    gates = gin + jnp.dot(h_scr[...].astype(jnp.bfloat16), whh_ref[...],
                          preferred_element_type=jnp.float32)
    H = h_scr.shape[-1]
    i_g = jax.nn.sigmoid(gates[:, 0 * H:1 * H])
    f_g = jax.nn.sigmoid(gates[:, 1 * H:2 * H])
    g_g = jnp.tanh(gates[:, 2 * H:3 * H])
    o_g = jax.nn.sigmoid(gates[:, 3 * H:4 * H])
    c_new = f_g * c_scr[...] + i_g * g_g
    h_new = o_g * jnp.tanh(c_new)
    c_scr[...] = c_new
    h_scr[...] = h_new
    return h_new


def _bilstm_seq_kernel(gf_ref, gb_ref, whf_ref, whb_ref,
                       of_ref, ob_ref, hf, cf, hb, cb):
    @pl.when(pl.program_id(0) == 0)
    def _():
        for s in (hf, cf, hb, cb):
            s[...] = jnp.zeros_like(s)

    of_ref[0] = _lstm_step(gf_ref[0], hf, cf, whf_ref)
    ob_ref[0] = _lstm_step(gb_ref[0], hb, cb, whb_ref)


def _bilstm_final_kernel(gf_ref, gb_ref, whf_ref, whb_ref,
                         of_ref, ob_ref, hf, cf, hb, cb):
    t = pl.program_id(0)

    @pl.when(t == 0)
    def _():
        for s in (hf, cf, hb, cb):
            s[...] = jnp.zeros_like(s)

    h_f = _lstm_step(gf_ref[0], hf, cf, whf_ref)
    h_b = _lstm_step(gb_ref[0], hb, cb, whb_ref)

    # Only the final hidden state per direction is needed (ht[-2] / ht[-1]).
    @pl.when(t == pl.num_programs(0) - 1)
    def _():
        of_ref[...] = h_f
        ob_ref[...] = h_b


def bilstm_layer_seq(gf, gb, whh_f, whh_b):
    """Returns the full hidden sequences (T,B,H) for both directions."""
    T, B, G = gf.shape
    H = whh_f.shape[0]
    return pl.pallas_call(
        _bilstm_seq_kernel,
        out_shape=(jax.ShapeDtypeStruct((T, B, H), jnp.float32),
                   jax.ShapeDtypeStruct((T, B, H), jnp.float32)),
        grid_spec=pltpu.PrefetchScalarGridSpec(
            num_scalar_prefetch=0,
            grid=(T,),
            in_specs=[
                pl.BlockSpec((1, B, G), lambda t: (t, 0, 0)),
                pl.BlockSpec((1, B, G), lambda t: (T - 1 - t, 0, 0)),
                pl.BlockSpec((H, G), lambda t: (0, 0)),
                pl.BlockSpec((H, G), lambda t: (0, 0)),
            ],
            out_specs=[
                pl.BlockSpec((1, B, H), lambda t: (t, 0, 0)),
                pl.BlockSpec((1, B, H), lambda t: (T - 1 - t, 0, 0)),
            ],
            scratch_shapes=[pltpu.VMEM((B, H), jnp.float32)] * 4,
        ),
        compiler_params=pltpu.CompilerParams(
            dimension_semantics=("arbitrary",),   # recurrent carry -> sequential
            vmem_limit_bytes=VMEM_LIMIT,
        ),
    )(gf, gb, whh_f, whh_b)


def bilstm_layer_final(gf, gb, whh_f, whh_b):
    """Returns only the final hidden state (B,H) of each direction."""
    T, B, G = gf.shape
    H = whh_f.shape[0]
    return pl.pallas_call(
        _bilstm_final_kernel,
        out_shape=(jax.ShapeDtypeStruct((B, H), jnp.float32),
                   jax.ShapeDtypeStruct((B, H), jnp.float32)),
        grid_spec=pltpu.PrefetchScalarGridSpec(
            num_scalar_prefetch=0,
            grid=(T,),
            in_specs=[
                pl.BlockSpec((1, B, G), lambda t: (t, 0, 0)),
                pl.BlockSpec((1, B, G), lambda t: (T - 1 - t, 0, 0)),
                pl.BlockSpec((H, G), lambda t: (0, 0)),
                pl.BlockSpec((H, G), lambda t: (0, 0)),
            ],
            out_specs=[
                pl.BlockSpec((B, H), lambda t: (0, 0)),
                pl.BlockSpec((B, H), lambda t: (0, 0)),
            ],
            scratch_shapes=[pltpu.VMEM((B, H), jnp.float32)] * 4,
        ),
        compiler_params=pltpu.CompilerParams(
            dimension_semantics=("arbitrary",),
            vmem_limit_bytes=VMEM_LIMIT,
        ),
    )(gf, gb, whh_f, whh_b)


# ---------------------------------------------------------------------------
# Classifier head: Linear -> Tanh -> Linear -> LogSoftmax, fused and tiled
# over the hidden (feature) dim of the head.  Dropouts are identity in eval.
# The class dim is pre-padded to 128 (padded biases = -1e30 so log-softmax
# over the padded columns equals log-softmax over the real classes).
# ---------------------------------------------------------------------------
def _head_kernel(x_ref, w1_ref, b1_ref, w2_ref, b2_ref, out_ref, acc_ref):
    j = pl.program_id(0)

    @pl.when(j == 0)
    def _():
        acc_ref[...] = jnp.zeros_like(acc_ref)

    h = jnp.tanh(
        jnp.dot(x_ref[...].astype(jnp.bfloat16), w1_ref[...],
                preferred_element_type=jnp.float32)
        + b1_ref[...]
    )
    acc_ref[...] += jnp.dot(h.astype(jnp.bfloat16), w2_ref[...],
                            preferred_element_type=jnp.float32)

    @pl.when(j == pl.num_programs(0) - 1)
    def _():
        logits = acc_ref[...] + b2_ref[...]
        m = jnp.max(logits, axis=-1, keepdims=True)
        lse = jnp.log(jnp.sum(jnp.exp(logits - m), axis=-1, keepdims=True)) + m
        out_ref[...] = logits - lse


def classifier_head(feat, w1_bf16, b1, w2_pad_bf16, b2_pad, *, tf=128):
    B, F = feat.shape
    C = w2_pad_bf16.shape[1]
    tf = min(tf, F)
    assert F % tf == 0
    return pl.pallas_call(
        _head_kernel,
        out_shape=jax.ShapeDtypeStruct((B, C), jnp.float32),
        grid_spec=pltpu.PrefetchScalarGridSpec(
            num_scalar_prefetch=0,
            grid=(F // tf,),
            in_specs=[
                pl.BlockSpec((B, F), lambda j: (0, 0)),    # feat (small rows)
                pl.BlockSpec((F, tf), lambda j: (0, j)),   # W1 column block
                pl.BlockSpec((1, tf), lambda j: (0, j)),   # b1 block
                pl.BlockSpec((tf, C), lambda j: (j, 0)),   # W2 row block
                pl.BlockSpec((1, C), lambda j: (0, 0)),    # b2 (padded classes)
            ],
            out_specs=pl.BlockSpec((B, C), lambda j: (0, 0)),
            scratch_shapes=[pltpu.VMEM((B, C), jnp.float32)],
        ),
        compiler_params=pltpu.CompilerParams(
            dimension_semantics=("arbitrary",),
            vmem_limit_bytes=VMEM_LIMIT,
        ),
    )(feat, w1_bf16, b1, w2_pad_bf16, b2_pad)


# ---------------------------------------------------------------------------
# Full forward pass (eval mode: dropouts are identity)
# ---------------------------------------------------------------------------
def model_forward(token_ids, params, *, n_cls=2):
    B, T = token_ids.shape

    # Embedding lookup (glue gather in plain JAX / XLA).
    x = params["emb"][token_ids]                       # (B, T, D) f32

    # Pad batch to a multiple of 8 (sublane alignment).
    B_pad = _round_up(B, 8)
    if B_pad != B:
        x = jnp.pad(x, ((0, B_pad - B), (0, 0), (0, 0)))
    x_tm = jnp.transpose(x, (1, 0, 2))                 # time-major (T, B_pad, D)
    D = x_tm.shape[-1]
    H = params["l0_fw_whh"].shape[0]

    # ----- layer 0: hoisted input projections (one big GEMM per direction) ---
    x_flat = x_tm.reshape(T * B_pad, D)
    g0f = input_proj(x_flat, params["l0_fw_wih"], params["l0_fw_b"]
                     ).reshape(T, B_pad, 4 * H)
    g0b = input_proj(x_flat, params["l0_bw_wih"], params["l0_bw_b"]
                     ).reshape(T, B_pad, 4 * H)

    # ----- layer 0: fused bidirectional recurrence (full sequences) ----------
    h0f, h0b = bilstm_layer_seq(g0f, g0b,
                                params["l0_fw_whh"], params["l0_bw_whh"])

    # ----- layer 1 input projections: split-K over (fw, bw) halves -----------
    h0f_flat = h0f.reshape(T * B_pad, H)
    h0b_flat = h0b.reshape(T * B_pad, H)
    g1f = input_proj2(h0f_flat, h0b_flat,
                      params["l1_fw_wih_f"], params["l1_fw_wih_b"],
                      params["l1_fw_b"]).reshape(T, B_pad, 4 * H)
    g1b = input_proj2(h0f_flat, h0b_flat,
                      params["l1_bw_wih_f"], params["l1_bw_wih_b"],
                      params["l1_bw_b"]).reshape(T, B_pad, 4 * H)

    # ----- layer 1: fused bidirectional recurrence, final states only --------
    htf, htb = bilstm_layer_final(g1f, g1b,
                                  params["l1_fw_whh"], params["l1_bw_whh"])

    # ht[-2] = final-layer forward last hidden, ht[-1] = backward last hidden.
    feat = jnp.concatenate([htf, htb], axis=-1)        # (B_pad, 2H)

    # Dropout1 / Dropout2 are identity in eval mode.
    log_probs = classifier_head(feat, params["w1"], params["b1"],
                                params["w2_pad"], params["b2_pad"])
    return log_probs[:B, :n_cls]


# ---------------------------------------------------------------------------
# Deterministic parameter init (weights stored pre-transposed: (in, out)).
# NOTE: when porting real PyTorch weights, the single combined LSTM bias here
# must equal b_ih + b_hh.
# ---------------------------------------------------------------------------
def init_params(key, vocab, embed_dim, hidden, n_cls=2, n_cls_pad=128):
    ks = iter(jax.random.split(key, 32))

    def dense(shape, scale=0.05, dtype=jnp.float32):
        return (scale * jax.random.normal(next(ks), shape)).astype(dtype)

    G = 4 * hidden
    p = {
        "emb": dense((vocab, embed_dim), scale=0.1),
        # layer 0 (input = embed_dim); bf16 weights, f32 combined bias
        "l0_fw_wih": dense((embed_dim, G), dtype=jnp.bfloat16),
        "l0_fw_whh": dense((hidden, G), dtype=jnp.bfloat16),
        "l0_fw_b":   dense((1, G)),
        "l0_bw_wih": dense((embed_dim, G), dtype=jnp.bfloat16),
        "l0_bw_whh": dense((hidden, G), dtype=jnp.bfloat16),
        "l0_bw_b":   dense((1, G)),
        # layer 1 (input = concat(fw, bw) = 2H); W_ih split along K
        "l1_fw_wih_f": dense((hidden, G), dtype=jnp.bfloat16),
        "l1_fw_wih_b": dense((hidden, G), dtype=jnp.bfloat16),
        "l1_fw_whh":   dense((hidden, G), dtype=jnp.bfloat16),
        "l1_fw_b":     dense((1, G)),
        "l1_bw_wih_f": dense((hidden, G), dtype=jnp.bfloat16),
        "l1_bw_wih_b": dense((hidden, G), dtype=jnp.bfloat16),
        "l1_bw_whh":   dense((hidden, G), dtype=jnp.bfloat16),
        "l1_bw_b":     dense((1, G)),
        # classifier head
        "w1": dense((2 * hidden, 2 * hidden), dtype=jnp.bfloat16),
        "b1": dense((1, 2 * hidden)),
    }
    # Second linear: pad classes n_cls -> n_cls_pad for a lane-dense output.
    w2 = dense((2 * hidden, n_cls))
    b2 = dense((1, n_cls))
    w2_pad = jnp.zeros((2 * hidden, n_cls_pad), jnp.float32).at[:, :n_cls].set(w2)
    b2_pad = jnp.full((1, n_cls_pad), -1e30, jnp.float32).at[:, :n_cls].set(b2)
    p["w2_pad"] = w2_pad.astype(jnp.bfloat16)
    p["b2_pad"] = b2_pad
    return p


if __name__ == "__main__":
    # Small synthetic sizes consistent with the module's forward.
    VOCAB, EMBED_DIM, HIDDEN = 50, 32, 128
    B, T = 2, 8

    key = jax.random.PRNGKey(0)
    k_tok, k_par = jax.random.split(key)

    token_ids = jax.random.randint(k_tok, (B, T), 0, VOCAB, dtype=jnp.int32)
    params = init_params(k_par, VOCAB, EMBED_DIM, HIDDEN, n_cls=2)

    fwd = jax.jit(model_forward, static_argnames=("n_cls",))
    out = jax.block_until_ready(fwd(token_ids, params, n_cls=2))

    assert out.shape == (B, 2)
    # log-softmax rows should (log-)sum to ~1
    assert bool(jnp.all(jnp.abs(jnp.sum(jnp.exp(out), axis=-1) - 1.0) < 1e-3))
    print("KERNEL_OK")
</pallas_src>

<mosaic_0001>
module attributes {stable_mosaic.version = 11 : i64} {
  func.func @_proj2_kernel(%arg0: i32, %arg1: memref<64x128xf32, #tpu.memory_space<vmem>>, %arg2: memref<64x128xf32, #tpu.memory_space<vmem>>, %arg3: memref<128x512xbf16, #tpu.memory_space<vmem>>, %arg4: memref<128x512xbf16, #tpu.memory_space<vmem>>, %arg5: memref<1x512xf32, #tpu.memory_space<vmem>>, %arg6: memref<64x512xf32, #tpu.memory_space<vmem>>) attributes {dimension_semantics = [#tpu.dimension_semantics<parallel>], iteration_bounds = array<i64: 1>, scalar_prefetch = 0 : i64, scratch_operands = 0 : i64, tpu.core_type = #tpu.core_type<tc>, window_params = [{pipeline_mode = #tpu.pipeline_mode<synchronous>, transform_indices = @transform_0, window_bounds = array<i64: 64, 128>}, {pipeline_mode = #tpu.pipeline_mode<synchronous>, transform_indices = @transform_1, window_bounds = array<i64: 64, 128>}, {transform_indices = @transform_2, window_bounds = array<i64: 128, 512>}, {transform_indices = @transform_3, window_bounds = array<i64: 128, 512>}, {transform_indices = @transform_4, window_bounds = array<i64: 1, 512>}, {transform_indices = @transform_5, window_bounds = array<i64: 64, 512>}]} {
    %c0 = arith.constant 0 : index
    %c0_0 = arith.constant 0 : index
    %0 = vector.load %arg1[%c0, %c0_0] : memref<64x128xf32, #tpu.memory_space<vmem>>, vector<64x128xf32>
    %1 = arith.truncf %0 : vector<64x128xf32> to vector<64x128xbf16>
    %c0_1 = arith.constant 0 : index
    %c0_2 = arith.constant 0 : index
    %2 = vector.load %arg3[%c0_1, %c0_2] : memref<128x512xbf16, #tpu.memory_space<vmem>>, vector<128x512xbf16>
    %cst = arith.constant dense<0.000000e+00> : vector<64x512xf32>
    %3 = tpu.matmul %1, %2, %cst {dimension_numbers = #tpu.dot_dimension_numbers<[1], [0], [0], [1], [0, 0, 1, 1], [], []>} : vector<64x128xbf16>, vector<128x512xbf16>, vector<64x512xf32> -> vector<64x512xf32>
    %c0_3 = arith.constant 0 : index
    %c0_4 = arith.constant 0 : index
    %4 = vector.load %arg2[%c0_3, %c0_4] : memref<64x128xf32, #tpu.memory_space<vmem>>, vector<64x128xf32>
    %5 = arith.truncf %4 : vector<64x128xf32> to vector<64x128xbf16>
    %c0_5 = arith.constant 0 : index
    %c0_6 = arith.constant 0 : index
    %6 = vector.load %arg4[%c0_5, %c0_6] : memref<128x512xbf16, #tpu.memory_space<vmem>>, vector<128x512xbf16>
    %cst_7 = arith.constant dense<0.000000e+00> : vector<64x512xf32>
    %7 = tpu.matmul %5, %6, %cst_7 {dimension_numbers = #tpu.dot_dimension_numbers<[1], [0], [0], [1], [0, 0, 1, 1], [], []>} : vector<64x128xbf16>, vector<128x512xbf16>, vector<64x512xf32> -> vector<64x512xf32>
    %8 = arith.addf %3, %7 : vector<64x512xf32>
    %c0_8 = arith.constant 0 : index
    %c0_9 = arith.constant 0 : index
    %9 = vector.load %arg5[%c0_8, %c0_9] : memref<1x512xf32, #tpu.memory_space<vmem>>, vector<1x512xf32>
    %10 = vector.broadcast %9 : vector<1x512xf32> to vector<64x512xf32>
    %11 = arith.addf %8, %10 : vector<64x512xf32>
    %c0_10 = arith.constant 0 : index
    %c0_11 = arith.constant 0 : index
    %12 = vector.load %arg6[%c0_10, %c0_11] : memref<64x512xf32, #tpu.memory_space<vmem>>, vector<64x512xf32>
    tpu.vector_store %arg6[%c0_10, %c0_11], %11 {strides = array<i32>} : memref<64x512xf32, #tpu.memory_space<vmem>>, vector<64x512xf32>,
    return
  }
  func.func @transform_0(%arg0: i32) -> (i32, i32) {
    %c0_i32 = arith.constant 0 : i32
    %c0_i32_0 = arith.constant 0 : i32
    %c0_i32_1 = arith.constant 0 : i32
    return %c0_i32, %c0_i32_0 : i32, i32
  }
  func.func @transform_1(%arg0: i32) -> (i32, i32) {
    %c0_i32 = arith.constant 0 : i32
    %c0_i32_0 = arith.constant 0 : i32
    %c0_i32_1 = arith.constant 0 : i32
    return %c0_i32, %c0_i32_0 : i32, i32
  }
  func.func @transform_2(%arg0: i32) -> (i32, i32) {
    %c0_i32 = arith.constant 0 : i32
    %c0_i32_0 = arith.constant 0 : i32
    return %c0_i32, %arg0 : i32, i32
  }
  func.func @transform_3(%arg0: i32) -> (i32, i32) {
    %c0_i32 = arith.constant 0 : i32
    %c0_i32_0 = arith.constant 0 : i32
    return %c0_i32, %arg0 : i32, i32
  }
  func.func @transform_4(%arg0: i32) -> (i32, i32) {
    %c0_i32 = arith.constant 0 : i32
    %c0_i32_0 = arith.constant 0 : i32
    return %c0_i32, %arg0 : i32, i32
  }
  func.func @transform_5(%arg0: i32) -> (i32, i32) {
    %c0_i32 = arith.constant 0 : i32
    %c0_i32_0 = arith.constant 0 : i32
    return %c0_i32, %arg0 : i32, i32
  }
}

module attributes {stable_mosaic.version = 11 : i64} {
  func.func @_proj_kernel(%arg0: i32, %arg1: memref<64x32xf32, #tpu.memory_space<vmem>>, %arg2: memref<32x512xbf16, #tpu.memory_space<vmem>>, %arg3: memref<1x512xf32, #tpu.memory_space<vmem>>, %arg4: memref<64x512xf32, #tpu.memory_space<vmem>>) attributes {dimension_semantics = [#tpu.dimension_semantics<parallel>], iteration_bounds = array<i64: 1>, scalar_prefetch = 0 : i64, scratch_operands = 0 : i64, tpu.core_type = #tpu.core_type<tc>, window_params = [{pipeline_mode = #tpu.pipeline_mode<synchronous>, transform_indices = @transform_0, window_bounds = array<i64: 64, 32>}, {transform_indices = @transform_1, window_bounds = array<i64: 32, 512>}, {transform_indices = @transform_2, window_bounds = array<i64: 1, 512>}, {transform_indices = @transform_3, window_bounds = array<i64: 64, 512>}]} {
    %c0 = arith.constant 0 : index
    %c0_0 = arith.constant 0 : index
    %0 = vector.load %arg1[%c0, %c0_0] : memref<64x32xf32, #tpu.memory_space<vmem>>, vector<64x32xf32>
    %1 = arith.truncf %0 : vector<64x32xf32> to vector<64x32xbf16>
    %c0_1 = arith.constant 0 : index
    %c0_2 = arith.constant 0 : index
    %2 = vector.load %arg2[%c0_1, %c0_2] : memref<32x512xbf16, #tpu.memory_space<vmem>>, vector<32x512xbf16>
    %cst = arith.constant dense<0.000000e+00> : vector<64x512xf32>
    %3 = tpu.matmul %1, %2, %cst {dimension_numbers = #tpu.dot_dimension_numbers<[1], [0], [0], [1], [0, 0, 1, 1], [], []>} : vector<64x32xbf16>, vector<32x512xbf16>, vector<64x512xf32> -> vector<64x512xf32>
    %c0_3 = arith.constant 0 : index
    %c0_4 = arith.constant 0 : index
    %4 = vector.load %arg3[%c0_3, %c0_4] : memref<1x512xf32, #tpu.memory_space<vmem>>, vector<1x512xf32>
    %5 = vector.broadcast %4 : vector<1x512xf32> to vector<64x512xf32>
    %6 = arith.addf %3, %5 : vector<64x512xf32>
    %c0_5 = arith.constant 0 : index
    %c0_6 = arith.constant 0 : index
    %7 = vector.load %arg4[%c0_5, %c0_6] : memref<64x512xf32, #tpu.memory_space<vmem>>, vector<64x512xf32>
    tpu.vector_store %arg4[%c0_5, %c0_6], %6 {strides = array<i32>} : memref<64x512xf32, #tpu.memory_space<vmem>>, vector<64x512xf32>,
    return
  }
  func.func @transform_0(%arg0: i32) -> (i32, i32) {
    %c0_i32 = arith.constant 0 : i32
    %c0_i32_0 = arith.constant 0 : i32
    %c0_i32_1 = arith.constant 0 : i32
    return %c0_i32, %c0_i32_0 : i32, i32
  }
  func.func @transform_1(%arg0: i32) -> (i32, i32) {
    %c0_i32 = arith.constant 0 : i32
    %c0_i32_0 = arith.constant 0 : i32
    return %c0_i32, %arg0 : i32, i32
  }
  func.func @transform_2(%arg0: i32) -> (i32, i32) {
    %c0_i32 = arith.constant 0 : i32
    %c0_i32_0 = arith.constant 0 : i32
    return %c0_i32, %arg0 : i32, i32
  }
  func.func @transform_3(%arg0: i32) -> (i32, i32) {
    %c0_i32 = arith.constant 0 : i32
    %c0_i32_0 = arith.constant 0 : i32
    return %c0_i32, %arg0 : i32, i32
  }
}

module attributes {stable_mosaic.version = 11 : i64} {
  func.func @_bilstm_final_kernel(%arg0: i32, %arg1: memref<1x8x512xf32, #tpu.memory_space<vmem>>, %arg2: memref<1x8x512xf32, #tpu.memory_space<vmem>>, %arg3: memref<128x512xbf16, #tpu.memory_space<vmem>>, %arg4: memref<128x512xbf16, #tpu.memory_space<vmem>>, %arg5: memref<8x128xf32, #tpu.memory_space<vmem>>, %arg6: memref<8x128xf32, #tpu.memory_space<vmem>>, %arg7: memref<8x128xf32, #tpu.memory_space<vmem>>, %arg8: memref<8x128xf32, #tpu.memory_space<vmem>>, %arg9: memref<8x128xf32, #tpu.memory_space<vmem>>, %arg10: memref<8x128xf32, #tpu.memory_space<vmem>>) attributes {dimension_semantics = [#tpu.dimension_semantics<arbitrary>], iteration_bounds = array<i64: 8>, scalar_prefetch = 0 : i64, scratch_operands = 4 : i64, tpu.core_type = #tpu.core_type<tc>, window_params = [{transform_indices = @transform_0, window_bounds = array<i64: 1, 8, 512>}, {transform_indices = @transform_1, window_bounds = array<i64: 1, 8, 512>}, {pipeline_mode = #tpu.pipeline_mode<synchronous>, transform_indices = @transform_2, window_bounds = array<i64: 128, 512>}, {pipeline_mode = #tpu.pipeline_mode<synchronous>, transform_indices = @transform_3, window_bounds = array<i64: 128, 512>}, {pipeline_mode = #tpu.pipeline_mode<synchronous>, transform_indices = @transform_4, window_bounds = array<i64: 8, 128>}, {pipeline_mode = #tpu.pipeline_mode<synchronous>, transform_indices = @transform_5, window_bounds = array<i64: 8, 128>}]} {
    %c0_i32 = arith.constant 0 : i32
    %0 = arith.cmpi eq, %arg0, %c0_i32 : i32
    %1 = arith.extui %0 : i1 to i32
    %c0_i32_0 = arith.constant 0 : i32
    %2 = arith.cmpi ne, %1, %c0_i32_0 : i32
    scf.if %2 {
      %cst_34 = arith.constant 0.000000e+00 : f32
      %76 = vector.broadcast %cst_34 : f32 to vector<8x128xf32>
      %c0_35 = arith.constant 0 : index
      %c0_36 = arith.constant 0 : index
      %77 = vector.load %arg7[%c0_35, %c0_36] : memref<8x128xf32, #tpu.memory_space<vmem>>, vector<8x128xf32>
      tpu.vector_store %arg7[%c0_35, %c0_36], %76 {strides = array<i32>} : memref<8x128xf32, #tpu.memory_space<vmem>>, vector<8x128xf32>,
      %cst_37 = arith.constant 0.000000e+00 : f32
      %78 = vector.broadcast %cst_37 : f32 to vector<8x128xf32>
      %c0_38 = arith.constant 0 : index
      %c0_39 = arith.constant 0 : index
      %79 = vector.load %arg8[%c0_38, %c0_39] : memref<8x128xf32, #tpu.memory_space<vmem>>, vector<8x128xf32>
      tpu.vector_store %arg8[%c0_38, %c0_39], %78 {strides = array<i32>} : memref<8x128xf32, #tpu.memory_space<vmem>>, vector<8x128xf32>,
      %cst_40 = arith.constant 0.000000e+00 : f32
      %80 = vector.broadcast %cst_40 : f32 to vector<8x128xf32>
      %c0_41 = arith.constant 0 : index
      %c0_42 = arith.constant 0 : index
      %81 = vector.load %arg9[%c0_41, %c0_42] : memref<8x128xf32, #tpu.memory_space<vmem>>, vector<8x128xf32>
      tpu.vector_store %arg9[%c0_41, %c0_42], %80 {strides = array<i32>} : memref<8x128xf32, #tpu.memory_space<vmem>>, vector<8x128xf32>,
      %cst_43 = arith.constant 0.000000e+00 : f32
      %82 = vector.broadcast %cst_43 : f32 to vector<8x128xf32>
      %c0_44 = arith.constant 0 : index
      %c0_45 = arith.constant 0 : index
      %83 = vector.load %arg10[%c0_44, %c0_45] : memref<8x128xf32, #tpu.memory_space<vmem>>, vector<8x128xf32>
      tpu.vector_store %arg10[%c0_44, %c0_45], %82 {strides = array<i32>} : memref<8x128xf32, #tpu.memory_space<vmem>>, vector<8x128xf32>,
    } else {
    }
    %c0 = arith.constant 0 : index
    %c0_1 = arith.constant 0 : index
    %c0_2 = arith.constant 0 : index
    %3 = vector.load %arg1[%c0, %c0_1, %c0_2] : memref<1x8x512xf32, #tpu.memory_space<vmem>>, vector<1x8x512xf32>
    %4 = vector.shape_cast %3 : vector<1x8x512xf32> to vector<8x512xf32>
    %c0_3 = arith.constant 0 : index
    %c0_4 = arith.constant 0 : index
    %5 = vector.load %arg7[%c0_3, %c0_4] : memref<8x128xf32, #tpu.memory_space<vmem>>, vector<8x128xf32>
    %6 = arith.truncf %5 : vector<8x128xf32> to vector<8x128xbf16>
    %c0_5 = arith.constant 0 : index
    %c0_6 = arith.constant 0 : index
    %7 = vector.load %arg3[%c0_5, %c0_6] : memref<128x512xbf16, #tpu.memory_space<vmem>>, vector<128x512xbf16>
    %cst = arith.constant dense<0.000000e+00> : vector<8x512xf32>
    %8 = tpu.matmul %6, %7, %cst {dimension_numbers = #tpu.dot_dimension_numbers<[1], [0], [0], [1], [0, 0, 1, 1], [], []>} : vector<8x128xbf16>, vector<128x512xbf16>, vector<8x512xf32> -> vector<8x512xf32>
    %9 = arith.addf %4, %8 : vector<8x512xf32>
    %10 = vector.extract_strided_slice %9 {offsets = [0, 0], sizes = [8, 128], strides = [1, 1]} : vector<8x512xf32> to vector<8x128xf32>
    %11 = arith.negf %10 : vector<8x128xf32>
    %12 = math.exp %11 : vector<8x128xf32>
    %cst_7 = arith.constant 1.000000e+00 : f32
    %13 = vector.broadcast %cst_7 : f32 to vector<8x128xf32>
    %14 = arith.addf %13, %12 : vector<8x128xf32>
    %15 = arith.divf %13, %14 : vector<8x128xf32>
    %16 = vector.extract_strided_slice %9 {offsets = [0, 128], sizes = [8, 128], strides = [1, 1]} : vector<8x512xf32> to vector<8x128xf32>
    %17 = arith.negf %16 : vector<8x128xf32>
    %18 = math.exp %17 : vector<8x128xf32>
    %cst_8 = arith.constant 1.000000e+00 : f32
    %19 = vector.broadcast %cst_8 : f32 to vector<8x128xf32>
    %20 = arith.addf %19, %18 : vector<8x128xf32>
    %21 = arith.divf %19, %20 : vector<8x128xf32>
    %22 = vector.extract_strided_slice %9 {offsets = [0, 256], sizes = [8, 128], strides = [1, 1]} : vector<8x512xf32> to vector<8x128xf32>
    %23 = math.tanh %22 : vector<8x128xf32>
    %24 = vector.extract_strided_slice %9 {offsets = [0, 384], sizes = [8, 128], strides = [1, 1]} : vector<8x512xf32> to vector<8x128xf32>
    %25 = arith.negf %24 : vector<8x128xf32>
    %26 = math.exp %25 : vector<8x128xf32>
    %cst_9 = arith.constant 1.000000e+00 : f32
    %27 = vector.broadcast %cst_9 : f32 to vector<8x128xf32>
    %28 = arith.addf %27, %26 : vector<8x128xf32>
    %29 = arith.divf %27, %28 : vector<8x128xf32>
    %c0_10 = arith.constant 0 : index
    %c0_11 = arith.constant 0 : index
    %30 = vector.load %arg8[%c0_10, %c0_11] : memref<8x128xf32, #tpu.memory_space<vmem>>, vector<8x128xf32>
    %31 = arith.mulf %21, %30 : vector<8x128xf32>
    %32 = arith.mulf %15, %23 : vector<8x128xf32>
    %33 = arith.addf %31, %32 : vector<8x128xf32>
    %34 = math.tanh %33 : vector<8x128xf32>
    %35 = arith.mulf %29, %34 : vector<8x128xf32>
    %c0_12 = arith.constant 0 : index
    %c0_13 = arith.constant 0 : index
    %36 = vector.load %arg8[%c0_12, %c0_13] : memref<8x128xf32, #tpu.memory_space<vmem>>, vector<8x128xf32>
    tpu.vector_store %arg8[%c0_12, %c0_13], %33 {strides = array<i32>} : memref<8x128xf32, #tpu.memory_space<vmem>>, vector<8x128xf32>,
    %c0_14 = arith.constant 0 : index
    %c0_15 = arith.constant 0 : index
    %37 = vector.load %arg7[%c0_14, %c0_15] : memref<8x128xf32, #tpu.memory_space<vmem>>, vector<8x128xf32>
    tpu.vector_store %arg7[%c0_14, %c0_15], %35 {strides = array<i32>} : memref<8x128xf32, #tpu.memory_space<vmem>>, vector<8x128xf32>,
    %c0_16 = arith.constant 0 : index
    %c0_17 = arith.constant 0 : index
    %c0_18 = arith.constant 0 : index
    %38 = vector.load %arg2[%c0_16, %c0_17, %c0_18] : memref<1x8x512xf32, #tpu.memory_space<vmem>>, vector<1x8x512xf32>
    %39 = vector.shape_cast %38 : vector<1x8x512xf32> to vector<8x512xf32>
    %c0_19 = arith.constant 0 : index
    %c0_20 = arith.constant 0 : index
    %40 = vector.load %arg9[%c0_19, %c0_20] : memref<8x128xf32, #tpu.memory_space<vmem>>, vector<8x128xf32>
    %41 = arith.truncf %40 : vector<8x128xf32> to vector<8x128xbf16>
    %c0_21 = arith.constant 0 : index
    %c0_22 = arith.constant 0 : index
    %42 = vector.load %arg4[%c0_21, %c0_22] : memref<128x512xbf16, #tpu.memory_space<vmem>>, vector<128x512xbf16>
    %cst_23 = arith.constant dense<0.000000e+00> : vector<8x512xf32>
    %43 = tpu.matmul %41, %42, %cst_23 {dimension_numbers = #tpu.dot_dimension_numbers<[1], [0], [0], [1], [0, 0, 1, 1], [], []>} : vector<8x128xbf16>, vector<128x512xbf16>, vector<8x512xf32> -> vector<8x512xf32>
    %44 = arith.addf %39, %43 : vector<8x512xf32>
    %45 = vector.extract_strided_slice %44 {offsets = [0, 0], sizes = [8, 128], strides = [1, 1]} : vector<8x512xf32> to vector<8x128xf32>
    %46 = arith.negf %45 : vector<8x128xf32>
    %47 = math.exp %46 : vector<8x128xf32>
    %cst_24 = arith.constant 1.000000e+00 : f32
    %48 = vector.broadcast %cst_24 : f32 to vector<8x128xf32>
    %49 = arith.addf %48, %47 : vector<8x128xf32>
    %50 = arith.divf %48, %49 : vector<8x128xf32>
    %51 = vector.extract_strided_slice %44 {offsets = [0, 128], sizes = [8, 128], strides = [1, 1]} : vector<8x512xf32> to vector<8x128xf32>
    %52 = arith.negf %51 : vector<8x128xf32>
    %53 = math.exp %52 : vector<8x128xf32>
    %cst_25 = arith.constant 1.000000e+00 : f32
    %54 = vector.broadcast %cst_25 : f32 to vector<8x128xf32>
    %55 = arith.addf %54, %53 : vector<8x128xf32>
    %56 = arith.divf %54, %55 : vector<8x128xf32>
    %57 = vector.extract_strided_slice %44 {offsets = [0, 256], sizes = [8, 128], strides = [1, 1]} : vector<8x512xf32> to vector<8x128xf32>
    %58 = math.tanh %57 : vector<8x128xf32>
    %59 = vector.extract_strided_slice %44 {offsets = [0, 384], sizes = [8, 128], strides = [1, 1]} : vector<8x512xf32> to vector<8x128xf32>
    %60 = arith.negf %59 : vector<8x128xf32>
    %61 = math.exp %60 : vector<8x128xf32>
    %cst_26 = arith.constant 1.000000e+00 : f32
    %62 = vector.broadcast %cst_26 : f32 to vector<8x128xf32>
    %63 = arith.addf %62, %61 : vector<8x128xf32>
    %64 = arith.divf %62, %63 : vector<8x128xf32>
    %c0_27 = arith.constant 0 : index
    %c0_28 = arith.constant 0 : index
    %65 = vector.load %arg10[%c0_27, %c0_28] : memref<8x128xf32, #tpu.memory_space<vmem>>, vector<8x128xf32>
    %66 = arith.mulf %56, %65 : vector<8x128xf32>
    %67 = arith.mulf %50, %58 : vector<8x128xf32>
    %68 = arith.addf %66, %67 : vector<8x128xf32>
    %69 = math.tanh %68 : vector<8x128xf32>
    %70 = arith.mulf %64, %69 : vector<8x128xf32>
    %c0_29 = arith.constant 0 : index
    %c0_30 = arith.constant 0 : index
    %71 = vector.load %arg10[%c0_29, %c0_30] : memref<8x128xf32, #tpu.memory_space<vmem>>, vector<8x128xf32>
    tpu.vector_store %arg10[%c0_29, %c0_30], %68 {strides = array<i32>} : memref<8x128xf32, #tpu.memory_space<vmem>>, vector<8x128xf32>,
    %c0_31 = arith.constant 0 : index
    %c0_32 = arith.constant 0 : index
    %72 = vector.load %arg9[%c0_31, %c0_32] : memref<8x128xf32, #tpu.memory_space<vmem>>, vector<8x128xf32>
    tpu.vector_store %arg9[%c0_31, %c0_32], %70 {strides = array<i32>} : memref<8x128xf32, #tpu.memory_space<vmem>>, vector<8x128xf32>,
    %c7_i32 = arith.constant 7 : i32
    %73 = arith.cmpi eq, %arg0, %c7_i32 : i32
    %74 = arith.extui %73 : i1 to i32
    %c0_i32_33 = arith.constant 0 : i32
    %75 = arith.cmpi ne, %74, %c0_i32_33 : i32
    scf.if %75 {
      %c0_34 = arith.constant 0 : index
      %c0_35 = arith.constant 0 : index
      %76 = vector.load %arg5[%c0_34, %c0_35] : memref<8x128xf32, #tpu.memory_space<vmem>>, vector<8x128xf32>
      tpu.vector_store %arg5[%c0_34, %c0_35], %35 {strides = array<i32>} : memref<8x128xf32, #tpu.memory_space<vmem>>, vector<8x128xf32>,
      %c0_36 = arith.constant 0 : index
      %c0_37 = arith.constant 0 : index
      %77 = vector.load %arg6[%c0_36, %c0_37] : memref<8x128xf32, #tpu.memory_space<vmem>>, vector<8x128xf32>
      tpu.vector_store %arg6[%c0_36, %c0_37], %70 {strides = array<i32>} : memref<8x128xf32, #tpu.memory_space<vmem>>, vector<8x128xf32>,
    } else {
    }
    return
  }
  func.func @transform_0(%arg0: i32) -> (i32, i32, i32) {
    %c0_i32 = arith.constant 0 : i32
    %c0_i32_0 = arith.constant 0 : i32
    %c0_i32_1 = arith.constant 0 : i32
    return %arg0, %c0_i32, %c0_i32_0 : i32, i32, i32
  }
  func.func @transform_1(%arg0: i32) -> (i32, i32, i32) {
    %c7_i32 = arith.constant 7 : i32
    %0 = arith.subi %c7_i32, %arg0 : i32
    %c0_i32 = arith.constant 0 : i32
    %c0_i32_0 = arith.constant 0 : i32
    %c0_i32_1 = arith.constant 0 : i32
    return %0, %c0_i32, %c0_i32_0 : i32, i32, i32
  }
  func.func @transform_2(%arg0: i32) -> (i32, i32) {
    %c0_i32 = arith.constant 0 : i32
    %c0_i32_0 = arith.constant 0 : i32
    %c0_i32_1 = arith.constant 0 : i32
    return %c0_i32, %c0_i32_0 : i32, i32
  }
  func.func @transform_3(%arg0: i32) -> (i32, i32) {
    %c0_i32 = arith.constant 0 : i32
    %c0_i32_0 = arith.constant 0 : i32
    %c0_i32_1 = arith.constant 0 : i32
    return %c0_i32, %c0_i32_0 : i32, i32
  }
  func.func @transform_4(%arg0: i32) -> (i32, i32) {
    %c0_i32 = arith.constant 0 : i32
    %c0_i32_0 = arith.constant 0 : i32
    %c0_i32_1 = arith.constant 0 : i32
    return %c0_i32, %c0_i32_0 : i32, i32
  }
  func.func @transform_5(%arg0: i32) -> (i32, i32) {
    %c0_i32 = arith.constant 0 : i32
    %c0_i32_0 = arith.constant 0 : i32
    %c0_i32_1 = arith.constant 0 : i32
    return %c0_i32, %c0_i32_0 : i32, i32
  }
}

module attributes {stable_mosaic.version = 11 : i64} {
  func.func @_bilstm_seq_kernel(%arg0: i32, %arg1: memref<1x8x512xf32, #tpu.memory_space<vmem>>, %arg2: memref<1x8x512xf32, #tpu.memory_space<vmem>>, %arg3: memref<128x512xbf16, #tpu.memory_space<vmem>>, %arg4: memref<128x512xbf16, #tpu.memory_space<vmem>>, %arg5: memref<1x8x128xf32, #tpu.memory_space<vmem>>, %arg6: memref<1x8x128xf32, #tpu.memory_space<vmem>>, %arg7: memref<8x128xf32, #tpu.memory_space<vmem>>, %arg8: memref<8x128xf32, #tpu.memory_space<vmem>>, %arg9: memref<8x128xf32, #tpu.memory_space<vmem>>, %arg10: memref<8x128xf32, #tpu.memory_space<vmem>>) attributes {dimension_semantics = [#tpu.dimension_semantics<arbitrary>], iteration_bounds = array<i64: 8>, scalar_prefetch = 0 : i64, scratch_operands = 4 : i64, tpu.core_type = #tpu.core_type<tc>, window_params = [{transform_indices = @transform_0, window_bounds = array<i64: 1, 8, 512>}, {transform_indices = @transform_1, window_bounds = array<i64: 1, 8, 512>}, {pipeline_mode = #tpu.pipeline_mode<synchronous>, transform_indices = @transform_2, window_bounds = array<i64: 128, 512>}, {pipeline_mode = #tpu.pipeline_mode<synchronous>, transform_indices = @transform_3, window_bounds = array<i64: 128, 512>}, {transform_indices = @transform_4, window_bounds = array<i64: 1, 8, 128>}, {transform_indices = @transform_5, window_bounds = array<i64: 1, 8, 128>}]} {
    %c0_i32 = arith.constant 0 : i32
    %0 = arith.cmpi eq, %arg0, %c0_i32 : i32
    %1 = arith.extui %0 : i1 to i32
    %c0_i32_0 = arith.constant 0 : i32
    %2 = arith.cmpi ne, %1, %c0_i32_0 : i32
    scf.if %2 {
      %cst_39 = arith.constant 0.000000e+00 : f32
      %79 = vector.broadcast %cst_39 : f32 to vector<8x128xf32>
      %c0_40 = arith.constant 0 : index
      %c0_41 = arith.constant 0 : index
      %80 = vector.load %arg7[%c0_40, %c0_41] : memref<8x128xf32, #tpu.memory_space<vmem>>, vector<8x128xf32>
      tpu.vector_store %arg7[%c0_40, %c0_41], %79 {strides = array<i32>} : memref<8x128xf32, #tpu.memory_space<vmem>>, vector<8x128xf32>,
      %cst_42 = arith.constant 0.000000e+00 : f32
      %81 = vector.broadcast %cst_42 : f32 to vector<8x128xf32>
      %c0_43 = arith.constant 0 : index
      %c0_44 = arith.constant 0 : index
      %82 = vector.load %arg8[%c0_43, %c0_44] : memref<8x128xf32, #tpu.memory_space<vmem>>, vector<8x128xf32>
      tpu.vector_store %arg8[%c0_43, %c0_44], %81 {strides = array<i32>} : memref<8x128xf32, #tpu.memory_space<vmem>>, vector<8x128xf32>,
      %cst_45 = arith.constant 0.000000e+00 : f32
      %83 = vector.broadcast %cst_45 : f32 to vector<8x128xf32>
      %c0_46 = arith.constant 0 : index
      %c0_47 = arith.constant 0 : index
      %84 = vector.load %arg9[%c0_46, %c0_47] : memref<8x128xf32, #tpu.memory_space<vmem>>, vector<8x128xf32>
      tpu.vector_store %arg9[%c0_46, %c0_47], %83 {strides = array<i32>} : memref<8x128xf32, #tpu.memory_space<vmem>>, vector<8x128xf32>,
      %cst_48 = arith.constant 0.000000e+00 : f32
      %85 = vector.broadcast %cst_48 : f32 to vector<8x128xf32>
      %c0_49 = arith.constant 0 : index
      %c0_50 = arith.constant 0 : index
      %86 = vector.load %arg10[%c0_49, %c0_50] : memref<8x128xf32, #tpu.memory_space<vmem>>, vector<8x128xf32>
      tpu.vector_store %arg10[%c0_49, %c0_50], %85 {strides = array<i32>} : memref<8x128xf32, #tpu.memory_space<vmem>>, vector<8x128xf32>,
    } else {
    }
    %c0 = arith.constant 0 : index
    %c0_1 = arith.constant 0 : index
    %c0_2 = arith.constant 0 : index
    %3 = vector.load %arg1[%c0, %c0_1, %c0_2] : memref<1x8x512xf32, #tpu.memory_space<vmem>>, vector<1x8x512xf32>
    %4 = vector.shape_cast %3 : vector<1x8x512xf32> to vector<8x512xf32>
    %c0_3 = arith.constant 0 : index
    %c0_4 = arith.constant 0 : index
    %5 = vector.load %arg7[%c0_3, %c0_4] : memref<8x128xf32, #tpu.memory_space<vmem>>, vector<8x128xf32>
    %6 = arith.truncf %5 : vector<8x128xf32> to vector<8x128xbf16>
    %c0_5 = arith.constant 0 : index
    %c0_6 = arith.constant 0 : index
    %7 = vector.load %arg3[%c0_5, %c0_6] : memref<128x512xbf16, #tpu.memory_space<vmem>>, vector<128x512xbf16>
    %cst = arith.constant dense<0.000000e+00> : vector<8x512xf32>
    %8 = tpu.matmul %6, %7, %cst {dimension_numbers = #tpu.dot_dimension_numbers<[1], [0], [0], [1], [0, 0, 1, 1], [], []>} : vector<8x128xbf16>, vector<128x512xbf16>, vector<8x512xf32> -> vector<8x512xf32>
    %9 = arith.addf %4, %8 : vector<8x512xf32>
    %10 = vector.extract_strided_slice %9 {offsets = [0, 0], sizes = [8, 128], strides = [1, 1]} : vector<8x512xf32> to vector<8x128xf32>
    %11 = arith.negf %10 : vector<8x128xf32>
    %12 = math.exp %11 : vector<8x128xf32>
    %cst_7 = arith.constant 1.000000e+00 : f32
    %13 = vector.broadcast %cst_7 : f32 to vector<8x128xf32>
    %14 = arith.addf %13, %12 : vector<8x128xf32>
    %15 = arith.divf %13, %14 : vector<8x128xf32>
    %16 = vector.extract_strided_slice %9 {offsets = [0, 128], sizes = [8, 128], strides = [1, 1]} : vector<8x512xf32> to vector<8x128xf32>
    %17 = arith.negf %16 : vector<8x128xf32>
    %18 = math.exp %17 : vector<8x128xf32>
    %cst_8 = arith.constant 1.000000e+00 : f32
    %19 = vector.broadcast %cst_8 : f32 to vector<8x128xf32>
    %20 = arith.addf %19, %18 : vector<8x128xf32>
    %21 = arith.divf %19, %20 : vector<8x128xf32>
    %22 = vector.extract_strided_slice %9 {offsets = [0, 256], sizes = [8, 128], strides = [1, 1]} : vector<8x512xf32> to vector<8x128xf32>
    %23 = math.tanh %22 : vector<8x128xf32>
    %24 = vector.extract_strided_slice %9 {offsets = [0, 384], sizes = [8, 128], strides = [1, 1]} : vector<8x512xf32> to vector<8x128xf32>
    %25 = arith.negf %24 : vector<8x128xf32>
    %26 = math.exp %25 : vector<8x128xf32>
    %cst_9 = arith.constant 1.000000e+00 : f32
    %27 = vector.broadcast %cst_9 : f32 to vector<8x128xf32>
    %28 = arith.addf %27, %26 : vector<8x128xf32>
    %29 = arith.divf %27, %28 : vector<8x128xf32>
    %c0_10 = arith.constant 0 : index
    %c0_11 = arith.constant 0 : index
    %30 = vector.load %arg8[%c0_10, %c0_11] : memref<8x128xf32, #tpu.memory_space<vmem>>, vector<8x128xf32>
    %31 = arith.mulf %21, %30 : vector<8x128xf32>
    %32 = arith.mulf %15, %23 : vector<8x128xf32>
    %33 = arith.addf %31, %32 : vector<8x128xf32>
    %34 = math.tanh %33 : vector<8x128xf32>
    %35 = arith.mulf %29, %34 : vector<8x128xf32>
    %c0_12 = arith.constant 0 : index
    %c0_13 = arith.constant 0 : index
    %36 = vector.load %arg8[%c0_12, %c0_13] : memref<8x128xf32, #tpu.memory_space<vmem>>, vector<8x128xf32>
    tpu.vector_store %arg8[%c0_12, %c0_13], %33 {strides = array<i32>} : memref<8x128xf32, #tpu.memory_space<vmem>>, vector<8x128xf32>,
    %c0_14 = arith.constant 0 : index
    %c0_15 = arith.constant 0 : index
    %37 = vector.load %arg7[%c0_14, %c0_15] : memref<8x128xf32, #tpu.memory_space<vmem>>, vector<8x128xf32>
    tpu.vector_store %arg7[%c0_14, %c0_15], %35 {strides = array<i32>} : memref<8x128xf32, #tpu.memory_space<vmem>>, vector<8x128xf32>,
    %c0_16 = arith.constant 0 : index
    %c0_17 = arith.constant 0 : index
    %c0_18 = arith.constant 0 : index
    %38 = vector.load %arg5[%c0_16, %c0_17, %c0_18] : memref<1x8x128xf32, #tpu.memory_space<vmem>>, vector<1x8x128xf32>
    %39 = vector.shape_cast %38 : vector<1x8x128xf32> to vector<8x128xf32>
    %40 = vector.shape_cast %35 : vector<8x128xf32> to vector<1x8x128xf32>
    tpu.vector_store %arg5[%c0_16, %c0_17, %c0_18], %40 {strides = array<i32>} : memref<1x8x128xf32, #tpu.memory_space<vmem>>, vector<1x8x128xf32>,
    %c0_19 = arith.constant 0 : index
    %c0_20 = arith.constant 0 : index
    %c0_21 = arith.constant 0 : index
    %41 = vector.load %arg2[%c0_19, %c0_20, %c0_21] : memref<1x8x512xf32, #tpu.memory_space<vmem>>, vector<1x8x512xf32>
    %42 = vector.shape_cast %41 : vector<1x8x512xf32> to vector<8x512xf32>
    %c0_22 = arith.constant 0 : index
    %c0_23 = arith.constant 0 : index
    %43 = vector.load %arg9[%c0_22, %c0_23] : memref<8x128xf32, #tpu.memory_space<vmem>>, vector<8x128xf32>
    %44 = arith.truncf %43 : vector<8x128xf32> to vector<8x128xbf16>
    %c0_24 = arith.constant 0 : index
    %c0_25 = arith.constant 0 : index
    %45 = vector.load %arg4[%c0_24, %c0_25] : memref<128x512xbf16, #tpu.memory_space<vmem>>, vector<128x512xbf16>
    %cst_26 = arith.constant dense<0.000000e+00> : vector<8x512xf32>
    %46 = tpu.matmul %44, %45, %cst_26 {dimension_numbers = #tpu.dot_dimension_numbers<[1], [0], [0], [1], [0, 0, 1, 1], [], []>} : vector<8x128xbf16>, vector<128x512xbf16>, vector<8x512xf32> -> vector<8x512xf32>
    %47 = arith.addf %42, %46 : vector<8x512xf32>
    %48 = vector.extract_strided_slice %47 {offsets = [0, 0], sizes = [8, 128], strides = [1, 1]} : vector<8x512xf32> to vector<8x128xf32>
    %49 = arith.negf %48 : vector<8x128xf32>
    %50 = math.exp %49 : vector<8x128xf32>
    %cst_27 = arith.constant 1.000000e+00 : f32
    %51 = vector.broadcast %cst_27 : f32 to vector<8x128xf32>
    %52 = arith.addf %51, %50 : vector<8x128xf32>
    %53 = arith.divf %51, %52 : vector<8x128xf32>
    %54 = vector.extract_strided_slice %47 {offsets = [0, 128], sizes = [8, 128], strides = [1, 1]} : vector<8x512xf32> to vector<8x128xf32>
    %55 = arith.negf %54 : vector<8x128xf32>
    %56 = math.exp %55 : vector<8x128xf32>
    %cst_28 = arith.constant 1.000000e+00 : f32
    %57 = vector.broadcast %cst_28 : f32 to vector<8x128xf32>
    %58 = arith.addf %57, %56 : vector<8x128xf32>
    %59 = arith.divf %57, %58 : vector<8x128xf32>
    %60 = vector.extract_strided_slice %47 {offsets = [0, 256], sizes = [8, 128], strides = [1, 1]} : vector<8x512xf32> to vector<8x128xf32>
    %61 = math.tanh %60 : vector<8x128xf32>
    %62 = vector.extract_strided_slice %47 {offsets = [0, 384], sizes = [8, 128], strides = [1, 1]} : vector<8x512xf32> to vector<8x128xf32>
    %63 = arith.negf %62 : vector<8x128xf32>
    %64 = math.exp %63 : vector<8x128xf32>
    %cst_29 = arith.constant 1.000000e+00 : f32
    %65 = vector.broadcast %cst_29 : f32 to vector<8x128xf32>
    %66 = arith.addf %65, %64 : vector<8x128xf32>
    %67 = arith.divf %65, %66 : vector<8x128xf32>
    %c0_30 = arith.constant 0 : index
    %c0_31 = arith.constant 0 : index
    %68 = vector.load %arg10[%c0_30, %c0_31] : memref<8x128xf32, #tpu.memory_space<vmem>>, vector<8x128xf32>
    %69 = arith.mulf %59, %68 : vector<8x128xf32>
    %70 = arith.mulf %53, %61 : vector<8x128xf32>
    %71 = arith.addf %69, %70 : vector<8x128xf32>
    %72 = math.tanh %71 : vector<8x128xf32>
    %73 = arith.mulf %67, %72 : vector<8x128xf32>
    %c0_32 = arith.constant 0 : index
    %c0_33 = arith.constant 0 : index
    %74 = vector.load %arg10[%c0_32, %c0_33] : memref<8x128xf32, #tpu.memory_space<vmem>>, vector<8x128xf32>
    tpu.vector_store %arg10[%c0_32, %c0_33], %71 {strides = array<i32>} : memref<8x128xf32, #tpu.memory_space<vmem>>, vector<8x128xf32>,
    %c0_34 = arith.constant 0 : index
    %c0_35 = arith.constant 0 : index
    %75 = vector.load %arg9[%c0_34, %c0_35] : memref<8x128xf32, #tpu.memory_space<vmem>>, vector<8x128xf32>
    tpu.vector_store %arg9[%c0_34, %c0_35], %73 {strides = array<i32>} : memref<8x128xf32, #tpu.memory_space<vmem>>, vector<8x128xf32>,
    %c0_36 = arith.constant 0 : index
    %c0_37 = arith.constant 0 : index
    %c0_38 = arith.constant 0 : index
    %76 = vector.load %arg6[%c0_36, %c0_37, %c0_38] : memref<1x8x128xf32, #tpu.memory_space<vmem>>, vector<1x8x128xf32>
    %77 = vector.shape_cast %76 : vector<1x8x128xf32> to vector<8x128xf32>
    %78 = vector.shape_cast %73 : vector<8x128xf32> to vector<1x8x128xf32>
    tpu.vector_store %arg6[%c0_36, %c0_37, %c0_38], %78 {strides = array<i32>} : memref<1x8x128xf32, #tpu.memory_space<vmem>>, vector<1x8x128xf32>,
    return
  }
  func.func @transform_0(%arg0: i32) -> (i32, i32, i32) {
    %c0_i32 = arith.constant 0 : i32
    %c0_i32_0 = arith.constant 0 : i32
    %c0_i32_1 = arith.constant 0 : i32
    return %arg0, %c0_i32, %c0_i32_0 : i32, i32, i32
  }
  func.func @transform_1(%arg0: i32) -> (i32, i32, i32) {
    %c7_i32 = arith.constant 7 : i32
    %0 = arith.subi %c7_i32, %arg0 : i32
    %c0_i32 = arith.constant 0 : i32
    %c0_i32_0 = arith.constant 0 : i32
    %c0_i32_1 = arith.constant 0 : i32
    return %0, %c0_i32, %c0_i32_0 : i32, i32, i32
  }
  func.func @transform_2(%arg0: i32) -> (i32, i32) {
    %c0_i32 = arith.constant 0 : i32
    %c0_i32_0 = arith.constant 0 : i32
    %c0_i32_1 = arith.constant 0 : i32
    return %c0_i32, %c0_i32_0 : i32, i32
  }
  func.func @transform_3(%arg0: i32) -> (i32, i32) {
    %c0_i32 = arith.constant 0 : i32
    %c0_i32_0 = arith.constant 0 : i32
    %c0_i32_1 = arith.constant 0 : i32
    return %c0_i32, %c0_i32_0 : i32, i32
  }
  func.func @transform_4(%arg0: i32) -> (i32, i32, i32) {
    %c0_i32 = arith.constant 0 : i32
    %c0_i32_0 = arith.constant 0 : i32
    %c0_i32_1 = arith.constant 0 : i32
    return %arg0, %c0_i32, %c0_i32_0 : i32, i32, i32
  }
  func.func @transform_5(%arg0: i32) -> (i32, i32, i32) {
    %c7_i32 = arith.constant 7 : i32
    %0 = arith.subi %c7_i32, %arg0 : i32
    %c0_i32 = arith.constant 0 : i32
    %c0_i32_0 = arith.constant 0 : i32
    %c0_i32_1 = arith.constant 0 : i32
    return %0, %c0_i32, %c0_i32_0 : i32, i32, i32
  }
}

module attributes {stable_mosaic.version = 11 : i64} {
  func.func @_head_kernel(%arg0: i32, %arg1: memref<8x256xf32, #tpu.memory_space<vmem>>, %arg2: memref<256x128xbf16, #tpu.memory_space<vmem>>, %arg3: memref<1x128xf32, #tpu.memory_space<vmem>>, %arg4: memref<128x128xbf16, #tpu.memory_space<vmem>>, %arg5: memref<1x128xf32, #tpu.memory_space<vmem>>, %arg6: memref<8x128xf32, #tpu.memory_space<vmem>>, %arg7: memref<8x128xf32, #tpu.memory_space<vmem>>) attributes {dimension_semantics = [#tpu.dimension_semantics<arbitrary>], iteration_bounds = array<i64: 2>, scalar_prefetch = 0 : i64, scratch_operands = 1 : i64, tpu.core_type = #tpu.core_type<tc>, window_params = [{pipeline_mode = #tpu.pipeline_mode<synchronous>, transform_indices = @transform_0, window_bounds = array<i64: 8, 256>}, {transform_indices = @transform_1, window_bounds = array<i64: 256, 128>}, {transform_indices = @transform_2, window_bounds = array<i64: 1, 128>}, {transform_indices = @transform_3, window_bounds = array<i64: 128, 128>}, {pipeline_mode = #tpu.pipeline_mode<synchronous>, transform_indices = @transform_4, window_bounds = array<i64: 1, 128>}, {pipeline_mode = #tpu.pipeline_mode<synchronous>, transform_indices = @transform_5, window_bounds = array<i64: 8, 128>}]} {
    %c0_i32 = arith.constant 0 : i32
    %0 = arith.cmpi eq, %arg0, %c0_i32 : i32
    %1 = arith.extui %0 : i1 to i32
    %c0_i32_0 = arith.constant 0 : i32
    %2 = arith.cmpi ne, %1, %c0_i32_0 : i32
    scf.if %2 {
      %cst_14 = arith.constant 0.000000e+00 : f32
      %20 = vector.broadcast %cst_14 : f32 to vector<8x128xf32>
      %c0_15 = arith.constant 0 : index
      %c0_16 = arith.constant 0 : index
      %21 = vector.load %arg7[%c0_15, %c0_16] : memref<8x128xf32, #tpu.memory_space<vmem>>, vector<8x128xf32>
      tpu.vector_store %arg7[%c0_15, %c0_16], %20 {strides = array<i32>} : memref<8x128xf32, #tpu.memory_space<vmem>>, vector<8x128xf32>,
    } else {
    }
    %c0 = arith.constant 0 : index
    %c0_1 = arith.constant 0 : index
    %3 = vector.load %arg1[%c0, %c0_1] : memref<8x256xf32, #tpu.memory_space<vmem>>, vector<8x256xf32>
    %4 = arith.truncf %3 : vector<8x256xf32> to vector<8x256xbf16>
    %c0_2 = arith.constant 0 : index
    %c0_3 = arith.constant 0 : index
    %5 = vector.load %arg2[%c0_2, %c0_3] : memref<256x128xbf16, #tpu.memory_space<vmem>>, vector<256x128xbf16>
    %cst = arith.constant dense<0.000000e+00> : vector<8x128xf32>
    %6 = tpu.matmul %4, %5, %cst {dimension_numbers = #tpu.dot_dimension_numbers<[1], [0], [0], [1], [0, 0, 1, 1], [], []>} : vector<8x256xbf16>, vector<256x128xbf16>, vector<8x128xf32> -> vector<8x128xf32>
    %c0_4 = arith.constant 0 : index
    %c0_5 = arith.constant 0 : index
    %7 = vector.load %arg3[%c0_4, %c0_5] : memref<1x128xf32, #tpu.memory_space<vmem>>, vector<1x128xf32>
    %8 = vector.broadcast %7 : vector<1x128xf32> to vector<8x128xf32>
    %9 = arith.addf %6, %8 : vector<8x128xf32>
    %10 = math.tanh %9 : vector<8x128xf32>
    %c0_6 = arith.constant 0 : index
    %c0_7 = arith.constant 0 : index
    %11 = vector.load %arg7[%c0_6, %c0_7] : memref<8x128xf32, #tpu.memory_space<vmem>>, vector<8x128xf32>
    %12 = arith.truncf %10 : vector<8x128xf32> to vector<8x128xbf16>
    %c0_8 = arith.constant 0 : index
    %c0_9 = arith.constant 0 : index
    %13 = vector.load %arg4[%c0_8, %c0_9] : memref<128x128xbf16, #tpu.memory_space<vmem>>, vector<128x128xbf16>
    %cst_10 = arith.constant dense<0.000000e+00> : vector<8x128xf32>
    %14 = tpu.matmul %12, %13, %cst_10 {dimension_numbers = #tpu.dot_dimension_numbers<[1], [0], [0], [1], [0, 0, 1, 1], [], []>} : vector<8x128xbf16>, vector<128x128xbf16>, vector<8x128xf32> -> vector<8x128xf32>
    %15 = arith.addf %11, %14 : vector<8x128xf32>
    %c0_11 = arith.constant 0 : index
    %c0_12 = arith.constant 0 : index
    %16 = vector.load %arg7[%c0_11, %c0_12] : memref<8x128xf32, #tpu.memory_space<vmem>>, vector<8x128xf32>
    tpu.vector_store %arg7[%c0_11, %c0_12], %15 {strides = array<i32>} : memref<8x128xf32, #tpu.memory_space<vmem>>, vector<8x128xf32>,
    %c1_i32 = arith.constant 1 : i32
    %17 = arith.cmpi eq, %arg0, %c1_i32 : i32
    %18 = arith.extui %17 : i1 to i32
    %c0_i32_13 = arith.constant 0 : i32
    %19 = arith.cmpi ne, %18, %c0_i32_13 : i32
    scf.if %19 {
      %c0_14 = arith.constant 0 : index
      %c0_15 = arith.constant 0 : index
      %20 = vector.load %arg7[%c0_14, %c0_15] : memref<8x128xf32, #tpu.memory_space<vmem>>, vector<8x128xf32>
      %c0_16 = arith.constant 0 : index
      %c0_17 = arith.constant 0 : index
      %21 = vector.load %arg5[%c0_16, %c0_17] : memref<1x128xf32, #tpu.memory_space<vmem>>, vector<1x128xf32>
      %22 = vector.broadcast %21 : vector<1x128xf32> to vector<8x128xf32>
      %23 = arith.addf %20, %22 : vector<8x128xf32>
      %cst_18 = arith.constant dense<0xFF800000> : vector<8xf32>
      %24 = vector.multi_reduction <maximumf>, %23, %cst_18 [1] : vector<8x128xf32> to vector<8xf32>
      %25 = vector.shape_cast %24 : vector<8xf32> to vector<8x1xf32>
      %26 = vector.broadcast %25 : vector<8x1xf32> to vector<8x128xf32>
      %27 = arith.subf %23, %26 : vector<8x128xf32>
      %28 = math.exp %27 : vector<8x128xf32>
      %cst_19 = arith.constant dense<0.000000e+00> : vector<8xf32>
      %29 = vector.multi_reduction <add>, %28, %cst_19 [1] : vector<8x128xf32> to vector<8xf32>
      %30 = vector.shape_cast %29 : vector<8xf32> to vector<8x1xf32>
      %31 = math.log %30 : vector<8x1xf32>
      %32 = arith.addf %31, %25 : vector<8x1xf32>
      %33 = vector.broadcast %32 : vector<8x1xf32> to vector<8x128xf32>
      %34 = arith.subf %23, %33 : vector<8x128xf32>
      %c0_20 = arith.constant 0 : index
      %c0_21 = arith.constant 0 : index
      %35 = vector.load %arg6[%c0_20, %c0_21] : memref<8x128xf32, #tpu.memory_space<vmem>>, vector<8x128xf32>
      tpu.vector_store %arg6[%c0_20, %c0_21], %34 {strides = array<i32>} : memref<8x128xf32, #tpu.memory_space<vmem>>, vector<8x128xf32>,
    } else {
    }
    return
  }
  func.func @transform_0(%arg0: i32) -> (i32, i32) {
    %c0_i32 = arith.constant 0 : i32
    %c0_i32_0 = arith.constant 0 : i32
    %c0_i32_1 = arith.constant 0 : i32
    return %c0_i32, %c0_i32_0 : i32, i32
  }
  func.func @transform_1(%arg0: i32) -> (i32, i32) {
    %c0_i32 = arith.constant 0 : i32
    %c0_i32_0 = arith.constant 0 : i32
    return %c0_i32, %arg0 : i32, i32
  }
  func.func @transform_2(%arg0: i32) -> (i32, i32) {
    %c0_i32 = arith.constant 0 : i32
    %c0_i32_0 = arith.constant 0 : i32
    return %c0_i32, %arg0 : i32, i32
  }
  func.func @transform_3(%arg0: i32) -> (i32, i32) {
    %c0_i32 = arith.constant 0 : i32
    %c0_i32_0 = arith.constant 0 : i32
    return %arg0, %c0_i32 : i32, i32
  }
  func.func @transform_4(%arg0: i32) -> (i32, i32) {
    %c0_i32 = arith.constant 0 : i32
    %c0_i32_0 = arith.constant 0 : i32
    %c0_i32_1 = arith.constant 0 : i32
    return %c0_i32, %c0_i32_0 : i32, i32
  }
  func.func @transform_5(%arg0: i32) -> (i32, i32) {
    %c0_i32 = arith.constant 0 : i32
    %c0_i32_0 = arith.constant 0 : i32
    %c0_i32_1 = arith.constant 0 : i32
    return %c0_i32, %c0_i32_0 : i32, i32
  }
}

</mosaic_0001>

<bundles_post_ra>
// kernel: model_forward.8
= control target key start
LH: loop header
LB: loop body
LE: loop exit
PB: predicated region body
PF: predicated region fallthrough
CT: control target
= control target key end

     0   :  { %8 = vsyncpa [#allocation3], 0  ;;  %s352_s15 = smov [#allocation2]   ;;  %s353_s17 = smov 256   ;;  %s557_s0 = inlined_call_operand.vmem [shape: f32[64,32], index: 0, kind: input, shape index: {}]   ;;  %s558_s1 = inlined_call_operand.hbm [shape: bf16[32,512], index: 1, kind: input, shape index: {}]   ;;  %s559_s2 = inlined_call_operand.vmem [shape: f32[1,512], index: 2, kind: input, shape index: {}]   ;;  %s560_s3 = inlined_call_operand.vmem [shape: f32[64,512], index: 3, kind: output, shape index: {}]  }
   0x1   :  { %s15_s14 = sshll.u32 %s558_s1, 4  ;;  %s17_s16 = sshll.u32 %s352_s15, 4  ;;  %s16_s14 = int_to_ptr.hbm [resolvable:$true] %s15_s14  ;;  %s18_s16 = int_to_ptr.vmem [resolvable:$true] %s17_s16 }
   0x2   :  { %s354_s18 = smov 16  }
   0x3   :  { %23 = dma.hbm_to_vmem [thread:$0]  %s16_s14, 1024, %s18_s16, [#allocation3], %s353_s17, %s353_s17, %s354_s18  }
   0x4   :  { %350 = dma.done.wait [#allocation3], 1024  }
   0x5   :  { %351 = vsyncadd [#allocation3], 4294966272  ;;  %v285_v0 = vld [vmem:[#allocation2 + $0x20] sm:$0xf]  ;;  %v321_v1 = vld [vmem:[#allocation2 + $0x2c] sm:$0xf0] }
   0x6   :  { %v319_v2 = vld [vmem:[#allocation2 + $0x24] sm:$0xf]  ;;  %v286_v3 = vor.u32 %v321_v1, %v285_v0  ;;  %v287_v4 = vld [vmem:[#allocation2 + $0x30] sm:$0xf0]  ;;  %v293_v5 = vld [vmem:[#allocation2 + $0x28] sm:$0xf] }
   0x7   :  { %v322_v6 = vld [vmem:[#allocation2 + $0x34] sm:$0xf0]  ;;  %v290_v7 = vor.u32 %v319_v2, %v287_v4  ;;  %v320_v9 = vld [vmem:[#allocation2 + $0x2c] sm:$0xf]  ;;  %v295_v10 = vld [vmem:[#allocation2 + $0x38] sm:$0xf0] }
   0x8   :  { %v294_v8 = vor.u32 %v322_v6, %v293_v5  ;;  %v269_v11 = vld [vmem:[#allocation2] sm:$0xf]  ;;  %120 = vmatpush.bf16.msra.mxu0 %v286_v3  ;;  %v298_v12 = vor.u32 %v320_v9, %v295_v10  ;;  %v317_v13 = vld [vmem:[#allocation2 + $0xc] sm:$0xf0]  ;;  %v315_v14 = vld [vmem:[#allocation2 + $0x4] sm:$0xf] }
   0x9   :  { %v271_v15 = vld [vmem:[#allocation2 + $0x10] sm:$0xf0]  ;;  %149 = vmatpush.bf16.msra.mxu1 %v290_v7  ;;  %v270_v16 = vor.u32 %v317_v13, %v269_v11  ;;  %v277_v18 = vld [vmem:[#allocation2 + $0x8] sm:$0xf]  ;;  %v318_v19 = vld [vmem:[#allocation2 + $0x14] sm:$0xf0] }
   0xa   :  { %178 = vmatpush.bf16.msra.mxu2 %v294_v8  ;;  %v274_v17 = vor.u32 %v315_v14, %v271_v15  ;;  %v316_v20 = vld [vmem:[#allocation2 + $0xc] sm:$0xf]  ;;  %207 = vmatpush.bf16.msra.mxu3 %v298_v12  ;;  %v278_v21 = vor.u32 %v318_v19, %v277_v18  ;;  %v279_v22 = vld [vmem:[#allocation2 + $0x18] sm:$0xf0]  ;;  %v31_v23 = vld [vmem:[%s557_s0] sm:$0xff]  ;;  %vm101_vm0 = vcmask 261120  }
   0xb   :  { %v32_v24 = vld [vmem:[%s557_s0 + $0x8] sm:$0xff]  ;;  %v282_v25 = vor.u32 %v316_v20, %v279_v22  ;;  %v33_v27 = vld [vmem:[%s557_s0 + $0x10] sm:$0xff]  ;;  %v34_v28 = vld [vmem:[%s557_s0 + $0x18] sm:$0xff] }
   0xc   :  { %v39_v26 = vpack.c.bf16 %v32_v24, %v31_v23  ;;  %121 = vmatpush.bf16.msra.mxu0 %v270_v16  ;;  %v40_v29 = vpack.c.bf16 %v34_v28, %v33_v27  ;;  %v35_v30 = vld [vmem:[%s557_s0 + $0x20] sm:$0xff]  ;;  %v36_v31 = vld [vmem:[%s557_s0 + $0x28] sm:$0xff]  ;;  %v37_v33 = vld [vmem:[%s557_s0 + $0x30] sm:$0xff] }
   0xd   :  { %150 = vmatpush.bf16.msra.mxu1 %v274_v17  ;;  %v41_v32 = vpack.c.bf16 %v36_v31, %v35_v30  ;;  %v38_v34 = vld [vmem:[%s557_s0 + $0x38] sm:$0xff]  ;;  %v51_v36 = vld [vmem:[%s559_s2] sm:$0xf] }
   0xe   :  { %179 = vmatpush.bf16.msra.mxu2 %v278_v21  ;;  %208 = vmatpush.bf16.msra.mxu3 %v282_v25  ;;  %v42_v35 = vpack.c.bf16 %v38_v34, %v37_v33  ;;  %v421_v37 = vperm.slane %v51_v36, 0  ;;  %v423_v38 = vperm.slane %v51_v36, 1  ;;  %v433_v43 = vperm.slane %v51_v36, 2 }
   0xf   :  { %299 = vmatmul.msk.bf16.vlgmr.msra.gmra.mxu0 %vm101_vm0, %v39_v26  ;;  %v435_v44 = vperm.slane %v51_v36, 3 }
  0x10   :  { %303 = vmatmul.msk.bf16.vlgmr.msra.gmra.mxu1 %vm101_vm0, %v39_v26 }
  0x11   :  { %307 = vmatmul.msk.bf16.vlgmr.msra.gmra.mxu2 %vm101_vm0, %v39_v26  ;;  %311 = vmatmul.msk.bf16.vlgmr.msra.gmra.mxu3 %vm101_vm0, %v39_v26 }
  0x1f   :  { %300 = vmatmul.msk.bf16.gmra.mxu0 %vm101_vm0, %v40_v29 }
  0x20   :  { %304 = vmatmul.msk.bf16.gmra.mxu1 %vm101_vm0, %v40_v29 }
  0x21   :  { %308 = vmatmul.msk.bf16.gmra.mxu2 %vm101_vm0, %v40_v29  ;;  %312 = vmatmul.msk.bf16.gmra.mxu3 %vm101_vm0, %v40_v29 }
  0x2f   :  { %301 = vmatmul.msk.bf16.gmra.mxu0 %vm101_vm0, %v41_v32 }
  0x30   :  { %305 = vmatmul.msk.bf16.gmra.mxu1 %vm101_vm0, %v41_v32 }
  0x31   :  { %309 = vmatmul.msk.bf16.gmra.mxu2 %vm101_vm0, %v41_v32  ;;  %313 = vmatmul.msk.bf16.gmra.mxu3 %vm101_vm0, %v41_v32 }
  0x3f   :  { %302 = vmatmul.msk.bf16.gmra.mxu0 %vm101_vm0, %v42_v35 }
  0x40   :  { %306 = vmatmul.msk.bf16.gmra.mxu1 %vm101_vm0, %v42_v35 }
  0x41   :  { %310 = vmatmul.msk.bf16.gmra.mxu2 %vm101_vm0, %v42_v35  ;;  %314 = vmatmul.msk.bf16.gmra.mxu3 %vm101_vm0, %v42_v35 }
  0x8c   :  { %v123_v39 = vpop.f32.mrf.mxu0 }
  0x8d   :  { %v124_v40 = vadd.f32 %v123_v39, %v421_v37  ;;  %v152_v41 = vpop.f32.mrf.mxu1 }
  0x8e   :  { %v153_v42 = vadd.f32 %v152_v41, %v423_v38 }
  0x8f   :  { %230 = vst [vmem:[%s560_s3] sm:$0xff] %v124_v40 }
  0x90   :  { %231 = vst [vmem:[%s560_s3 + $0x8] sm:$0xff] %v153_v42 }
  0x94   :  { %v181_v45 = vpop.f32.mrf.mxu2  ;;  %v210_v47 = vpop.f32.mrf.mxu3 }
  0x95   :  { %v182_v46 = vadd.f32 %v181_v45, %v433_v43  ;;  %v125_v48 = vpop.f32.mrf.mxu0  ;;  %v211_v49 = vadd.f32 %v210_v47, %v435_v44  ;;  %v154_v51 = vpop.f32.mrf.mxu1 }
  0x96   :  { %v126_v50 = vadd.f32 %v125_v48, %v421_v37  ;;  %v155_v52 = vadd.f32 %v154_v51, %v423_v38 }
  0x97   :  { %232 = vst [vmem:[%s560_s3 + $0x10] sm:$0xff] %v182_v46 }
  0x98   :  { %233 = vst [vmem:[%s560_s3 + $0x18] sm:$0xff] %v211_v49 }
  0x99   :  { %234 = vst [vmem:[%s560_s3 + $0x20] sm:$0xff] %v126_v50 }
  0x9a   :  { %235 = vst [vmem:[%s560_s3 + $0x28] sm:$0xff] %v155_v52 }
  0x9c   :  { %v183_v53 = vpop.f32.mrf.mxu2  ;;  %v212_v55 = vpop.f32.mrf.mxu3 }
  0x9d   :  { %v184_v54 = vadd.f32 %v183_v53, %v433_v43  ;;  %v128_v56 = vpop.f32.mrf.mxu0  ;;  %v213_v57 = vadd.f32 %v212_v55, %v435_v44  ;;  %v157_v59 = vpop.f32.mrf.mxu1 }
  0x9e   :  { %v129_v58 = vadd.f32 %v128_v56, %v421_v37  ;;  %v158_v60 = vadd.f32 %v157_v59, %v423_v38 }
  0x9f   :  { %236 = vst [vmem:[%s560_s3 + $0x30] sm:$0xff] %v184_v54 }
  0xa0   :  { %237 = vst [vmem:[%s560_s3 + $0x38] sm:$0xff] %v213_v57 }
  0xa1   :  { %238 = vst [vmem:[%s560_s3 + $0x40] sm:$0xff] %v129_v58 }
  0xa2   :  { %239 = vst [vmem:[%s560_s3 + $0x48] sm:$0xff] %v158_v60 }
  0xa4   :  { %v186_v61 = vpop.f32.mrf.mxu2  ;;  %v215_v63 = vpop.f32.mrf.mxu3 }
  0xa5   :  { %v187_v62 = vadd.f32 %v186_v61, %v433_v43  ;;  %v130_v0 = vpop.f32.mrf.mxu0  ;;  %v216_v1 = vadd.f32 %v215_v63, %v435_v44  ;;  %v159_v3 = vpop.f32.mrf.mxu1 }
  0xa6   :  { %v131_v2 = vadd.f32 %v130_v0, %v421_v37  ;;  %v160_v4 = vadd.f32 %v159_v3, %v423_v38 }
  0xa7   :  { %240 = vst [vmem:[%s560_s3 + $0x50] sm:$0xff] %v187_v62 }
  0xa8   :  { %241 = vst [vmem:[%s560_s3 + $0x58] sm:$0xff] %v216_v1 }
  0xa9   :  { %242 = vst [vmem:[%s560_s3 + $0x60] sm:$0xff] %v131_v2 }
  0xaa   :  { %243 = vst [vmem:[%s560_s3 + $0x68] sm:$0xff] %v160_v4 }
  0xac   :  { %v188_v5 = vpop.f32.mrf.mxu2  ;;  %v217_v7 = vpop.f32.mrf.mxu3 }
  0xad   :  { %v189_v6 = vadd.f32 %v188_v5, %v433_v43  ;;  %v133_v8 = vpop.f32.mrf.mxu0  ;;  %v218_v9 = vadd.f32 %v217_v7, %v435_v44  ;;  %v162_v11 = vpop.f32.mrf.mxu1 }
  0xae   :  { %v134_v10 = vadd.f32 %v133_v8, %v421_v37  ;;  %v163_v12 = vadd.f32 %v162_v11, %v423_v38 }
  0xaf   :  { %244 = vst [vmem:[%s560_s3 + $0x70] sm:$0xff] %v189_v6 }
  0xb0   :  { %245 = vst [vmem:[%s560_s3 + $0x78] sm:$0xff] %v218_v9 }
  0xb1   :  { %246 = vst [vmem:[%s560_s3 + $0x80] sm:$0xff] %v134_v10 }
  0xb2   :  { %247 = vst [vmem:[%s560_s3 + $0x88] sm:$0xff] %v163_v12 }
  0xb4   :  { %v191_v13 = vpop.f32.mrf.mxu2  ;;  %v220_v15 = vpop.f32.mrf.mxu3 }
  0xb5   :  { %v192_v14 = vadd.f32 %v191_v13, %v433_v43  ;;  %v135_v16 = vpop.f32.mrf.mxu0  ;;  %v221_v17 = vadd.f32 %v220_v15, %v435_v44  ;;  %v164_v19 = vpop.f32.mrf.mxu1 }
  0xb6   :  { %v136_v18 = vadd.f32 %v135_v16, %v421_v37  ;;  %v165_v20 = vadd.f32 %v164_v19, %v423_v38 }
  0xb7   :  { %248 = vst [vmem:[%s560_s3 + $0x90] sm:$0xff] %v192_v14 }
  0xb8   :  { %249 = vst [vmem:[%s560_s3 + $0x98] sm:$0xff] %v221_v17 }
  0xb9   :  { %250 = vst [vmem:[%s560_s3 + $0xa0] sm:$0xff] %v136_v18 }
  0xba   :  { %251 = vst [vmem:[%s560_s3 + $0xa8] sm:$0xff] %v165_v20 }
  0xbc   :  { %v193_v21 = vpop.f32.mrf.mxu2  ;;  %v222_v23 = vpop.f32.mrf.mxu3 }
  0xbd   :  { %v194_v22 = vadd.f32 %v193_v21, %v433_v43  ;;  %v138_v24 = vpop.f32.mrf.mxu0  ;;  %v223_v25 = vadd.f32 %v222_v23, %v435_v44  ;;  %v167_v27 = vpop.f32.mrf.mxu1 }
  0xbe   :  { %v139_v26 = vadd.f32 %v138_v24, %v421_v37  ;;  %v168_v28 = vadd.f32 %v167_v27, %v423_v38 }
  0xbf   :  { %252 = vst [vmem:[%s560_s3 + $0xb0] sm:$0xff] %v194_v22 }
  0xc0   :  { %253 = vst [vmem:[%s560_s3 + $0xb8] sm:$0xff] %v223_v25 }
  0xc1   :  { %254 = vst [vmem:[%s560_s3 + $0xc0] sm:$0xff] %v139_v26 }
  0xc2   :  { %255 = vst [vmem:[%s560_s3 + $0xc8] sm:$0xff] %v168_v28 }
  0xc4   :  { %v196_v29 = vpop.f32.mrf.mxu2  ;;  %v225_v31 = vpop.f32.mrf.mxu3 }
  0xc5   :  { %v197_v30 = vadd.f32 %v196_v29, %v433_v43  ;;  %v140_v32 = vpop.f32.mrf.mxu0  ;;  %v226_v33 = vadd.f32 %v225_v31, %v435_v44  ;;  %v169_v35 = vpop.f32.mrf.mxu1 }
  0xc6   :  { %v141_v34 = vadd.f32 %v140_v32, %v421_v37  ;;  %v170_v36 = vadd.f32 %v169_v35, %v423_v38 }
  0xc7   :  { %256 = vst [vmem:[%s560_s3 + $0xd0] sm:$0xff] %v197_v30 }
  0xc8   :  { %257 = vst [vmem:[%s560_s3 + $0xd8] sm:$0xff] %v226_v33 }
  0xc9   :  { %258 = vst [vmem:[%s560_s3 + $0xe0] sm:$0xff] %v141_v34 }
  0xca   :  { %259 = vst [vmem:[%s560_s3 + $0xe8] sm:$0xff] %v170_v36 }
  0xcc   :  { %v198_v37 = vpop.f32.mrf.mxu2  ;;  %v227_v40 = vpop.f32.mrf.mxu3 }
  0xcd   :  { %v199_v39 = vadd.f32 %v198_v37, %v433_v43  ;;  %v228_v41 = vadd.f32 %v227_v40, %v435_v44 }
  0xcf   :  { %260 = vst [vmem:[%s560_s3 + $0xf0] sm:$0xff] %v199_v39 }
  0xd0   :  { %261 = vst [vmem:[%s560_s3 + $0xf8] sm:$0xff] %v228_v41 }
  0xd1   :  { %266 = vsyncpa [#allocation3], 1 }

// kernel: model_forward.11
= control target key start
LH: loop header
LB: loop body
LE: loop exit
PB: predicated region body
PF: predicated region fallthrough
CT: control target
= control target key end

     0   :  { %10 = vsyncpa [#allocation3], 0  ;;  %s1441_s0 = inlined_call_operand.vmem [shape: f32[64,128], index: 0, kind: input, shape index: {}]   ;;  %s1442_s1 = inlined_call_operand.vmem [shape: f32[64,128], index: 1, kind: input, shape index: {}]   ;;  %s1443_s2 = inlined_call_operand.hbm [shape: bf16[128,512], index: 2, kind: input, shape index: {}]   ;;  %s1444_s3 = inlined_call_operand.hbm [shape: bf16[128,512], index: 3, kind: input, shape index: {}]   ;;  %s1445_s4 = inlined_call_operand.vmem [shape: f32[1,512], index: 4, kind: input, shape index: {}]   ;;  %s1446_s5 = inlined_call_operand.vmem [shape: f32[64,512], index: 5, kind: output, shape index: {}]  }
   0x1   :  { %s20_s20 = sshll.u32 %s1443_s2, 4  ;;  %s21_s20 = int_to_ptr.hbm [resolvable:$true] %s20_s20 }
   0x2   :  { %11 = vsyncpa [#allocation5], 0  ;;  %s1148_s21 = smov [#allocation2]   ;;  %s33_s25 = sshll.u32 %s1444_s3, 4  ;;  %s34_s25 = int_to_ptr.hbm [resolvable:$true] %s33_s25 }
   0x3   :  { %s22_s22 = sshll.u32 %s1148_s21, 4  ;;  %s1149_s26 = smov 256   ;;  %s23_s22 = int_to_ptr.vmem [resolvable:$true] %s22_s22 }
   0x4   :  { %s1150_s27 = smov 16   ;;  %s1151_s28 = smov [#allocation4]  }
   0x5   :  { %28 = dma.hbm_to_vmem [thread:$0]  %s21_s20, 4096, %s23_s22, [#allocation3], %s1149_s26, %s1149_s26, %s1150_s27  }
   0x6   :  { %s35_s29 = sshll.u32 %s1151_s28, 4  ;;  %s36_s29 = int_to_ptr.vmem [resolvable:$true] %s35_s29 }
   0x7   :  { %41 = dma.hbm_to_vmem [thread:$0]  %s34_s25, 4096, %s36_s29, [#allocation5], %s1149_s26, %s1149_s26, %s1150_s27  }
   0x8   :  { %1144 = dma.done.wait [#allocation3], 4096  }
   0x9   :  { %1145 = vsyncadd [#allocation3], 4294963200 }
   0xa   :  { %1146 = dma.done.wait [#allocation5], 4096  }
   0xb   :  { %1147 = vsyncadd [#allocation5], 4294963200  ;;  %v886_v0 = vld [vmem:[#allocation4 + $0xe0] sm:$0xf]  ;;  %v1090_v1 = vld [vmem:[#allocation4 + $0xec] sm:$0xf0] }
   0xc   :  { %v1088_v2 = vld [vmem:[#allocation4 + $0xe4] sm:$0xf]  ;;  %v887_v3 = vor.u32 %v1090_v1, %v886_v0  ;;  %v888_v4 = vld [vmem:[#allocation4 + $0xf0] sm:$0xf0]  ;;  %v894_v5 = vld [vmem:[#allocation4 + $0xe8] sm:$0xf] }
   0xd   :  { %v1091_v6 = vld [vmem:[#allocation4 + $0xf4] sm:$0xf0]  ;;  %v891_v7 = vor.u32 %v1088_v2, %v888_v4  ;;  %v1089_v9 = vld [vmem:[#allocation4 + $0xec] sm:$0xf]  ;;  %v896_v10 = vld [vmem:[#allocation4 + $0xf8] sm:$0xf0] }
   0xe   :  { %v895_v8 = vor.u32 %v1091_v6, %v894_v5  ;;  %v870_v11 = vld [vmem:[#allocation4 + $0xc0] sm:$0xf]  ;;  %300 = vmatpush.bf16.msra.mxu0 %v887_v3  ;;  %v899_v12 = vor.u32 %v1089_v9, %v896_v10  ;;  %v1086_v13 = vld [vmem:[#allocation4 + $0xcc] sm:$0xf0]  ;;  %v1084_v14 = vld [vmem:[#allocation4 + $0xc4] sm:$0xf] }
   0xf   :  { %v872_v15 = vld [vmem:[#allocation4 + $0xd0] sm:$0xf0]  ;;  %329 = vmatpush.bf16.msra.mxu1 %v891_v7  ;;  %v871_v16 = vor.u32 %v1086_v13, %v870_v11  ;;  %v878_v18 = vld [vmem:[#allocation4 + $0xc8] sm:$0xf]  ;;  %v1087_v19 = vld [vmem:[#allocation4 + $0xd4] sm:$0xf0] }
  0x10   :  { %358 = vmatpush.bf16.msra.mxu2 %v895_v8  ;;  %v875_v17 = vor.u32 %v1084_v14, %v872_v15  ;;  %v1085_v20 = vld [vmem:[#allocation4 + $0xcc] sm:$0xf]  ;;  %387 = vmatpush.bf16.msra.mxu3 %v899_v12  ;;  %v879_v21 = vor.u32 %v1087_v19, %v878_v18  ;;  %v880_v22 = vld [vmem:[#allocation4 + $0xd8] sm:$0xf0]  ;;  %v854_v23 = vld [vmem:[#allocation4 + $0xa0] sm:$0xf] }
  0x11   :  { %v1082_v24 = vld [vmem:[#allocation4 + $0xac] sm:$0xf0]  ;;  %v883_v25 = vor.u32 %v1085_v20, %v880_v22  ;;  %v1080_v26 = vld [vmem:[#allocation4 + $0xa4] sm:$0xf]  ;;  %v856_v27 = vld [vmem:[#allocation4 + $0xb0] sm:$0xf0] }
  0x12   :  { %v862_v28 = vld [vmem:[#allocation4 + $0xa8] sm:$0xf]  ;;  %301 = vmatpush.bf16.msra.mxu0 %v871_v16  ;;  %v855_v29 = vor.u32 %v1082_v24, %v854_v23  ;;  %v1083_v30 = vld [vmem:[#allocation4 + $0xb4] sm:$0xf0]  ;;  %v1081_v31 = vld [vmem:[#allocation4 + $0xac] sm:$0xf]  ;;  %v859_v33 = vor.u32 %v1080_v26, %v856_v27 }
  0x13   :  { %v864_v32 = vld [vmem:[#allocation4 + $0xb8] sm:$0xf0]  ;;  %330 = vmatpush.bf16.msra.mxu1 %v875_v17  ;;  %v863_v34 = vor.u32 %v1083_v30, %v862_v28  ;;  %v838_v35 = vld [vmem:[#allocation4 + $0x80] sm:$0xf]  ;;  %v1078_v36 = vld [vmem:[#allocation4 + $0x8c] sm:$0xf0] }
  0x14   :  { %359 = vmatpush.bf16.msra.mxu2 %v879_v21  ;;  %v1076_v37 = vld [vmem:[#allocation4 + $0x84] sm:$0xf]  ;;  %388 = vmatpush.bf16.msra.mxu3 %v883_v25  ;;  %v867_v38 = vor.u32 %v1081_v31, %v864_v32  ;;  %v840_v39 = vld [vmem:[#allocation4 + $0x90] sm:$0xf0]  ;;  %v846_v40 = vld [vmem:[#allocation4 + $0x88] sm:$0xf]  ;;  %v839_v44 = vor.u32 %v1078_v36, %v838_v35 }
  0x15   :  { %v1079_v41 = vld [vmem:[#allocation4 + $0x94] sm:$0xf0]  ;;  %v1077_v42 = vld [vmem:[#allocation4 + $0x8c] sm:$0xf]  ;;  %v848_v43 = vld [vmem:[#allocation4 + $0x98] sm:$0xf0]  ;;  %v843_v45 = vor.u32 %v1076_v37, %v840_v39 }
  0x16   :  { %302 = vmatpush.bf16.msra.mxu0 %v855_v29  ;;  %v847_v46 = vor.u32 %v1079_v41, %v846_v40  ;;  %v822_v47 = vld [vmem:[#allocation4 + $0x60] sm:$0xf]  ;;  %v1074_v48 = vld [vmem:[#allocation4 + $0x6c] sm:$0xf0]  ;;  %v1072_v49 = vld [vmem:[#allocation4 + $0x64] sm:$0xf]  ;;  %v851_v50 = vor.u32 %v1077_v42, %v848_v43 }
  0x17   :  { %331 = vmatpush.bf16.msra.mxu1 %v859_v33  ;;  %v824_v51 = vld [vmem:[#allocation4 + $0x70] sm:$0xf0]  ;;  %v830_v52 = vld [vmem:[#allocation4 + $0x68] sm:$0xf]  ;;  %v1075_v53 = vld [vmem:[#allocation4 + $0x74] sm:$0xf0]  ;;  %v823_v56 = vor.u32 %v1074_v48, %v822_v47 }
  0x18   :  { %360 = vmatpush.bf16.msra.mxu2 %v863_v34  ;;  %389 = vmatpush.bf16.msra.mxu3 %v867_v38  ;;  %v1073_v54 = vld [vmem:[#allocation4 + $0x6c] sm:$0xf]  ;;  %v832_v55 = vld [vmem:[#allocation4 + $0x78] sm:$0xf0]  ;;  %v827_v57 = vor.u32 %v1072_v49, %v824_v51  ;;  %v831_v58 = vor.u32 %v1075_v53, %v830_v52  ;;  %v806_v59 = vld [vmem:[#allocation4 + $0x40] sm:$0xf] }
  0x19   :  { %v1070_v60 = vld [vmem:[#allocation4 + $0x4c] sm:$0xf0]  ;;  %v1068_v61 = vld [vmem:[#allocation4 + $0x44] sm:$0xf]  ;;  %v835_v62 = vor.u32 %v1073_v54, %v832_v55  ;;  %v808_v63 = vld [vmem:[#allocation4 + $0x50] sm:$0xf0] }
  0x1a   :  { %303 = vmatpush.bf16.msra.mxu0 %v839_v44  ;;  %v814_v0 = vld [vmem:[#allocation4 + $0x48] sm:$0xf]  ;;  %v1071_v1 = vld [vmem:[#allocation4 + $0x54] sm:$0xf0]  ;;  %v1069_v2 = vld [vmem:[#allocation4 + $0x4c] sm:$0xf]  ;;  %v807_v4 = vor.u32 %v1070_v60, %v806_v59  ;;  %v811_v5 = vor.u32 %v1068_v61, %v808_v63 }
  0x1b   :  { %332 = vmatpush.bf16.msra.mxu1 %v843_v45  ;;  %v816_v3 = vld [vmem:[#allocation4 + $0x58] sm:$0xf0]  ;;  %v815_v6 = vor.u32 %v1071_v1, %v814_v0  ;;  %v790_v7 = vld [vmem:[#allocation4 + $0x20] sm:$0xf]  ;;  %v1066_v8 = vld [vmem:[#allocation4 + $0x2c] sm:$0xf0] }
  0x1c   :  { %361 = vmatpush.bf16.msra.mxu2 %v847_v46  ;;  %390 = vmatpush.bf16.msra.mxu3 %v851_v50  ;;  %v1064_v9 = vld [vmem:[#allocation4 + $0x24] sm:$0xf]  ;;  %v819_v10 = vor.u32 %v1069_v2, %v816_v3  ;;  %v792_v11 = vld [vmem:[#allocation4 + $0x30] sm:$0xf0]  ;;  %v798_v12 = vld [vmem:[#allocation4 + $0x28] sm:$0xf]  ;;  %v791_v16 = vor.u32 %v1066_v8, %v790_v7 }
  0x1d   :  { %v1067_v13 = vld [vmem:[#allocation4 + $0x34] sm:$0xf0]  ;;  %v1065_v14 = vld [vmem:[#allocation4 + $0x2c] sm:$0xf]  ;;  %v800_v15 = vld [vmem:[#allocation4 + $0x38] sm:$0xf0]  ;;  %v795_v19 = vor.u32 %v1064_v9, %v792_v11 }
  0x1e   :  { %304 = vmatpush.bf16.msra.mxu0 %v823_v56  ;;  %v774_v17 = vld [vmem:[#allocation4] sm:$0xf]  ;;  %v1062_v18 = vld [vmem:[#allocation4 + $0xc] sm:$0xf0]  ;;  %v799_v20 = vor.u32 %v1067_v13, %v798_v12  ;;  %v1060_v21 = vld [vmem:[#allocation4 + $0x4] sm:$0xf]  ;;  %v803_v24 = vor.u32 %v1065_v14, %v800_v15 }
  0x1f   :  { %333 = vmatpush.bf16.msra.mxu1 %v827_v57  ;;  %v776_v22 = vld [vmem:[#allocation4 + $0x10] sm:$0xf0]  ;;  %v782_v23 = vld [vmem:[#allocation4 + $0x8] sm:$0xf]  ;;  %v1063_v25 = vld [vmem:[#allocation4 + $0x14] sm:$0xf0]  ;;  %v775_v31 = vor.u32 %v1062_v18, %v774_v17 }
  0x20   :  { %362 = vmatpush.bf16.msra.mxu2 %v831_v58  ;;  %391 = vmatpush.bf16.msra.mxu3 %v835_v62  ;;  %v1061_v26 = vld [vmem:[#allocation4 + $0xc] sm:$0xf]  ;;  %v784_v27 = vld [vmem:[#allocation4 + $0x18] sm:$0xf0]  ;;  %v96_v28 = vld [vmem:[%s1442_s1] sm:$0xff]  ;;  %v779_v35 = vor.u32 %v1060_v21, %v776_v22  ;;  %v783_v36 = vor.u32 %v1063_v25, %v782_v23 }
  0x21   :  { %v1022_v29 = vld [vmem:[#allocation2 + $0xe8] sm:$0xf]  ;;  %v1059_v30 = vld [vmem:[#allocation2 + $0xf4] sm:$0xf0]  ;;  %v1057_v33 = vld [vmem:[#allocation2 + $0xec] sm:$0xf]  ;;  %v787_v37 = vor.u32 %v1061_v26, %v784_v27 }
  0x22   :  { %305 = vmatpush.bf16.msra.mxu0 %v807_v4  ;;  %v97_v32 = vld [vmem:[%s1442_s1 + $0x8] sm:$0xff]  ;;  %v1024_v34 = vld [vmem:[#allocation2 + $0xf8] sm:$0xf0]  ;;  %v1023_v38 = vor.u32 %v1059_v30, %v1022_v29  ;;  %v1014_v39 = vld [vmem:[#allocation2 + $0xe0] sm:$0xf] }
  0x23   :  { %334 = vmatpush.bf16.msra.mxu1 %v811_v5  ;;  %v1058_v40 = vld [vmem:[#allocation2 + $0xec] sm:$0xf0]  ;;  %v1056_v41 = vld [vmem:[#allocation2 + $0xe4] sm:$0xf]  ;;  %v104_v42 = vpack.c.bf16 %v97_v32, %v96_v28  ;;  %v1027_v43 = vor.u32 %v1057_v33, %v1024_v34  ;;  %v1016_v44 = vld [vmem:[#allocation2 + $0xf0] sm:$0xf0] }
  0x24   :  { %363 = vmatpush.bf16.msra.mxu2 %v815_v6  ;;  %392 = vmatpush.bf16.msra.mxu3 %v819_v10  ;;  %v1006_v45 = vld [vmem:[#allocation2 + $0xc8] sm:$0xf]  ;;  %v1055_v46 = vld [vmem:[#allocation2 + $0xd4] sm:$0xf0]  ;;  %v1053_v47 = vld [vmem:[#allocation2 + $0xcc] sm:$0xf]  ;;  %v1015_v49 = vor.u32 %v1058_v40, %v1014_v39  ;;  %v1019_v50 = vor.u32 %v1056_v41, %v1016_v44 }
  0x25   :  { %v1008_v48 = vld [vmem:[#allocation2 + $0xd8] sm:$0xf0]  ;;  %v1007_v51 = vor.u32 %v1055_v46, %v1006_v45  ;;  %v998_v52 = vld [vmem:[#allocation2 + $0xc0] sm:$0xf]  ;;  %v1054_v53 = vld [vmem:[#allocation2 + $0xcc] sm:$0xf0] }
  0x26   :  { %306 = vmatpush.bf16.msra.mxu0 %v791_v16  ;;  %v1052_v54 = vld [vmem:[#allocation2 + $0xc4] sm:$0xf]  ;;  %v1011_v55 = vor.u32 %v1053_v47, %v1008_v48  ;;  %v1000_v56 = vld [vmem:[#allocation2 + $0xd0] sm:$0xf0]  ;;  %v990_v57 = vld [vmem:[#allocation2 + $0xa8] sm:$0xf]  ;;  %v999_v61 = vor.u32 %v1054_v53, %v998_v52 }
  0x27   :  { %335 = vmatpush.bf16.msra.mxu1 %v795_v19  ;;  %v1051_v58 = vld [vmem:[#allocation2 + $0xb4] sm:$0xf0]  ;;  %v1049_v59 = vld [vmem:[#allocation2 + $0xac] sm:$0xf]  ;;  %v992_v60 = vld [vmem:[#allocation2 + $0xb8] sm:$0xf0]  ;;  %v1003_v62 = vor.u32 %v1052_v54, %v1000_v56 }
  0x28   :  { %364 = vmatpush.bf16.msra.mxu2 %v799_v20  ;;  %393 = vmatpush.bf16.msra.mxu3 %v803_v24  ;;  %v991_v63 = vor.u32 %v1051_v58, %v990_v57  ;;  %v982_v0 = vld [vmem:[#allocation2 + $0xa0] sm:$0xf]  ;;  %v1050_v1 = vld [vmem:[#allocation2 + $0xac] sm:$0xf0]  ;;  %v1048_v2 = vld [vmem:[#allocation2 + $0xa4] sm:$0xf]  ;;  %v995_v3 = vor.u32 %v1049_v59, %v992_v60 }
  0x29   :  { %v984_v4 = vld [vmem:[#allocation2 + $0xb0] sm:$0xf0]  ;;  %v974_v5 = vld [vmem:[#allocation2 + $0x88] sm:$0xf]  ;;  %v1047_v6 = vld [vmem:[#allocation2 + $0x94] sm:$0xf0]  ;;  %v983_v9 = vor.u32 %v1050_v1, %v982_v0 }
  0x2a   :  { %307 = vmatpush.bf16.msra.mxu0 %v775_v31  ;;  %v1045_v7 = vld [vmem:[#allocation2 + $0x8c] sm:$0xf]  ;;  %v976_v8 = vld [vmem:[#allocation2 + $0x98] sm:$0xf0]  ;;  %v98_v10 = vld [vmem:[%s1442_s1 + $0x10] sm:$0xff]  ;;  %v987_v11 = vor.u32 %v1048_v2, %v984_v4  ;;  %v975_v12 = vor.u32 %v1047_v6, %v974_v5 }
  0x2b   :  { %336 = vmatpush.bf16.msra.mxu1 %v779_v35  ;;  %v966_v13 = vld [vmem:[#allocation2 + $0x80] sm:$0xf]  ;;  %v1046_v14 = vld [vmem:[#allocation2 + $0x8c] sm:$0xf0]  ;;  %v1044_v15 = vld [vmem:[#allocation2 + $0x84] sm:$0xf]  ;;  %v979_v16 = vor.u32 %v1045_v7, %v976_v8 }
  0x2c   :  { %365 = vmatpush.bf16.msra.mxu2 %v783_v36  ;;  %394 = vmatpush.bf16.msra.mxu3 %v787_v37  ;;  %v968_v17 = vld [vmem:[#allocation2 + $0x90] sm:$0xf0]  ;;  %v958_v18 = vld [vmem:[#allocation2 + $0x68] sm:$0xf]  ;;  %v1043_v19 = vld [vmem:[#allocation2 + $0x74] sm:$0xf0]  ;;  %v967_v23 = vor.u32 %v1046_v14, %v966_v13 }
  0x2d   :  { %308 = vmatmul.bf16.vlgmr.msra.gmra.mxu0 %v104_v42  ;;  %v99_v20 = vld [vmem:[%s1442_s1 + $0x18] sm:$0xff]  ;;  %v1041_v21 = vld [vmem:[#allocation2 + $0x6c] sm:$0xf]  ;;  %v971_v24 = vor.u32 %v1044_v15, %v968_v17  ;;  %v959_v25 = vor.u32 %v1043_v19, %v958_v18  ;;  %v950_v26 = vld [vmem:[#allocation2 + $0x60] sm:$0xf] }
  0x2e   :  { %337 = vmatmul.bf16.vlgmr.msra.gmra.mxu1 %v104_v42  ;;  %576 = vmatpush.bf16.msrb.mxu0 %v1015_v49  ;;  %v960_v22 = vld [vmem:[#allocation2 + $0x78] sm:$0xf0]  ;;  %v1042_v27 = vld [vmem:[#allocation2 + $0x6c] sm:$0xf0]  ;;  %v1040_v28 = vld [vmem:[#allocation2 + $0x64] sm:$0xf]  ;;  %v105_v29 = vpack.c.bf16 %v99_v20, %v98_v10 }
  0x2f   :  { %366 = vmatmul.bf16.vlgmr.msra.gmra.mxu2 %v104_v42  ;;  %395 = vmatmul.bf16.vlgmr.msra.gmra.mxu3 %v104_v42  ;;  %v963_v30 = vor.u32 %v1041_v21, %v960_v22  ;;  %v952_v31 = vld [vmem:[#allocation2 + $0x70] sm:$0xf0]  ;;  %v942_v32 = vld [vmem:[#allocation2 + $0x48] sm:$0xf]  ;;  %v1039_v33 = vld [vmem:[#allocation2 + $0x54] sm:$0xf0]  ;;  %v951_v36 = vor.u32 %v1042_v27, %v950_v26 }
  0x30   :  { %634 = vmatpush.bf16.msrb.mxu2 %v1023_v38  ;;  %663 = vmatpush.bf16.msrb.mxu3 %v1027_v43  ;;  %v1037_v34 = vld [vmem:[#allocation2 + $0x4c] sm:$0xf]  ;;  %v944_v35 = vld [vmem:[#allocation2 + $0x58] sm:$0xf0]  ;;  %v955_v37 = vor.u32 %v1040_v28, %v952_v31  ;;  %v943_v38 = vor.u32 %v1039_v33, %v942_v32  ;;  %v934_v39 = vld [vmem:[#allocation2 + $0x40] sm:$0xf] }
  0x31   :  { %605 = vmatpush.bf16.msrb.mxu1 %v1019_v50  ;;  %v1038_v40 = vld [vmem:[#allocation2 + $0x4c] sm:$0xf0]  ;;  %v947_v41 = vor.u32 %v1037_v34, %v944_v35  ;;  %v1036_v42 = vld [vmem:[#allocation2 + $0x44] sm:$0xf]  ;;  %v936_v43 = vld [vmem:[#allocation2 + $0x50] sm:$0xf0] }
  0x32   :  { %577 = vmatpush.bf16.msrb.mxu0 %v999_v61  ;;  %v935_v44 = vor.u32 %v1038_v40, %v934_v39  ;;  %v926_v45 = vld [vmem:[#allocation2 + $0x28] sm:$0xf]  ;;  %v1035_v46 = vld [vmem:[#allocation2 + $0x34] sm:$0xf0]  ;;  %v1033_v47 = vld [vmem:[#allocation2 + $0x2c] sm:$0xf]  ;;  %v939_v48 = vor.u32 %v1036_v42, %v936_v43 }
  0x33   :  { %v927_v49 = vor.u32 %v1035_v46, %v926_v45  ;;  %v928_v50 = vld [vmem:[#allocation2 + $0x38] sm:$0xf0]  ;;  %v1034_v52 = vld [vmem:[#allocation2 + $0x2c] sm:$0xf0]  ;;  %v1032_v54 = vld [vmem:[#allocation2 + $0x24] sm:$0xf] }
  0x34   :  { %635 = vmatpush.bf16.msrb.mxu2 %v1007_v51  ;;  %664 = vmatpush.bf16.msrb.mxu3 %v1011_v55  ;;  %v918_v51 = vld [vmem:[#allocation2 + $0x20] sm:$0xf]  ;;  %v931_v53 = vor.u32 %v1033_v47, %v928_v50  ;;  %v920_v55 = vld [vmem:[#allocation2 + $0x30] sm:$0xf0]  ;;  %v910_v56 = vld [vmem:[#allocation2 + $0x8] sm:$0xf] }
  0x35   :  { %606 = vmatpush.bf16.msrb.mxu1 %v1003_v62  ;;  %v1031_v57 = vld [vmem:[#allocation2 + $0x14] sm:$0xf0]  ;;  %v1029_v58 = vld [vmem:[#allocation2 + $0xc] sm:$0xf]  ;;  %v912_v59 = vld [vmem:[#allocation2 + $0x18] sm:$0xf0]  ;;  %v919_v60 = vor.u32 %v1034_v52, %v918_v51  ;;  %v923_v61 = vor.u32 %v1032_v54, %v920_v55 }
  0x36   :  { %578 = vmatpush.bf16.msrb.mxu0 %v983_v9  ;;  %v911_v62 = vor.u32 %v1031_v57, %v910_v56  ;;  %v1030_v0 = vld [vmem:[#allocation2 + $0xc] sm:$0xf0]  ;;  %v915_v1 = vor.u32 %v1029_v58, %v912_v59  ;;  %v1028_v2 = vld [vmem:[#allocation2 + $0x4] sm:$0xf]  ;;  %v101_v5 = vld [vmem:[%s1442_s1 + $0x28] sm:$0xff] }
  0x37   :  { %v100_v4 = vld [vmem:[%s1442_s1 + $0x20] sm:$0xff]  ;;  %v102_v9 = vld [vmem:[%s1442_s1 + $0x30] sm:$0xff]  ;;  %v103_v10 = vld [vmem:[%s1442_s1 + $0x38] sm:$0xff] }
  0x38   :  { %636 = vmatpush.bf16.msrb.mxu2 %v991_v63  ;;  %665 = vmatpush.bf16.msrb.mxu3 %v995_v3  ;;  %v902_v63 = vld [vmem:[#allocation2] sm:$0xf]  ;;  %v904_v3 = vld [vmem:[#allocation2 + $0x10] sm:$0xf0]  ;;  %v106_v8 = vpack.c.bf16 %v101_v5, %v100_v4  ;;  %v53_v13 = vld [vmem:[%s1441_s0 + $0x8] sm:$0xff] }
  0x39   :  { %607 = vmatpush.bf16.msrb.mxu1 %v987_v11  ;;  %v903_v6 = vor.u32 %v1030_v0, %v902_v63  ;;  %v907_v7 = vor.u32 %v1028_v2, %v904_v3  ;;  %v107_v11 = vpack.c.bf16 %v103_v10, %v102_v9  ;;  %v54_v15 = vld [vmem:[%s1441_s0 + $0x10] sm:$0xff]  ;;  %v56_v18 = vld [vmem:[%s1441_s0 + $0x20] sm:$0xff]  ;;  %v57_v19 = vld [vmem:[%s1441_s0 + $0x28] sm:$0xff] }
  0x3a   :  { %579 = vmatpush.bf16.msrb.mxu0 %v967_v23  ;;  %v62_v20 = vpack.c.bf16 %v57_v19, %v56_v18  ;;  %v58_v21 = vld [vmem:[%s1441_s0 + $0x30] sm:$0xff]  ;;  %v59_v22 = vld [vmem:[%s1441_s0 + $0x38] sm:$0xff]  ;;  %v692_v54 = vld [vmem:[%s1445_s4] sm:$0xf] }
  0x3b   :  { %v63_v23 = vpack.c.bf16 %v59_v22, %v58_v21  ;;  %v1281_v56 = vperm.slane %v692_v54, 0  ;;  %v1285_v59 = vperm.slane %v692_v54, 1  ;;  %v1297_v3 = vperm.slane %v692_v54, 3 }
  0x3c   :  { %637 = vmatpush.bf16.msrb.mxu2 %v975_v12  ;;  %666 = vmatpush.bf16.msrb.mxu3 %v979_v16  ;;  %v52_v12 = vld [vmem:[%s1441_s0] sm:$0xff]  ;;  %v55_v16 = vld [vmem:[%s1441_s0 + $0x18] sm:$0xff] }
  0x3d   :  { %608 = vmatpush.bf16.msrb.mxu1 %v971_v24  ;;  %313 = vmatmul.bf16.gmra.mxu0 %v105_v29  ;;  %v60_v14 = vpack.c.bf16 %v53_v13, %v52_v12  ;;  %v61_v17 = vpack.c.bf16 %v55_v16, %v54_v15 }
  0x3e   :  { %342 = vmatmul.bf16.gmra.mxu1 %v105_v29  ;;  %580 = vmatpush.bf16.msrb.mxu0 %v951_v36 }
  0x3f   :  { %371 = vmatmul.bf16.gmra.mxu2 %v105_v29  ;;  %400 = vmatmul.bf16.gmra.mxu3 %v105_v29 }
  0x40   :  { %638 = vmatpush.bf16.msrb.mxu2 %v959_v25  ;;  %667 = vmatpush.bf16.msrb.mxu3 %v963_v30 }
  0x41   :  { %609 = vmatpush.bf16.msrb.mxu1 %v955_v37 }
  0x42   :  { %581 = vmatpush.bf16.msrb.mxu0 %v935_v44 }
  0x44   :  { %639 = vmatpush.bf16.msrb.mxu2 %v943_v38  ;;  %668 = vmatpush.bf16.msrb.mxu3 %v947_v41 }
  0x45   :  { %610 = vmatpush.bf16.msrb.mxu1 %v939_v48 }
  0x46   :  { %582 = vmatpush.bf16.msrb.mxu0 %v919_v60 }
  0x48   :  { %640 = vmatpush.bf16.msrb.mxu2 %v927_v49  ;;  %669 = vmatpush.bf16.msrb.mxu3 %v931_v53 }
  0x49   :  { %611 = vmatpush.bf16.msrb.mxu1 %v923_v61 }
  0x4a   :  { %583 = vmatpush.bf16.msrb.mxu0 %v903_v6 }
  0x4c   :  { %641 = vmatpush.bf16.msrb.mxu2 %v911_v62  ;;  %670 = vmatpush.bf16.msrb.mxu3 %v915_v1  ;;  %v1295_v1 = vperm.slane %v692_v54, 2 }
  0x4d   :  { %612 = vmatpush.bf16.msrb.mxu1 %v907_v7  ;;  %318 = vmatmul.bf16.gmra.mxu0 %v106_v8 }
  0x4e   :  { %347 = vmatmul.bf16.gmra.mxu1 %v106_v8 }
  0x4f   :  { %376 = vmatmul.bf16.gmra.mxu2 %v106_v8  ;;  %405 = vmatmul.bf16.gmra.mxu3 %v106_v8 }
  0x5d   :  { %323 = vmatmul.bf16.gmra.mxu0 %v107_v11 }
  0x5e   :  { %352 = vmatmul.bf16.gmra.mxu1 %v107_v11 }
  0x5f   :  { %381 = vmatmul.bf16.gmra.mxu2 %v107_v11  ;;  %410 = vmatmul.bf16.gmra.mxu3 %v107_v11 }
  0x6d   :  { %584 = vmatmul.bf16.vlgmr.msrb.gmra.mxu0 %v60_v14 }
  0x6e   :  { %613 = vmatmul.bf16.vlgmr.msrb.gmra.mxu1 %v60_v14 }
  0x6f   :  { %642 = vmatmul.bf16.vlgmr.msrb.gmra.mxu2 %v60_v14  ;;  %671 = vmatmul.bf16.vlgmr.msrb.gmra.mxu3 %v60_v14 }
  0x7d   :  { %589 = vmatmul.bf16.gmra.mxu0 %v61_v17 }
  0x7e   :  { %618 = vmatmul.bf16.gmra.mxu1 %v61_v17 }
  0x7f   :  { %647 = vmatmul.bf16.gmra.mxu2 %v61_v17  ;;  %676 = vmatmul.bf16.gmra.mxu3 %v61_v17 }
  0x8d   :  { %594 = vmatmul.bf16.gmra.mxu0 %v62_v20 }
  0x8e   :  { %623 = vmatmul.bf16.gmra.mxu1 %v62_v20 }
  0x8f   :  { %652 = vmatmul.bf16.gmra.mxu2 %v62_v20  ;;  %681 = vmatmul.bf16.gmra.mxu3 %v62_v20 }
  0x9d   :  { %599 = vmatmul.bf16.gmra.mxu0 %v63_v23 }
  0x9e   :  { %628 = vmatmul.bf16.gmra.mxu1 %v63_v23 }
  0x9f   :  { %657 = vmatmul.bf16.gmra.mxu2 %v63_v23  ;;  %686 = vmatmul.bf16.gmra.mxu3 %v63_v23 }
  0xaa   :  { %v309_v24 = vpop.f32.mrf.mxu0 }
  0xab   :  { %v338_v25 = vpop.f32.mrf.mxu1 }
  0xb2   :  { %v367_v26 = vpop.f32.mrf.mxu2  ;;  %v396_v27 = vpop.f32.mrf.mxu3 }
  0xb3   :  { %v311_v28 = vpop.f32.mrf.mxu0  ;;  %v340_v29 = vpop.f32.mrf.mxu1 }
  0xba   :  { %v369_v30 = vpop.f32.mrf.mxu2  ;;  %v398_v31 = vpop.f32.mrf.mxu3 }
  0xbb   :  { %v314_v32 = vpop.f32.mrf.mxu0  ;;  %v343_v33 = vpop.f32.mrf.mxu1 }
  0xc2   :  { %v1236_v34 = vpop.f32.mrf.mxu2  ;;  %v1238_v35 = vpop.f32.mrf.mxu3 }
  0xc3   :  { %v1240_v36 = vpop.f32.mrf.mxu0  ;;  %v1242_v37 = vpop.f32.mrf.mxu1 }
  0xca   :  { %v1244_v38 = vpop.f32.mrf.mxu2  ;;  %v1246_v39 = vpop.f32.mrf.mxu3 }
  0xcb   :  { %v1248_v40 = vpop.f32.mrf.mxu0  ;;  %v1250_v41 = vpop.f32.mrf.mxu1 }
  0xd2   :  { %v1252_v42 = vpop.f32.mrf.mxu2  ;;  %v1254_v43 = vpop.f32.mrf.mxu3 }
  0xd3   :  { %v1256_v44 = vpop.f32.mrf.mxu0  ;;  %v1258_v45 = vpop.f32.mrf.mxu1 }
  0xda   :  { %v1260_v46 = vpop.f32.mrf.mxu2  ;;  %v1262_v47 = vpop.f32.mrf.mxu3 }
  0xdb   :  { %v1264_v48 = vpop.f32.mrf.mxu0  ;;  %v1266_v49 = vpop.f32.mrf.mxu1 }
  0xe2   :  { %v1268_v50 = vpop.f32.mrf.mxu2  ;;  %v1270_v51 = vpop.f32.mrf.mxu3 }
  0xe3   :  { %v1272_v52 = vpop.f32.mrf.mxu0  ;;  %v1274_v53 = vpop.f32.mrf.mxu1 }
  0xea   :  { %v1279_v55 = vpop.f32.mrf.mxu2  ;;  %v1283_v57 = vpop.f32.mrf.mxu3 }
  0xeb   :  { %v585_v58 = vpop.f32.mrf.mxu0  ;;  %v614_v61 = vpop.f32.mrf.mxu1 }
  0xec   :  { %v586_v60 = vadd.f32 %v585_v58, %v309_v24  ;;  %v615_v62 = vadd.f32 %v614_v61, %v338_v25 }
  0xee   :  { %v702_v63 = vadd.f32 %v1281_v56, %v586_v60  ;;  %v703_v0 = vadd.f32 %v1285_v59, %v615_v62 }
  0xf0   :  { %734 = vst [vmem:[%s1446_s5] sm:$0xff] %v702_v63 }
  0xf1   :  { %735 = vst [vmem:[%s1446_s5 + $0x8] sm:$0xff] %v703_v0 }
  0xf2   :  { %v643_v2 = vpop.f32.mrf.mxu2  ;;  %v672_v5 = vpop.f32.mrf.mxu3 }
  0xf3   :  { %v644_v4 = vadd.f32 %v643_v2, %v367_v26  ;;  %v587_v6 = vpop.f32.mrf.mxu0  ;;  %v673_v7 = vadd.f32 %v672_v5, %v396_v27  ;;  %v616_v9 = vpop.f32.mrf.mxu1 }
  0xf4   :  { %v588_v8 = vadd.f32 %v587_v6, %v311_v28  ;;  %v617_v11 = vadd.f32 %v616_v9, %v340_v29 }
  0xf5   :  { %v704_v10 = vadd.f32 %v1295_v1, %v644_v4  ;;  %v705_v12 = vadd.f32 %v1297_v3, %v673_v7 }
  0xf6   :  { %v706_v13 = vadd.f32 %v1281_v56, %v588_v8  ;;  %v707_v14 = vadd.f32 %v1285_v59, %v617_v11 }
  0xf7   :  { %736 = vst [vmem:[%s1446_s5 + $0x10] sm:$0xff] %v704_v10 }
  0xf8   :  { %737 = vst [vmem:[%s1446_s5 + $0x18] sm:$0xff] %v705_v12 }
  0xf9   :  { %738 = vst [vmem:[%s1446_s5 + $0x20] sm:$0xff] %v706_v13 }
  0xfa   :  { %739 = vst [vmem:[%s1446_s5 + $0x28] sm:$0xff] %v707_v14  ;;  %v645_v15 = vpop.f32.mrf.mxu2  ;;  %v674_v17 = vpop.f32.mrf.mxu3 }
  0xfb   :  { %v646_v16 = vadd.f32 %v645_v15, %v369_v30  ;;  %v590_v18 = vpop.f32.mrf.mxu0  ;;  %v675_v19 = vadd.f32 %v674_v17, %v398_v31  ;;  %v619_v21 = vpop.f32.mrf.mxu1 }
  0xfc   :  { %v591_v20 = vadd.f32 %v590_v18, %v314_v32  ;;  %v620_v23 = vadd.f32 %v619_v21, %v343_v33 }
  0xfd   :  { %v708_v22 = vadd.f32 %v1295_v1, %v646_v16  ;;  %v709_v24 = vadd.f32 %v1297_v3, %v675_v19 }
  0xfe   :  { %v710_v25 = vadd.f32 %v1281_v56, %v591_v20  ;;  %v711_v26 = vadd.f32 %v1285_v59, %v620_v23 }
  0xff   :  { %740 = vst [vmem:[%s1446_s5 + $0x30] sm:$0xff] %v708_v22 }
 0x100   :  { %741 = vst [vmem:[%s1446_s5 + $0x38] sm:$0xff] %v709_v24 }
 0x101   :  { %742 = vst [vmem:[%s1446_s5 + $0x40] sm:$0xff] %v710_v25 }
 0x102   :  { %743 = vst [vmem:[%s1446_s5 + $0x48] sm:$0xff] %v711_v26  ;;  %v648_v27 = vpop.f32.mrf.mxu2  ;;  %v677_v29 = vpop.f32.mrf.mxu3 }
 0x103   :  { %v649_v28 = vadd.f32 %v648_v27, %v1236_v34  ;;  %v592_v30 = vpop.f32.mrf.mxu0  ;;  %v678_v31 = vadd.f32 %v677_v29, %v1238_v35  ;;  %v621_v33 = vpop.f32.mrf.mxu1 }
 0x104   :  { %v593_v32 = vadd.f32 %v592_v30, %v1240_v36  ;;  %v622_v58 = vadd.f32 %v621_v33, %v1242_v37 }
 0x105   :  { %v712_v54 = vadd.f32 %v1295_v1, %v649_v28  ;;  %v713_v60 = vadd.f32 %v1297_v3, %v678_v31 }
 0x106   :  { %v714_v61 = vadd.f32 %v1281_v56, %v593_v32  ;;  %v715_v34 = vadd.f32 %v1285_v59, %v622_v58 }
 0x107   :  { %744 = vst [vmem:[%s1446_s5 + $0x50] sm:$0xff] %v712_v54 }
 0x108   :  { %745 = vst [vmem:[%s1446_s5 + $0x58] sm:$0xff] %v713_v60 }
 0x109   :  { %746 = vst [vmem:[%s1446_s5 + $0x60] sm:$0xff] %v714_v61 }
 0x10a   :  { %747 = vst [vmem:[%s1446_s5 + $0x68] sm:$0xff] %v715_v34  ;;  %v650_v35 = vpop.f32.mrf.mxu2  ;;  %v679_v37 = vpop.f32.mrf.mxu3 }
 0x10b   :  { %v651_v36 = vadd.f32 %v650_v35, %v1244_v38  ;;  %v595_v62 = vpop.f32.mrf.mxu0  ;;  %v680_v63 = vadd.f32 %v679_v37, %v1246_v39  ;;  %v624_v2 = vpop.f32.mrf.mxu1 }
 0x10c   :  { %v596_v0 = vadd.f32 %v595_v62, %v1248_v40  ;;  %v625_v5 = vadd.f32 %v624_v2, %v1250_v41 }
 0x10d   :  { %v716_v4 = vadd.f32 %v1295_v1, %v651_v36  ;;  %v717_v6 = vadd.f32 %v1297_v3, %v680_v63 }
 0x10e   :  { %v718_v7 = vadd.f32 %v1281_v56, %v596_v0  ;;  %v719_v38 = vadd.f32 %v1285_v59, %v625_v5 }
 0x10f   :  { %748 = vst [vmem:[%s1446_s5 + $0x70] sm:$0xff] %v716_v4 }
 0x110   :  { %749 = vst [vmem:[%s1446_s5 + $0x78] sm:$0xff] %v717_v6 }
 0x111   :  { %750 = vst [vmem:[%s1446_s5 + $0x80] sm:$0xff] %v718_v7 }
 0x112   :  { %751 = vst [vmem:[%s1446_s5 + $0x88] sm:$0xff] %v719_v38  ;;  %v653_v39 = vpop.f32.mrf.mxu2  ;;  %v682_v41 = vpop.f32.mrf.mxu3 }
 0x113   :  { %v654_v40 = vadd.f32 %v653_v39, %v1252_v42  ;;  %v597_v8 = vpop.f32.mrf.mxu0  ;;  %v683_v9 = vadd.f32 %v682_v41, %v1254_v43  ;;  %v626_v11 = vpop.f32.mrf.mxu1 }
 0x114   :  { %v598_v10 = vadd.f32 %v597_v8, %v1256_v44  ;;  %v627_v13 = vadd.f32 %v626_v11, %v1258_v45 }
 0x115   :  { %v720_v12 = vadd.f32 %v1295_v1, %v654_v40  ;;  %v721_v14 = vadd.f32 %v1297_v3, %v683_v9 }
 0x116   :  { %v722_v15 = vadd.f32 %v1281_v56, %v598_v10  ;;  %v723_v42 = vadd.f32 %v1285_v59, %v627_v13 }
 0x117   :  { %752 = vst [vmem:[%s1446_s5 + $0x90] sm:$0xff] %v720_v12 }
 0x118   :  { %753 = vst [vmem:[%s1446_s5 + $0x98] sm:$0xff] %v721_v14 }
 0x119   :  { %754 = vst [vmem:[%s1446_s5 + $0xa0] sm:$0xff] %v722_v15 }
 0x11a   :  { %755 = vst [vmem:[%s1446_s5 + $0xa8] sm:$0xff] %v723_v42  ;;  %v655_v43 = vpop.f32.mrf.mxu2  ;;  %v684_v45 = vpop.f32.mrf.mxu3 }
 0x11b   :  { %v656_v44 = vadd.f32 %v655_v43, %v1260_v46  ;;  %v600_v16 = vpop.f32.mrf.mxu0  ;;  %v685_v17 = vadd.f32 %v684_v45, %v1262_v47  ;;  %v629_v19 = vpop.f32.mrf.mxu1 }
 0x11c   :  { %v601_v18 = vadd.f32 %v600_v16, %v1264_v48  ;;  %v630_v21 = vadd.f32 %v629_v19, %v1266_v49 }
 0x11d   :  { %v724_v20 = vadd.f32 %v1295_v1, %v656_v44  ;;  %v725_v22 = vadd.f32 %v1297_v3, %v685_v17 }
 0x11e   :  { %v726_v23 = vadd.f32 %v1281_v56, %v601_v18  ;;  %v727_v46 = vadd.f32 %v1285_v59, %v630_v21 }
 0x11f   :  { %756 = vst [vmem:[%s1446_s5 + $0xb0] sm:$0xff] %v724_v20 }
 0x120   :  { %757 = vst [vmem:[%s1446_s5 + $0xb8] sm:$0xff] %v725_v22 }
 0x121   :  { %758 = vst [vmem:[%s1446_s5 + $0xc0] sm:$0xff] %v726_v23 }
 0x122   :  { %759 = vst [vmem:[%s1446_s5 + $0xc8] sm:$0xff] %v727_v46  ;;  %v658_v47 = vpop.f32.mrf.mxu2  ;;  %v687_v49 = vpop.f32.mrf.mxu3 }
 0x123   :  { %v659_v48 = vadd.f32 %v658_v47, %v1268_v50  ;;  %v602_v24 = vpop.f32.mrf.mxu0  ;;  %v688_v25 = vadd.f32 %v687_v49, %v1270_v51  ;;  %v631_v27 = vpop.f32.mrf.mxu1 }
 0x124   :  { %v603_v26 = vadd.f32 %v602_v24, %v1272_v52  ;;  %v632_v29 = vadd.f32 %v631_v27, %v1274_v53 }
 0x125   :  { %v728_v28 = vadd.f32 %v1295_v1, %v659_v48  ;;  %v729_v30 = vadd.f32 %v1297_v3, %v688_v25 }
 0x126   :  { %v730_v31 = vadd.f32 %v1281_v56, %v603_v26  ;;  %v731_v50 = vadd.f32 %v1285_v59, %v632_v29 }
 0x127   :  { %760 = vst [vmem:[%s1446_s5 + $0xd0] sm:$0xff] %v728_v28 }
 0x128   :  { %761 = vst [vmem:[%s1446_s5 + $0xd8] sm:$0xff] %v729_v30 }
 0x129   :  { %762 = vst [vmem:[%s1446_s5 + $0xe0] sm:$0xff] %v730_v31 }
 0x12a   :  { %763 = vst [vmem:[%s1446_s5 + $0xe8] sm:$0xff] %v731_v50  ;;  %v660_v51 = vpop.f32.mrf.mxu2  ;;  %v689_v53 = vpop.f32.mrf.mxu3 }
 0x12b   :  { %v661_v52 = vadd.f32 %v660_v51, %v1279_v55  ;;  %v690_v56 = vadd.f32 %v689_v53, %v1283_v57 }
 0x12d   :  { %v732_v59 = vadd.f32 %v1295_v1, %v661_v52  ;;  %v733_v32 = vadd.f32 %v1297_v3, %v690_v56 }
 0x12f   :  { %764 = vst [vmem:[%s1446_s5 + $0xf0] sm:$0xff] %v732_v59 }
 0x130   :  { %765 = vst [vmem:[%s1446_s5 + $0xf8] sm:$0xff] %v733_v32 }
 0x131   :  { %770 = vsyncpa [#allocation3], 1 }
 0x132   :  { %771 = vsyncpa [#allocation5], 1 }

// kernel: model_forward.12
= control target key start
LH: loop header
LB: loop body
LE: loop exit
PB: predicated region body
PF: predicated region fallthrough
CT: control target
= control target key end

     0   :  { %11 = vsyncpa [#allocation7], 0  ;;  %s1603_s0 = inlined_call_operand.vmem [shape: f32[8,8,512], index: 0, kind: input, shape index: {}]   ;;  %s1604_s1 = inlined_call_operand.vmem [shape: f32[8,8,512], index: 1, kind: input, shape index: {}]   ;;  %s1605_s2 = inlined_call_operand.hbm [shape: bf16[128,512], index: 2, kind: input, shape index: {}]   ;;  %s1606_s3 = inlined_call_operand.hbm [shape: bf16[128,512], index: 3, kind: input, shape index: {}]   ;;  %s1607_s4 = inlined_call_operand.vmem [shape: f32[8,128], index: 4, kind: output, shape index: {0}]   ;;  %s1608_s5 = inlined_call_operand.vmem [shape: f32[8,128], index: 5, kind: output, shape index: {1}]  }
   0x1   :  { %12 = vsyncpa [#allocation9], 0  ;;  %s1510_s18 = smov 0  }
   0x2 LB: > { %s172_s21 = sshll.u32 %s1605_s2, 4  ;;  %s1519_s22 = sadd.s32 4294967295, %s1473_s18   ;;  %s1473_s18 = sphi %s1510_s18, %s18_s18   ;;  %s173_s21 = int_to_ptr.hbm [resolvable:$true] %s172_s21 }
   0x3   : > { %p992_p0 = scmp.ge.s32.totalorder %s1473_s18, 1  ;;  %p161_p1 = scmp.lt.s32.totalorder %s1473_s18, 9 }
   0x4   : > { %p993_p2 = scmp.ne.s32.totalorder %s1519_s22, 0  ;;  %p1350_p3 = scmp.eq.s32.totalorder %s1519_s22, 0 }
   0x5   : > { %p1525_p4 = pnand %p992_p0, %p161_p1  ;;  %s1475_s24 = smov [#allocation6]  }
   0x6   : > { %s174_s25 = sshll.u32 %s1475_s24, 4  ;;  %s186_s28 = sshll.u32 %s1606_s3, 4  ;;  %s175_s25 = int_to_ptr.vmem [resolvable:$true] %s174_s25  ;;  %s187_s28 = int_to_ptr.hbm [resolvable:$true] %s186_s28 }
   0x7   : > { %p1343_p5 = pneg %p1525_p4  ;;  %s1476_s29 = smov [#allocation8]  }
   0x8   : > { %s188_s30 = sshll.u32 %s1476_s29, 4  ;;  %s1477_s6 = smov 256   ;;  %s189_s30 = int_to_ptr.vmem [resolvable:$true] %s188_s30 }
   0x9   : > { %p1344_p6 = pnand %p1350_p3, %p1343_p5  ;;  %s1478_s7 = smov 16  }
   0xa   : > { %222 = sbr.rel (%p1525_p4) target bundleno = 269 (0x10d), region = 36 }
   0xb   : > { %1346 = dma.hbm_to_vmem [thread:$0]  (!%p1344_p6), %s173_s21, 4096, %s175_s25, [#allocation7], %s1477_s6, %s1477_s6, %s1478_s7  }
   0xc   : > { %1349 = dma.hbm_to_vmem [thread:$0]  (!%p1344_p6), %s187_s28, 4096, %s189_s30, [#allocation9], %s1477_s6, %s1477_s6, %s1478_s7  }
   0xf   : > { %1464 = dma.done.wait (%p1350_p3), [#allocation7], 4096  }
  0x10   : > { %1466 = vsyncadd (%p1350_p3), [#allocation7], 4294963200 }
  0x11   : > { %1468 = dma.done.wait (%p1350_p3), [#allocation9], 4096  }
  0x12   : > { %1470 = vsyncadd (%p1350_p3), [#allocation9], 4294963200  ;;  %p257_p7 = scmp.lt.s32.totalorder %s1519_s22, 7  ;;  %s262_s8 = ssub.s32 7, %s1519_s22 }
  0x13   : > { %p263_p8 = scmp.lt.s32.totalorder %s262_s8, 7  ;;  %272 = sbr.rel (%p993_p2) target bundleno = 29 (0x1d), region = 48 }
  0x14   : > { %s258_s9 = scalar_select %p257_p7, %s1519_s22, 7 }
  0x15   : > { %s1617_s8 = smov (!%p263_p8, %s262_s8), 7 }
  0x16   : > { %s1269_s10 = sshll.u32 %s258_s9, 5  ;;  %s1270_s14 = sshll.u32 %s1617_s8, 5 }
  0x17   : > { %s1552_s13 = scalar_lea.vmem %s1603_s0, %s1269_s10  ;;  %s1557_s17 = scalar_lea.vmem %s1604_s1, %s1270_s14 }
  0x18   : > { %v1479_v0 = vmov 0.0  }
  0x19   : > { %273 = vst [vmem:[#allocation2] sm:$0xff] %v1479_v0 }
  0x1a   : > { %274 = vst [vmem:[#allocation3] sm:$0xff] %v1479_v0 }
  0x1b   : > { %275 = vst [vmem:[#allocation4] sm:$0xff] %v1479_v0 }
  0x1c   : > { %276 = vst [vmem:[#allocation5] sm:$0xff] %v1479_v0 }
  0x1d PF: > { %v1118_v1 = vld [vmem:[#allocation6 + $0xe0] sm:$0xf]  ;;  %v1301_v2 = vld [vmem:[#allocation6 + $0xec] sm:$0xf0]  ;;  %v1299_v3 = vld [vmem:[#allocation6 + $0xe4] sm:$0xf] }
  0x1e   : > { %v1119_v4 = vor.u32 %v1301_v2, %v1118_v1  ;;  %v1120_v5 = vld [vmem:[#allocation6 + $0xf0] sm:$0xf0]  ;;  %v1300_v6 = vld [vmem:[#allocation6 + $0xec] sm:$0xf]  ;;  %v1128_v7 = vld [vmem:[#allocation6 + $0xf8] sm:$0xf0] }
  0x1f   : > { %v1123_v8 = vor.u32 %v1299_v3, %v1120_v5  ;;  %v1131_v9 = vor.u32 %v1300_v6, %v1128_v7  ;;  %v1102_v10 = vld [vmem:[#allocation6 + $0xc0] sm:$0xf]  ;;  %v1297_v11 = vld [vmem:[#allocation6 + $0xcc] sm:$0xf0]  ;;  %v1295_v12 = vld [vmem:[#allocation6 + $0xc4] sm:$0xf] }
  0x20   : > { %475 = vmatpush.bf16.msra.mxu0 %v1119_v4  ;;  %v1103_v13 = vor.u32 %v1297_v11, %v1102_v10  ;;  %v1104_v14 = vld [vmem:[#allocation6 + $0xd0] sm:$0xf0]  ;;  %v1296_v15 = vld [vmem:[#allocation6 + $0xcc] sm:$0xf]  ;;  %v1112_v16 = vld [vmem:[#allocation6 + $0xd8] sm:$0xf0] }
  0x21   : > { %488 = vmatpush.bf16.msra.mxu1 %v1123_v8  ;;  %514 = vmatpush.bf16.msra.mxu3 %v1131_v9  ;;  %v1107_v17 = vor.u32 %v1295_v12, %v1104_v14  ;;  %v1115_v18 = vor.u32 %v1296_v15, %v1112_v16  ;;  %v1126_v19 = vld [vmem:[#allocation6 + $0xe8] sm:$0xf]  ;;  %v1302_v20 = vld [vmem:[#allocation6 + $0xf4] sm:$0xf0]  ;;  %v1086_v21 = vld [vmem:[#allocation6 + $0xa0] sm:$0xf] }
  0x22   : > { %v1127_v22 = vor.u32 %v1302_v20, %v1126_v19  ;;  %v1293_v23 = vld [vmem:[#allocation6 + $0xac] sm:$0xf0]  ;;  %v1291_v24 = vld [vmem:[#allocation6 + $0xa4] sm:$0xf]  ;;  %v1088_v25 = vld [vmem:[#allocation6 + $0xb0] sm:$0xf0] }
  0x23   : > { %v1292_v26 = vld [vmem:[#allocation6 + $0xac] sm:$0xf]  ;;  %v1096_v27 = vld [vmem:[#allocation6 + $0xb8] sm:$0xf0]  ;;  %v1110_v28 = vld [vmem:[#allocation6 + $0xc8] sm:$0xf]  ;;  %v1087_v29 = vor.u32 %v1293_v23, %v1086_v21  ;;  %v1091_v33 = vor.u32 %v1291_v24, %v1088_v25 }
  0x24   : > { %476 = vmatpush.bf16.msra.mxu0 %v1103_v13  ;;  %501 = vmatpush.bf16.msra.mxu2 %v1127_v22  ;;  %v1298_v30 = vld [vmem:[#allocation6 + $0xd4] sm:$0xf0]  ;;  %v1070_v31 = vld [vmem:[#allocation6 + $0x80] sm:$0xf]  ;;  %v1289_v32 = vld [vmem:[#allocation6 + $0x8c] sm:$0xf0]  ;;  %v1099_v34 = vor.u32 %v1292_v26, %v1096_v27 }
  0x25   : > { %489 = vmatpush.bf16.msra.mxu1 %v1107_v17  ;;  %515 = vmatpush.bf16.msra.mxu3 %v1115_v18  ;;  %v1111_v35 = vor.u32 %v1298_v30, %v1110_v28  ;;  %v1287_v36 = vld [vmem:[#allocation6 + $0x84] sm:$0xf]  ;;  %v1072_v37 = vld [vmem:[#allocation6 + $0x90] sm:$0xf0]  ;;  %v1288_v38 = vld [vmem:[#allocation6 + $0x8c] sm:$0xf]  ;;  %v1071_v42 = vor.u32 %v1289_v32, %v1070_v31 }
  0x26   : > { %v1080_v39 = vld [vmem:[#allocation6 + $0x98] sm:$0xf0]  ;;  %v1094_v40 = vld [vmem:[#allocation6 + $0xa8] sm:$0xf]  ;;  %v1294_v41 = vld [vmem:[#allocation6 + $0xb4] sm:$0xf0]  ;;  %v1075_v46 = vor.u32 %v1287_v36, %v1072_v37 }
  0x27   : > { %v1095_v43 = vor.u32 %v1294_v41, %v1094_v40  ;;  %v1054_v44 = vld [vmem:[#allocation6 + $0x60] sm:$0xf]  ;;  %v1285_v45 = vld [vmem:[#allocation6 + $0x6c] sm:$0xf0]  ;;  %v1083_v47 = vor.u32 %v1288_v38, %v1080_v39  ;;  %v1283_v48 = vld [vmem:[#allocation6 + $0x64] sm:$0xf] }
  0x28   : > { %477 = vmatpush.bf16.msra.mxu0 %v1087_v29  ;;  %502 = vmatpush.bf16.msra.mxu2 %v1111_v35  ;;  %v1078_v49 = vld [vmem:[#allocation6 + $0x88] sm:$0xf]  ;;  %v1290_v50 = vld [vmem:[#allocation6 + $0x94] sm:$0xf0]  ;;  %v1056_v51 = vld [vmem:[#allocation6 + $0x70] sm:$0xf0]  ;;  %v1055_v54 = vor.u32 %v1285_v45, %v1054_v44 }
  0x29   : > { %490 = vmatpush.bf16.msra.mxu1 %v1091_v33  ;;  %516 = vmatpush.bf16.msra.mxu3 %v1099_v34  ;;  %v1284_v52 = vld [vmem:[#allocation6 + $0x6c] sm:$0xf]  ;;  %v1064_v53 = vld [vmem:[#allocation6 + $0x78] sm:$0xf0]  ;;  %v1079_v55 = vor.u32 %v1290_v50, %v1078_v49  ;;  %v1038_v56 = vld [vmem:[#allocation6 + $0x40] sm:$0xf]  ;;  %v1059_v58 = vor.u32 %v1283_v48, %v1056_v51 }
  0x2a   : > { %v1281_v57 = vld [vmem:[#allocation6 + $0x4c] sm:$0xf0]  ;;  %v1067_v59 = vor.u32 %v1284_v52, %v1064_v53  ;;  %v1279_v60 = vld [vmem:[#allocation6 + $0x44] sm:$0xf]  ;;  %v1062_v61 = vld [vmem:[#allocation6 + $0x68] sm:$0xf] }
  0x2b   : > { %v1286_v62 = vld [vmem:[#allocation6 + $0x74] sm:$0xf0]  ;;  %v1040_v63 = vld [vmem:[#allocation6 + $0x50] sm:$0xf0]  ;;  %v1280_v0 = vld [vmem:[#allocation6 + $0x4c] sm:$0xf]  ;;  %v1039_v2 = vor.u32 %v1281_v57, %v1038_v56 }
  0x2c   : > { %478 = vmatpush.bf16.msra.mxu0 %v1071_v42  ;;  %503 = vmatpush.bf16.msra.mxu2 %v1095_v43  ;;  %v1048_v1 = vld [vmem:[#allocation6 + $0x58] sm:$0xf0]  ;;  %v1063_v3 = vor.u32 %v1286_v62, %v1062_v61  ;;  %v1022_v4 = vld [vmem:[#allocation6 + $0x20] sm:$0xf]  ;;  %v1277_v5 = vld [vmem:[#allocation6 + $0x2c] sm:$0xf0]  ;;  %v1043_v6 = vor.u32 %v1279_v60, %v1040_v63 }
  0x2d   : > { %491 = vmatpush.bf16.msra.mxu1 %v1075_v46  ;;  %517 = vmatpush.bf16.msra.mxu3 %v1083_v47  ;;  %v1051_v7 = vor.u32 %v1280_v0, %v1048_v1  ;;  %v1275_v8 = vld [vmem:[#allocation6 + $0x24] sm:$0xf]  ;;  %v1046_v9 = vld [vmem:[#allocation6 + $0x48] sm:$0xf]  ;;  %v1282_v10 = vld [vmem:[#allocation6 + $0x54] sm:$0xf0]  ;;  %v1023_v14 = vor.u32 %v1277_v5, %v1022_v4 }
  0x2e   : > { %v1024_v11 = vld [vmem:[#allocation6 + $0x30] sm:$0xf0]  ;;  %v1276_v12 = vld [vmem:[#allocation6 + $0x2c] sm:$0xf]  ;;  %v1032_v13 = vld [vmem:[#allocation6 + $0x38] sm:$0xf0]  ;;  %v1047_v15 = vor.u32 %v1282_v10, %v1046_v9 }
  0x2f   : > { %v1006_v16 = vld [vmem:[#allocation6] sm:$0xf]  ;;  %v1273_v17 = vld [vmem:[#allocation6 + $0xc] sm:$0xf0]  ;;  %v1271_v18 = vld [vmem:[#allocation6 + $0x4] sm:$0xf]  ;;  %v1027_v19 = vor.u32 %v1275_v8, %v1024_v11  ;;  %v1035_v20 = vor.u32 %v1276_v12, %v1032_v13 }
  0x30   : > { %479 = vmatpush.bf16.msra.mxu0 %v1055_v54  ;;  %504 = vmatpush.bf16.msra.mxu2 %v1079_v55  ;;  %v1008_v21 = vld [vmem:[#allocation6 + $0x10] sm:$0xf0]  ;;  %v1030_v22 = vld [vmem:[#allocation6 + $0x28] sm:$0xf]  ;;  %v1278_v23 = vld [vmem:[#allocation6 + $0x34] sm:$0xf0]  ;;  %v1007_v30 = vor.u32 %v1273_v17, %v1006_v16 }
  0x31   : > { %492 = vmatpush.bf16.msra.mxu1 %v1059_v58  ;;  %518 = vmatpush.bf16.msra.mxu3 %v1067_v59  ;;  %v1272_v24 = vld [vmem:[#allocation6 + $0xc] sm:$0xf]  ;;  %v1016_v25 = vld [vmem:[#allocation6 + $0x18] sm:$0xf0]  ;;  %v1249_v26 = vld [vmem:[#allocation8 + $0xe0] sm:$0xf]  ;;  %v1031_v34 = vor.u32 %v1278_v23, %v1030_v22  ;;  %v1011_v35 = vor.u32 %v1271_v18, %v1008_v21 }
  0x32   : > { %v1333_v27 = vld [vmem:[#allocation8 + $0xec] sm:$0xf0]  ;;  %v1331_v28 = vld [vmem:[#allocation8 + $0xe4] sm:$0xf]  ;;  %v1251_v29 = vld [vmem:[#allocation8 + $0xf0] sm:$0xf0]  ;;  %v1019_v36 = vor.u32 %v1272_v24, %v1016_v25 }
  0x33   : > { %v1332_v31 = vld [vmem:[#allocation8 + $0xec] sm:$0xf]  ;;  %v1259_v32 = vld [vmem:[#allocation8 + $0xf8] sm:$0xf0]  ;;  %v281_v33 = vld [vmem:[#allocation2] sm:$0xff]  ;;  %v1250_v39 = vor.u32 %v1333_v27, %v1249_v26  ;;  %v1254_v40 = vor.u32 %v1331_v28, %v1251_v29  ;;  %p1266_p9 = scmp.ne.s32.totalorder %s1519_s22, 7 }
  0x34   : > { %480 = vmatpush.bf16.msra.mxu0 %v1039_v2  ;;  %505 = vmatpush.bf16.msra.mxu2 %v1063_v3  ;;  %v1014_v37 = vld [vmem:[#allocation6 + $0x8] sm:$0xf]  ;;  %v1274_v38 = vld [vmem:[#allocation6 + $0x14] sm:$0xf0]  ;;  %v1233_v41 = vld [vmem:[#allocation8 + $0xc0] sm:$0xf]  ;;  %v1262_v44 = vor.u32 %v1332_v31, %v1259_v32  ;;  %v282_v45 = vpack.c.bf16 %v281_v33, %v281_v33 }
  0x35   : > { %493 = vmatpush.bf16.msra.mxu1 %v1043_v6  ;;  %519 = vmatpush.bf16.msra.mxu3 %v1051_v7  ;;  %v1257_v42 = vld [vmem:[#allocation8 + $0xe8] sm:$0xf]  ;;  %v1334_v43 = vld [vmem:[#allocation8 + $0xf4] sm:$0xf0]  ;;  %v1329_v46 = vld [vmem:[#allocation8 + $0xcc] sm:$0xf0]  ;;  %v1015_v51 = vor.u32 %v1274_v38, %v1014_v37 }
  0x36   : > { %v1327_v47 = vld [vmem:[#allocation8 + $0xc4] sm:$0xf]  ;;  %v1235_v48 = vld [vmem:[#allocation8 + $0xd0] sm:$0xf0]  ;;  %v1328_v49 = vld [vmem:[#allocation8 + $0xcc] sm:$0xf]  ;;  %v1258_v52 = vor.u32 %v1334_v43, %v1257_v42  ;;  %v1234_v53 = vor.u32 %v1329_v46, %v1233_v41 }
  0x37   : > { %v1243_v50 = vld [vmem:[#allocation8 + $0xd8] sm:$0xf0]  ;;  %v1238_v54 = vor.u32 %v1327_v47, %v1235_v48  ;;  %v1217_v55 = vld [vmem:[#allocation8 + $0xa0] sm:$0xf]  ;;  %v1241_v56 = vld [vmem:[#allocation8 + $0xc8] sm:$0xf] }
  0x38   : > { %481 = vmatpush.bf16.msra.mxu0 %v1023_v14  ;;  %506 = vmatpush.bf16.msra.mxu2 %v1047_v15  ;;  %v1330_v57 = vld [vmem:[#allocation8 + $0xd4] sm:$0xf0]  ;;  %v1246_v58 = vor.u32 %v1328_v49, %v1243_v50  ;;  %v1325_v59 = vld [vmem:[#allocation8 + $0xac] sm:$0xf0]  ;;  %v1323_v60 = vld [vmem:[#allocation8 + $0xa4] sm:$0xf] }
  0x39   : > { %494 = vmatpush.bf16.msra.mxu1 %v1027_v19  ;;  %520 = vmatpush.bf16.msra.mxu3 %v1035_v20  ;;  %v1219_v61 = vld [vmem:[#allocation8 + $0xb0] sm:$0xf0]  ;;  %v1324_v62 = vld [vmem:[#allocation8 + $0xac] sm:$0xf]  ;;  %v1227_v63 = vld [vmem:[#allocation8 + $0xb8] sm:$0xf0]  ;;  %v1242_v0 = vor.u32 %v1330_v57, %v1241_v56  ;;  %v1218_v1 = vor.u32 %v1325_v59, %v1217_v55 }
  0x3a   : > { %v1222_v2 = vor.u32 %v1323_v60, %v1219_v61  ;;  %v1201_v3 = vld [vmem:[#allocation8 + $0x80] sm:$0xf]  ;;  %v1225_v4 = vld [vmem:[#allocation8 + $0xa8] sm:$0xf]  ;;  %v1326_v5 = vld [vmem:[#allocation8 + $0xb4] sm:$0xf0]  ;;  %v1230_v6 = vor.u32 %v1324_v62, %v1227_v63 }
  0x3b   : > { %v1321_v7 = vld [vmem:[#allocation8 + $0x8c] sm:$0xf0]  ;;  %v1319_v8 = vld [vmem:[#allocation8 + $0x84] sm:$0xf]  ;;  %v1203_v9 = vld [vmem:[#allocation8 + $0x90] sm:$0xf0]  ;;  %v1226_v12 = vor.u32 %v1326_v5, %v1225_v4 }
  0x3c   : > { %482 = vmatpush.bf16.msra.mxu0 %v1007_v30  ;;  %507 = vmatpush.bf16.msra.mxu2 %v1031_v34  ;;  %v1320_v10 = vld [vmem:[#allocation8 + $0x8c] sm:$0xf]  ;;  %v1211_v11 = vld [vmem:[#allocation8 + $0x98] sm:$0xf0]  ;;  %v1202_v13 = vor.u32 %v1321_v7, %v1201_v3  ;;  %v1206_v14 = vor.u32 %v1319_v8, %v1203_v9  ;;  %v1185_v15 = vld [vmem:[#allocation8 + $0x60] sm:$0xf] }
  0x3d   : > { %495 = vmatpush.bf16.msra.mxu1 %v1011_v35  ;;  %521 = vmatpush.bf16.msra.mxu3 %v1019_v36  ;;  %v1209_v16 = vld [vmem:[#allocation8 + $0x88] sm:$0xf]  ;;  %v1322_v17 = vld [vmem:[#allocation8 + $0x94] sm:$0xf0]  ;;  %v1214_v18 = vor.u32 %v1320_v10, %v1211_v11  ;;  %v1317_v19 = vld [vmem:[#allocation8 + $0x6c] sm:$0xf0] }
  0x3e   : > { %v1315_v20 = vld [vmem:[#allocation8 + $0x64] sm:$0xf]  ;;  %v1187_v21 = vld [vmem:[#allocation8 + $0x70] sm:$0xf0]  ;;  %v1316_v22 = vld [vmem:[#allocation8 + $0x6c] sm:$0xf]  ;;  %v1210_v24 = vor.u32 %v1322_v17, %v1209_v16  ;;  %v1186_v25 = vor.u32 %v1317_v19, %v1185_v15 }
  0x3f   : > { %483 = vmatmul.bf16.vlgmr.msra.gmra.mxu0 %v282_v45  ;;  %v1195_v23 = vld [vmem:[#allocation8 + $0x78] sm:$0xf0]  ;;  %v1190_v26 = vor.u32 %v1315_v20, %v1187_v21  ;;  %v1169_v27 = vld [vmem:[#allocation8 + $0x40] sm:$0xf]  ;;  %v1193_v28 = vld [vmem:[#allocation8 + $0x68] sm:$0xf] }
  0x40   : > { %795 = vmatpush.bf16.msrb.mxu0 %v1250_v39  ;;  %496 = vmatmul.bf16.vlgmr.msra.gmra.mxu1 %v282_v45  ;;  %v1318_v29 = vld [vmem:[#allocation8 + $0x74] sm:$0xf0]  ;;  %v1198_v30 = vor.u32 %v1316_v22, %v1195_v23  ;;  %v1313_v31 = vld [vmem:[#allocation8 + $0x4c] sm:$0xf0]  ;;  %v1311_v32 = vld [vmem:[#allocation8 + $0x44] sm:$0xf] }
  0x41   : > { %808 = vmatpush.bf16.msrb.mxu1 %v1254_v40  ;;  %834 = vmatpush.bf16.msrb.mxu3 %v1262_v44  ;;  %v1171_v33 = vld [vmem:[#allocation8 + $0x50] sm:$0xf0]  ;;  %v1312_v34 = vld [vmem:[#allocation8 + $0x4c] sm:$0xf]  ;;  %v1179_v35 = vld [vmem:[#allocation8 + $0x58] sm:$0xf0]  ;;  %v1194_v36 = vor.u32 %v1318_v29, %v1193_v28  ;;  %v1170_v37 = vor.u32 %v1313_v31, %v1169_v27 }
  0x42   : > { %508 = vmatpush.bf16.msra.mxu2 %v1015_v51  ;;  %522 = vmatmul.bf16.vlgmr.msra.gmra.mxu3 %v282_v45  ;;  %v1174_v38 = vor.u32 %v1311_v32, %v1171_v33  ;;  %v1153_v39 = vld [vmem:[#allocation8 + $0x20] sm:$0xf]  ;;  %v1177_v40 = vld [vmem:[#allocation8 + $0x48] sm:$0xf]  ;;  %v1314_v41 = vld [vmem:[#allocation8 + $0x54] sm:$0xf0]  ;;  %v1182_v42 = vor.u32 %v1312_v34, %v1179_v35 }
  0x43   : > { %v1309_v43 = vld [vmem:[#allocation8 + $0x2c] sm:$0xf0]  ;;  %v1307_v44 = vld [vmem:[#allocation8 + $0x24] sm:$0xf]  ;;  %v1308_v46 = vld [vmem:[#allocation8 + $0x2c] sm:$0xf]  ;;  %v1178_v48 = vor.u32 %v1314_v41, %v1177_v40 }
  0x44   : > { %796 = vmatpush.bf16.msrb.mxu0 %v1234_v53  ;;  %v1163_v47 = vld [vmem:[#allocation8 + $0x38] sm:$0xf0]  ;;  %v1154_v49 = vor.u32 %v1309_v43, %v1153_v39  ;;  %v1137_v51 = vld [vmem:[#allocation8] sm:$0xf]  ;;  %v1310_v53 = vld [vmem:[#allocation8 + $0x34] sm:$0xf0] }
  0x45   : > { %809 = vmatpush.bf16.msrb.mxu1 %v1238_v54  ;;  %835 = vmatpush.bf16.msrb.mxu3 %v1246_v58  ;;  %v1166_v54 = vor.u32 %v1308_v46, %v1163_v47  ;;  %v1305_v55 = vld [vmem:[#allocation8 + $0xc] sm:$0xf0]  ;;  %v1303_v56 = vld [vmem:[#allocation8 + $0x4] sm:$0xf]  ;;  %v1139_v57 = vld [vmem:[#allocation8 + $0x10] sm:$0xf0] }
  0x46   : > { %821 = vmatpush.bf16.msrb.mxu2 %v1258_v52  ;;  %v1161_v52 = vld [vmem:[#allocation8 + $0x28] sm:$0xf]  ;;  %v1304_v58 = vld [vmem:[#allocation8 + $0xc] sm:$0xf]  ;;  %v1147_v59 = vld [vmem:[#allocation8 + $0x18] sm:$0xf0]  ;;  %v1138_v61 = vor.u32 %v1305_v55, %v1137_v51  ;;  %v1142_v62 = vor.u32 %v1303_v56, %v1139_v57 }
  0x47   : > { %509 = vmatmul.bf16.vlgmr.msra.gmra.mxu2 %v282_v45  ;;  %v1155_v45 = vld [vmem:[#allocation8 + $0x30] sm:$0xf0]  ;;  %v1162_v60 = vor.u32 %v1310_v53, %v1161_v52  ;;  %v277_v5 = vld [vmem:[%s1552_s13] sm:$0xff]  ;;  %v589_v53 = vld [vmem:[#allocation3] sm:$0xff] }
  0x48   : > { %797 = vmatpush.bf16.msrb.mxu0 %v1218_v1  ;;  %v1158_v50 = vor.u32 %v1307_v44, %v1155_v45  ;;  %v601_v63 = vld [vmem:[#allocation4] sm:$0xff]  ;;  %v1145_v1 = vld [vmem:[#allocation8 + $0x8] sm:$0xf] }
  0x49   : > { %810 = vmatpush.bf16.msrb.mxu1 %v1222_v2  ;;  %836 = vmatpush.bf16.msrb.mxu3 %v1230_v6  ;;  %v1306_v2 = vld [vmem:[#allocation8 + $0x14] sm:$0xf0]  ;;  %v602_v3 = vpack.c.bf16 %v601_v63, %v601_v63  ;;  %v278_v6 = vld [vmem:[%s1552_s13 + $0x8] sm:$0xff] }
  0x4a   : > { %822 = vmatpush.bf16.msrb.mxu2 %v1242_v0  ;;  %v1150_v0 = vor.u32 %v1304_v58, %v1147_v59  ;;  %v1146_v4 = vor.u32 %v1306_v2, %v1145_v1 }
  0x4c   : > { %798 = vmatpush.bf16.msrb.mxu0 %v1202_v13  ;;  %v280_v13 = vld [vmem:[%s1552_s13 + $0x18] sm:$0xff] }
  0x4d   : > { %811 = vmatpush.bf16.msrb.mxu1 %v1206_v14  ;;  %837 = vmatpush.bf16.msrb.mxu3 %v1214_v18 }
  0x4e   : > { %823 = vmatpush.bf16.msrb.mxu2 %v1226_v12 }
  0x50   : > { %799 = vmatpush.bf16.msrb.mxu0 %v1186_v25 }
  0x51   : > { %812 = vmatpush.bf16.msrb.mxu1 %v1190_v26  ;;  %838 = vmatpush.bf16.msrb.mxu3 %v1198_v30 }
  0x52   : > { %824 = vmatpush.bf16.msrb.mxu2 %v1210_v24  ;;  %v279_v24 = vld [vmem:[%s1552_s13 + $0x10] sm:$0xff] }
  0x54   : > { %800 = vmatpush.bf16.msrb.mxu0 %v1170_v37 }
  0x55   : > { %813 = vmatpush.bf16.msrb.mxu1 %v1174_v38  ;;  %839 = vmatpush.bf16.msrb.mxu3 %v1182_v42 }
  0x56   : > { %825 = vmatpush.bf16.msrb.mxu2 %v1194_v36 }
  0x58   : > { %801 = vmatpush.bf16.msrb.mxu0 %v1154_v49 }
  0x59   : > { %814 = vmatpush.bf16.msrb.mxu1 %v1158_v50  ;;  %840 = vmatpush.bf16.msrb.mxu3 %v1166_v54  ;;  %v597_v50 = vld [vmem:[%s1557_s17] sm:$0xff]  ;;  %v598_v54 = vld [vmem:[%s1557_s17 + $0x8] sm:$0xff] }
  0x5a   : > { %826 = vmatpush.bf16.msrb.mxu2 %v1178_v48 }
  0x5c   : > { %802 = vmatpush.bf16.msrb.mxu0 %v1138_v61 }
  0x5d   : > { %815 = vmatpush.bf16.msrb.mxu1 %v1142_v62  ;;  %841 = vmatpush.bf16.msrb.mxu3 %v1150_v0 }
  0x5e   : > { %827 = vmatpush.bf16.msrb.mxu2 %v1162_v60 }
  0x5f   : > { %803 = vmatmul.bf16.vlgmr.msrb.gmra.mxu0 %v602_v3 }
  0x60   : > { %816 = vmatmul.bf16.vlgmr.msrb.gmra.mxu1 %v602_v3  ;;  %842 = vmatmul.bf16.vlgmr.msrb.gmra.mxu3 %v602_v3 }
  0x62   : > { %828 = vmatpush.bf16.msrb.mxu2 %v1146_v4 }
  0x65   : > { %829 = vmatmul.bf16.vlgmr.msrb.gmra.mxu2 %v602_v3 }
  0xbc   : > { %v484_v7 = vpop.f32.mrf.mxu0 }
  0xbd   : > { %v527_v8 = vadd.f32 %v484_v7, %v277_v5  ;;  %v497_v9 = vpop.f32.mrf.mxu1 }
  0xbe   : > { %v528_v10 = vadd.f32 %v497_v9, %v278_v6  ;;  %v600_v9 = vld [vmem:[%s1557_s17 + $0x18] sm:$0xff] }
  0xbf   : > { %v1132_v11 = vmul.f32 -1.442695, %v527_v8 }
  0xc0   : > { %v1133_v12 = vmul.f32 -1.442695, %v528_v10 }
  0xc1   : > { %1367 = vpow2.f32 %v1132_v11 }
  0xc2   : > { %1369 = vpow2.f32 %v1133_v12 }
  0xc4   : > { %v486_v15 = vpop.f32.mrf.mxu0 }
  0xc5   : > { %v523_v14 = vpop.f32.mrf.mxu3  ;;  %v499_v17 = vpop.f32.mrf.mxu1 }
  0xc6   : > { %v530_v16 = vadd.f32 %v523_v14, %v280_v13 }
  0xc7   : > { %v1368_v19 = vpop.eup %1367 }
  0xc8   : > { %v1134_v20 = vmul.f32 -1.442695, %v530_v16  ;;  %v1370_v21 = vpop.eup %1369  ;;  %v534_v22 = vadd.f32 1.0, %v1368_v19 }
  0xc9   : > { %v553_v23 = vadd.f32 1.0, %v1370_v21 }
  0xca   : > { %v510_v18 = vpop.f32.mrf.mxu2  ;;  %1371 = vpow2.f32 %v1134_v20  ;;  %vm540_vm0 = vweird.f32 %v534_v22  ;;  %v546_v34 = vand.u32 2147483648, %v534_v22  ;;  %v544_v37 = vand.u32 2147483647, %v534_v22 }
  0xcb   : > { %1373 = vrcp.f32 %v534_v22  ;;  %v529_v26 = vadd.f32 %v510_v18, %v279_v24  ;;  %v565_v36 = vand.u32 2147483648, %v553_v23  ;;  %vm559_vm2 = vweird.f32 %v553_v23 }
  0xcc   : > { %1375 = vrcp.f32 %v553_v23  ;;  %v563_v39 = vand.u32 2147483647, %v553_v23  ;;  %v547_v43 = vor.u32 1.1754944e-38, %v546_v34  ;;  %vm545_vm6 = vcmp.eq.f32.partialorder %v544_v37, 8.507059e+37 }
  0xcd   : > { %v525_v25 = vpop.f32.mrf.mxu3  ;;  %1377 = vtanh.f32 %v529_v26  ;;  %v566_v46 = vor.u32 1.1754944e-38, %v565_v36 }
  0xce   : > { %vm564_vm7 = vcmp.eq.f32.partialorder %v563_v39, 8.507059e+37  ;;  %v599_v25 = vld [vmem:[%s1557_s17 + $0x10] sm:$0xff] }
  0xd0   : > { %v1372_v28 = vpop.eup %1371 }
  0xd1   : > { %v1374_v29 = vpop.eup %1373  ;;  %v573_v30 = vadd.f32 1.0, %v1372_v28 }
  0xd2   : > { %v512_v27 = vpop.f32.mrf.mxu2  ;;  %v1376_v31 = vpop.eup %1375  ;;  %v536_v32 = vmul.f32 %v1374_v29, %v534_v22  ;;  %vm541_vm1 = vweird.f32 %v1374_v29 }
  0xd3   : > { %v555_v33 = vmul.f32 %v1376_v31, %v553_v23  ;;  %1379 = vrcp.f32 %v573_v30  ;;  %vm560_vm3 = vweird.f32 %v1376_v31  ;;  %vm1565_vm4 = vmor %vm540_vm0, %vm541_vm1  ;;  %v1378_v44 = vpop.eup %1377  ;;  %vm579_vm8 = vweird.f32 %v573_v30 }
  0xd4   : > { %v537_v35 = vsub.f32 1.0, %v536_v32  ;;  %vm1569_vm5 = vmor %vm559_vm2, %vm560_vm3  ;;  %v585_v63 = vand.u32 2147483648, %v573_v30  ;;  %v583_v3 = vand.u32 2147483647, %v573_v30 }
  0xd5   : > { %v556_v38 = vsub.f32 1.0, %v555_v33 }
  0xd6   : > { %v538_v40 = vmul.f32 %v1374_v29, %v537_v35  ;;  %v586_v10 = vor.u32 1.1754944e-38, %v585_v63  ;;  %vm584_vm11 = vcmp.eq.f32.partialorder %v583_v3, 8.507059e+37 }
  0xd7   : > { %v557_v41 = vmul.f32 %v1376_v31, %v556_v38 }
  0xd8   : > { %v539_v47 = vadd.f32 %v1374_v29, %v538_v40 }
  0xd9   : > { %v1380_v48 = vpop.eup %1379  ;;  %v558_v49 = vadd.f32 %v1376_v31, %v557_v41 }
  0xda   : > { %v575_v51 = vmul.f32 %v1380_v48, %v573_v30  ;;  %v543_v52 = vsel %vm1565_vm4, %v1374_v29, %v539_v47  ;;  %vm580_vm9 = vweird.f32 %v1380_v48 }
  0xdb   : > { %v548_v55 = vsel %vm545_vm6, %v547_v43, %v543_v52  ;;  %v562_v56 = vsel %vm1569_vm5, %v1376_v31, %v558_v49  ;;  %vm1581_vm10 = vmor %vm579_vm8, %vm580_vm9 }
  0xdc   : > { %v804_v57 = vpop.f32.mrf.mxu0  ;;  %v576_v59 = vsub.f32 1.0, %v575_v51  ;;  %v567_v60 = vsel %vm564_vm7, %v566_v46, %v562_v56  ;;  %v591_v61 = vmul.f32 %v1378_v44, %v548_v55 }
  0xdd   : > { %v817_v58 = vpop.f32.mrf.mxu1  ;;  %v847_v62 = vadd.f32 %v804_v57, %v597_v50  ;;  %v590_v0 = vmul.f32 %v589_v53, %v567_v60  ;;  %v909_v53 = vld [vmem:[#allocation5] sm:$0xff] }
  0xde   : > { %v848_v1 = vadd.f32 %v817_v58, %v598_v54  ;;  %v577_v2 = vmul.f32 %v1380_v48, %v576_v59 }
  0xdf   : > { %v1263_v4 = vmul.f32 -1.442695, %v847_v62  ;;  %v592_v6 = vadd.f32 %v591_v61, %v590_v0 }
  0xe0   : > { %v1264_v7 = vmul.f32 -1.442695, %v848_v1  ;;  %v578_v8 = vadd.f32 %v1380_v48, %v577_v2 }
  0xe1   : > { %1381 = vpow2.f32 %v1263_v4  ;;  %595 = vst [vmem:[#allocation3] sm:$0xff] %v592_v6 }
  0xe2   : > { %1383 = vtanh.f32 %v592_v6  ;;  %v582_v11 = vsel %vm1581_vm10, %v1380_v48, %v578_v8 }
  0xe3   : > { %1385 = vpow2.f32 %v1264_v7  ;;  %v843_v12 = vpop.f32.mrf.mxu3  ;;  %v587_v16 = vsel %vm584_vm11, %v586_v10, %v582_v11 }
  0xe4   : > { %v850_v13 = vadd.f32 %v843_v12, %v600_v9  ;;  %v806_v14 = vpop.f32.mrf.mxu0 }
  0xe5   : > { %v819_v15 = vpop.f32.mrf.mxu1 }
  0xe6   : > { %v1265_v17 = vmul.f32 -1.442695, %v850_v13 }
  0xe7   : > { %v1382_v19 = vpop.eup %1381 }
  0xe8   : > { %v830_v18 = vpop.f32.mrf.mxu2  ;;  %v1384_v20 = vpop.eup %1383  ;;  %v854_v21 = vadd.f32 1.0, %v1382_v19  ;;  %1387 = vpow2.f32 %v1265_v17 }
  0xe9   : > { %v1386_v22 = vpop.eup %1385  ;;  %v1588_v23 = vmul.f32 %v1384_v20, %v587_v16  ;;  %v849_v28 = vadd.f32 %v830_v18, %v599_v25 }
  0xea   : > { %1389 = vrcp.f32 %v854_v21  ;;  %v873_v24 = vadd.f32 1.0, %v1386_v22  ;;  %v866_v36 = vand.u32 2147483648, %v854_v21  ;;  %v864_v39 = vand.u32 2147483647, %v854_v21 }
  0xeb   : > { %596 = vst [vmem:[#allocation2] sm:$0xff] %v1588_v23  ;;  %v845_v26 = vpop.f32.mrf.mxu3  ;;  %vm860_vm13 = vweird.f32 %v854_v21 }
  0xec   : > { %1391 = vrcp.f32 %v873_v24  ;;  %v885_v40 = vand.u32 2147483648, %v873_v24  ;;  %v883_v44 = vand.u32 2147483647, %v873_v24  ;;  %v867_v47 = vor.u32 1.1754944e-38, %v866_v36 }
  0xed   : > { %vm879_vm0 = vweird.f32 %v873_v24  ;;  %vm865_vm1 = vcmp.eq.f32.partialorder %v864_v39, 8.507059e+37 }
  0xee   : > { %v1388_v27 = vpop.eup %1387  ;;  %v886_v50 = vor.u32 1.1754944e-38, %v885_v40  ;;  %vm884_vm3 = vcmp.eq.f32.partialorder %v883_v44, 8.507059e+37 }
  0xef   : > { %v893_v30 = vadd.f32 1.0, %v1388_v27 }
  0xf0   : > { %v832_v29 = vpop.f32.mrf.mxu2  ;;  %v1390_v31 = vpop.eup %1389 }
  0xf1   : > { %v856_v32 = vmul.f32 %v1390_v31, %v854_v21  ;;  %1393 = vrcp.f32 %v893_v30  ;;  %vm861_vm12 = vweird.f32 %v1390_v31  ;;  %v905_v61 = vand.u32 2147483648, %v893_v30 }
  0xf2   : > { %v1392_v33 = vpop.eup %1391  ;;  %1395 = vtanh.f32 %v849_v28  ;;  %vm862_vm15 = vmor %vm860_vm13, %vm861_vm12  ;;  %vm899_vm5 = vweird.f32 %v893_v30  ;;  %v903_v62 = vand.u32 2147483647, %v893_v30 }
  0xf3   : > { %v857_v34 = vsub.f32 1.0, %v856_v32  ;;  %v875_v35 = vmul.f32 %v1392_v33, %v873_v24  ;;  %vm880_vm14 = vweird.f32 %v1392_v33  ;;  %v906_v0 = vor.u32 1.1754944e-38, %v905_v61 }
  0xf4   : > { %vm881_vm2 = vmor %vm879_vm0, %vm880_vm14  ;;  %vm904_vm7 = vcmp.eq.f32.partialorder %v903_v62, 8.507059e+37 }
  0xf5   : > { %v876_v37 = vsub.f32 1.0, %v875_v35  ;;  %v858_v38 = vmul.f32 %v1390_v31, %v857_v34 }
  0xf7   : > { %v1394_v41 = vpop.eup %1393  ;;  %v877_v42 = vmul.f32 %v1392_v33, %v876_v37  ;;  %v859_v43 = vadd.f32 %v1390_v31, %v858_v38 }
  0xf8   : > { %v1396_v45 = vpop.eup %1395  ;;  %v895_v46 = vmul.f32 %v1394_v41, %v893_v30  ;;  %vm900_vm4 = vweird.f32 %v1394_v41 }
  0xf9   : > { %v863_v48 = vsel %vm862_vm15, %v1390_v31, %v859_v43  ;;  %v878_v49 = vadd.f32 %v1392_v33, %v877_v42  ;;  %vm901_vm6 = vmor %vm899_vm5, %vm900_vm4 }
  0xfa   : > { %v896_v51 = vsub.f32 1.0, %v895_v46  ;;  %v868_v52 = vsel %vm865_vm1, %v867_v47, %v863_v48 }
  0xfb   : > { %v882_v54 = vsel %vm881_vm2, %v1392_v33, %v878_v49  ;;  %v911_v55 = vmul.f32 %v1396_v45, %v868_v52 }
  0xfc   : > { %v897_v56 = vmul.f32 %v1394_v41, %v896_v51  ;;  %v887_v57 = vsel %vm884_vm3, %v886_v50, %v882_v54 }
  0xfd   : > { %v910_v58 = vmul.f32 %v909_v53, %v887_v57 }
  0xfe   : > { %v898_v60 = vadd.f32 %v1394_v41, %v897_v56 }
  0xff   : > { %v912_v59 = vadd.f32 %v911_v55, %v910_v58 }
 0x100   : > { %v902_v63 = vsel %vm901_vm6, %v1394_v41, %v898_v60 }
 0x101   : > { %1397 = vtanh.f32 %v912_v59  ;;  %915 = vst [vmem:[#allocation5] sm:$0xff] %v912_v59  ;;  %v907_v2 = vsel %vm904_vm7, %v906_v0, %v902_v63 }
 0x106   : > { %920 = sbr.rel (%p1266_p9) target bundleno = 269 (0x10d), region = 52 }
 0x107   : > { %v1398_v1 = vpop.eup %1397 }
 0x108   : > { %v914_v3 = vmul.f32 %v1398_v1, %v907_v2 }
 0x10a   : > { %916 = vst [vmem:[#allocation4] sm:$0xff] %v914_v3 }
 0x10b   : > { %921 = vst [vmem:[%s1607_s4] sm:$0xff] %v1588_v23 }
 0x10c   : > { %922 = vst [vmem:[%s1608_s5] sm:$0xff] %v914_v3 }
 0x10d PF: > { %s18_s18 = sadd.s32 1, %s1473_s18  }
 0x10e   : > { %p15_p10 = scmp.ge.s32.totalorder %s18_s18, 10  }
 0x110   :  { %17 = sbr.rel (!%p15_p10) target bundleno = 2 (0x2), region = 90 }
 0x115   :  { %940 = vsyncpa [#allocation7], 1 }
 0x116   :  { %942 = vsyncpa [#allocation7 + $0x1], 1 }
 0x117   :  { %943 = vsyncpa [#allocation9], 1 }

// kernel: model_forward.9
= control target key start
LH: loop header
LB: loop body
LE: loop exit
PB: predicated region body
PF: predicated region fallthrough
CT: control target
= control target key end

     0   :  { %11 = vsyncpa [#allocation7], 0  ;;  %s1518_s18 = smov 0   ;;  %s1783_s0 = inlined_call_operand.vmem [shape: f32[8,8,512], index: 0, kind: input, shape index: {}]   ;;  %s1784_s1 = inlined_call_operand.vmem [shape: f32[8,8,512], index: 1, kind: input, shape index: {}]   ;;  %s1785_s2 = inlined_call_operand.vmem [shape: bf16[128,512], index: 2, kind: input, shape index: {}]   ;;  %s1786_s3 = inlined_call_operand.hbm [shape: bf16[128,512], index: 3, kind: input, shape index: {}]   ;;  %s1787_s4 = inlined_call_operand.vmem [shape: f32[8,8,128], index: 4, kind: output, shape index: {0}]   ;;  %s1788_s5 = inlined_call_operand.vmem [shape: f32[8,8,128], index: 5, kind: output, shape index: {1}]  }
   0x1 LB: > { %s186_s21 = sshll.u32 %s1786_s3, 4  ;;  %s1527_s22 = sadd.s32 4294967295, %s1482_s18   ;;  %s1482_s18 = sphi %s1518_s18, %s17_s18   ;;  %s187_s21 = int_to_ptr.hbm [resolvable:$true] %s186_s21 }
   0x2   : > { %p1046_p0 = scmp.ge.s32.totalorder %s1482_s18, 1  ;;  %p172_p1 = scmp.lt.s32.totalorder %s1482_s18, 9 }
   0x3   : > { %p1047_p2 = scmp.ne.s32.totalorder %s1527_s22, 0  ;;  %p1396_p3 = scmp.eq.s32.totalorder %s1527_s22, 0 }
   0x4   : > { %p173_p4 = pnand %p1046_p0, %p172_p1  ;;  %s1484_s23 = smov [#allocation6]  }
   0x5   : > { %s188_s24 = sshll.u32 %s1484_s23, 4  ;;  %s1485_s25 = smov 256   ;;  %s189_s24 = int_to_ptr.vmem [resolvable:$true] %s188_s24 }
   0x6   : > { %p1392_p5 = pneg %p173_p4  ;;  %s1486_s26 = smov 16  }
   0x7   : > { %222 = sbr.rel (%p173_p4) target bundleno = 269 (0x10d), region = 36 }
   0x8   : > { %p1393_p6 = pnand %p1396_p3, %p1392_p5 }
   0xa   : > { %1395 = dma.hbm_to_vmem [thread:$0]  (!%p1393_p6), %s187_s21, 4096, %s189_s24, [#allocation7], %s1485_s25, %s1485_s25, %s1486_s26  }
   0xc   : > { %1477 = dma.done.wait (%p1396_p3), [#allocation7], 4096  }
   0xd   : > { %1479 = vsyncadd (%p1396_p3), [#allocation7], 4294963200  ;;  %p261_p7 = scmp.lt.s32.totalorder %s1527_s22, 7  ;;  %s266_s27 = ssub.s32 7, %s1527_s22 }
   0xe   : > { %p267_p8 = scmp.lt.s32.totalorder %s266_s27, 7 }
   0xf   : > { %s262_s28 = scalar_select %p261_p7, %s1527_s22, 7 }
  0x10   : > { %s1796_s27 = smov (!%p267_p8, %s266_s27), 7 }
  0x11   : > { %s1322_s29 = sshll.u32 %s262_s28, 5  ;;  %s1055_s30 = sshll.u32 %s262_s28, 3 }
  0x12   : > { %s1539_s8 = scalar_lea.vmem %s1783_s0, %s1322_s29  ;;  %s1323_s9 = sshll.u32 %s1796_s27, 5 }
  0x13   : > { %s1544_s12 = scalar_lea.vmem %s1784_s1, %s1323_s9  ;;  %s1549_s15 = scalar_lea.vmem %s1787_s4, %s1055_s30 }
  0x14   : > { %s1056_s16 = sshll.u32 %s1796_s27, 3  ;;  %286 = sbr.rel (%p1047_p2) target bundleno = 30 (0x1e), region = 44 }
  0x15   : > { %s1554_s20 = scalar_lea.vmem %s1788_s5, %s1056_s16 }
  0x19   : > { %v1487_v0 = vmov 0.0  }
  0x1a   : > { %287 = vst [vmem:[#allocation2] sm:$0xff] %v1487_v0 }
  0x1b   : > { %288 = vst [vmem:[#allocation3] sm:$0xff] %v1487_v0 }
  0x1c   : > { %289 = vst [vmem:[#allocation4] sm:$0xff] %v1487_v0 }
  0x1d   : > { %290 = vst [vmem:[#allocation5] sm:$0xff] %v1487_v0 }
  0x1e PF: > { %v1172_v1 = vld [vmem:[%s1785_s2 + $0xe0] sm:$0xf]  ;;  %v1354_v2 = vld [vmem:[%s1785_s2 + $0xec] sm:$0xf0]  ;;  %v1352_v3 = vld [vmem:[%s1785_s2 + $0xe4] sm:$0xf] }
  0x1f   : > { %v1173_v4 = vor.u32 %v1354_v2, %v1172_v1  ;;  %v1174_v5 = vld [vmem:[%s1785_s2 + $0xf0] sm:$0xf0]  ;;  %v1353_v6 = vld [vmem:[%s1785_s2 + $0xec] sm:$0xf]  ;;  %v1182_v7 = vld [vmem:[%s1785_s2 + $0xf8] sm:$0xf0] }
  0x20   : > { %v1177_v8 = vor.u32 %v1352_v3, %v1174_v5  ;;  %v1185_v9 = vor.u32 %v1353_v6, %v1182_v7  ;;  %v1156_v10 = vld [vmem:[%s1785_s2 + $0xc0] sm:$0xf]  ;;  %v1350_v11 = vld [vmem:[%s1785_s2 + $0xcc] sm:$0xf0]  ;;  %v1348_v12 = vld [vmem:[%s1785_s2 + $0xc4] sm:$0xf] }
  0x21   : > { %489 = vmatpush.bf16.msra.mxu0 %v1173_v4  ;;  %v1157_v13 = vor.u32 %v1350_v11, %v1156_v10  ;;  %v1158_v14 = vld [vmem:[%s1785_s2 + $0xd0] sm:$0xf0]  ;;  %v1349_v15 = vld [vmem:[%s1785_s2 + $0xcc] sm:$0xf]  ;;  %v1166_v16 = vld [vmem:[%s1785_s2 + $0xd8] sm:$0xf0] }
  0x22   : > { %502 = vmatpush.bf16.msra.mxu1 %v1177_v8  ;;  %528 = vmatpush.bf16.msra.mxu3 %v1185_v9  ;;  %v1161_v17 = vor.u32 %v1348_v12, %v1158_v14  ;;  %v1169_v18 = vor.u32 %v1349_v15, %v1166_v16  ;;  %v1180_v19 = vld [vmem:[%s1785_s2 + $0xe8] sm:$0xf]  ;;  %v1355_v20 = vld [vmem:[%s1785_s2 + $0xf4] sm:$0xf0]  ;;  %v1140_v21 = vld [vmem:[%s1785_s2 + $0xa0] sm:$0xf] }
  0x23   : > { %v1181_v22 = vor.u32 %v1355_v20, %v1180_v19  ;;  %v1346_v23 = vld [vmem:[%s1785_s2 + $0xac] sm:$0xf0]  ;;  %v1344_v24 = vld [vmem:[%s1785_s2 + $0xa4] sm:$0xf]  ;;  %v1142_v25 = vld [vmem:[%s1785_s2 + $0xb0] sm:$0xf0] }
  0x24   : > { %v1345_v26 = vld [vmem:[%s1785_s2 + $0xac] sm:$0xf]  ;;  %v1150_v27 = vld [vmem:[%s1785_s2 + $0xb8] sm:$0xf0]  ;;  %v1164_v28 = vld [vmem:[%s1785_s2 + $0xc8] sm:$0xf]  ;;  %v1141_v29 = vor.u32 %v1346_v23, %v1140_v21  ;;  %v1145_v33 = vor.u32 %v1344_v24, %v1142_v25 }
  0x25   : > { %490 = vmatpush.bf16.msra.mxu0 %v1157_v13  ;;  %515 = vmatpush.bf16.msra.mxu2 %v1181_v22  ;;  %v1351_v30 = vld [vmem:[%s1785_s2 + $0xd4] sm:$0xf0]  ;;  %v1124_v31 = vld [vmem:[%s1785_s2 + $0x80] sm:$0xf]  ;;  %v1342_v32 = vld [vmem:[%s1785_s2 + $0x8c] sm:$0xf0]  ;;  %v1153_v34 = vor.u32 %v1345_v26, %v1150_v27 }
  0x26   : > { %503 = vmatpush.bf16.msra.mxu1 %v1161_v17  ;;  %529 = vmatpush.bf16.msra.mxu3 %v1169_v18  ;;  %v1165_v35 = vor.u32 %v1351_v30, %v1164_v28  ;;  %v1340_v36 = vld [vmem:[%s1785_s2 + $0x84] sm:$0xf]  ;;  %v1126_v37 = vld [vmem:[%s1785_s2 + $0x90] sm:$0xf0]  ;;  %v1341_v38 = vld [vmem:[%s1785_s2 + $0x8c] sm:$0xf]  ;;  %v1125_v42 = vor.u32 %v1342_v32, %v1124_v31 }
  0x27   : > { %v1134_v39 = vld [vmem:[%s1785_s2 + $0x98] sm:$0xf0]  ;;  %v1148_v40 = vld [vmem:[%s1785_s2 + $0xa8] sm:$0xf]  ;;  %v1347_v41 = vld [vmem:[%s1785_s2 + $0xb4] sm:$0xf0]  ;;  %v1129_v46 = vor.u32 %v1340_v36, %v1126_v37 }
  0x28   : > { %v1149_v43 = vor.u32 %v1347_v41, %v1148_v40  ;;  %v1108_v44 = vld [vmem:[%s1785_s2 + $0x60] sm:$0xf]  ;;  %v1338_v45 = vld [vmem:[%s1785_s2 + $0x6c] sm:$0xf0]  ;;  %v1137_v47 = vor.u32 %v1341_v38, %v1134_v39  ;;  %v1336_v48 = vld [vmem:[%s1785_s2 + $0x64] sm:$0xf] }
  0x29   : > { %491 = vmatpush.bf16.msra.mxu0 %v1141_v29  ;;  %516 = vmatpush.bf16.msra.mxu2 %v1165_v35  ;;  %v1132_v49 = vld [vmem:[%s1785_s2 + $0x88] sm:$0xf]  ;;  %v1343_v50 = vld [vmem:[%s1785_s2 + $0x94] sm:$0xf0]  ;;  %v1110_v51 = vld [vmem:[%s1785_s2 + $0x70] sm:$0xf0]  ;;  %v1109_v54 = vor.u32 %v1338_v45, %v1108_v44 }
  0x2a   : > { %504 = vmatpush.bf16.msra.mxu1 %v1145_v33  ;;  %530 = vmatpush.bf16.msra.mxu3 %v1153_v34  ;;  %v1337_v52 = vld [vmem:[%s1785_s2 + $0x6c] sm:$0xf]  ;;  %v1118_v53 = vld [vmem:[%s1785_s2 + $0x78] sm:$0xf0]  ;;  %v1133_v55 = vor.u32 %v1343_v50, %v1132_v49  ;;  %v1092_v56 = vld [vmem:[%s1785_s2 + $0x40] sm:$0xf]  ;;  %v1113_v58 = vor.u32 %v1336_v48, %v1110_v51 }
  0x2b   : > { %v1334_v57 = vld [vmem:[%s1785_s2 + $0x4c] sm:$0xf0]  ;;  %v1121_v59 = vor.u32 %v1337_v52, %v1118_v53  ;;  %v1332_v60 = vld [vmem:[%s1785_s2 + $0x44] sm:$0xf]  ;;  %v1116_v61 = vld [vmem:[%s1785_s2 + $0x68] sm:$0xf] }
  0x2c   : > { %v1339_v62 = vld [vmem:[%s1785_s2 + $0x74] sm:$0xf0]  ;;  %v1094_v63 = vld [vmem:[%s1785_s2 + $0x50] sm:$0xf0]  ;;  %v1333_v0 = vld [vmem:[%s1785_s2 + $0x4c] sm:$0xf]  ;;  %v1093_v2 = vor.u32 %v1334_v57, %v1092_v56 }
  0x2d   : > { %492 = vmatpush.bf16.msra.mxu0 %v1125_v42  ;;  %517 = vmatpush.bf16.msra.mxu2 %v1149_v43  ;;  %v1102_v1 = vld [vmem:[%s1785_s2 + $0x58] sm:$0xf0]  ;;  %v1117_v3 = vor.u32 %v1339_v62, %v1116_v61  ;;  %v1076_v4 = vld [vmem:[%s1785_s2 + $0x20] sm:$0xf]  ;;  %v1330_v5 = vld [vmem:[%s1785_s2 + $0x2c] sm:$0xf0]  ;;  %v1097_v6 = vor.u32 %v1332_v60, %v1094_v63 }
  0x2e   : > { %505 = vmatpush.bf16.msra.mxu1 %v1129_v46  ;;  %531 = vmatpush.bf16.msra.mxu3 %v1137_v47  ;;  %v1105_v7 = vor.u32 %v1333_v0, %v1102_v1  ;;  %v1328_v8 = vld [vmem:[%s1785_s2 + $0x24] sm:$0xf]  ;;  %v1100_v9 = vld [vmem:[%s1785_s2 + $0x48] sm:$0xf]  ;;  %v1335_v10 = vld [vmem:[%s1785_s2 + $0x54] sm:$0xf0]  ;;  %v1077_v14 = vor.u32 %v1330_v5, %v1076_v4 }
  0x2f   : > { %v1078_v11 = vld [vmem:[%s1785_s2 + $0x30] sm:$0xf0]  ;;  %v1329_v12 = vld [vmem:[%s1785_s2 + $0x2c] sm:$0xf]  ;;  %v1086_v13 = vld [vmem:[%s1785_s2 + $0x38] sm:$0xf0]  ;;  %v1101_v15 = vor.u32 %v1335_v10, %v1100_v9 }
  0x30   : > { %v1060_v16 = vld [vmem:[%s1785_s2] sm:$0xf]  ;;  %v1326_v17 = vld [vmem:[%s1785_s2 + $0xc] sm:$0xf0]  ;;  %v1324_v18 = vld [vmem:[%s1785_s2 + $0x4] sm:$0xf]  ;;  %v1081_v19 = vor.u32 %v1328_v8, %v1078_v11  ;;  %v1089_v20 = vor.u32 %v1329_v12, %v1086_v13 }
  0x31   : > { %493 = vmatpush.bf16.msra.mxu0 %v1109_v54  ;;  %518 = vmatpush.bf16.msra.mxu2 %v1133_v55  ;;  %v1062_v21 = vld [vmem:[%s1785_s2 + $0x10] sm:$0xf0]  ;;  %v1084_v22 = vld [vmem:[%s1785_s2 + $0x28] sm:$0xf]  ;;  %v1331_v23 = vld [vmem:[%s1785_s2 + $0x34] sm:$0xf0]  ;;  %v1061_v30 = vor.u32 %v1326_v17, %v1060_v16 }
  0x32   : > { %506 = vmatpush.bf16.msra.mxu1 %v1113_v58  ;;  %532 = vmatpush.bf16.msra.mxu3 %v1121_v59  ;;  %v1325_v24 = vld [vmem:[%s1785_s2 + $0xc] sm:$0xf]  ;;  %v1070_v25 = vld [vmem:[%s1785_s2 + $0x18] sm:$0xf0]  ;;  %v1303_v26 = vld [vmem:[#allocation6 + $0xe0] sm:$0xf]  ;;  %v1085_v34 = vor.u32 %v1331_v23, %v1084_v22  ;;  %v1065_v35 = vor.u32 %v1324_v18, %v1062_v21 }
  0x33   : > { %v1386_v27 = vld [vmem:[#allocation6 + $0xec] sm:$0xf0]  ;;  %v1384_v28 = vld [vmem:[#allocation6 + $0xe4] sm:$0xf]  ;;  %v1305_v29 = vld [vmem:[#allocation6 + $0xf0] sm:$0xf0]  ;;  %v1073_v36 = vor.u32 %v1325_v24, %v1070_v25 }
  0x34   : > { %v1385_v31 = vld [vmem:[#allocation6 + $0xec] sm:$0xf]  ;;  %v1313_v32 = vld [vmem:[#allocation6 + $0xf8] sm:$0xf0]  ;;  %v295_v33 = vld [vmem:[#allocation2] sm:$0xff]  ;;  %v1304_v39 = vor.u32 %v1386_v27, %v1303_v26  ;;  %v1308_v40 = vor.u32 %v1384_v28, %v1305_v29 }
  0x35   : > { %494 = vmatpush.bf16.msra.mxu0 %v1093_v2  ;;  %519 = vmatpush.bf16.msra.mxu2 %v1117_v3  ;;  %v1068_v37 = vld [vmem:[%s1785_s2 + $0x8] sm:$0xf]  ;;  %v1327_v38 = vld [vmem:[%s1785_s2 + $0x14] sm:$0xf0]  ;;  %v1287_v41 = vld [vmem:[#allocation6 + $0xc0] sm:$0xf]  ;;  %v1316_v44 = vor.u32 %v1385_v31, %v1313_v32  ;;  %v296_v45 = vpack.c.bf16 %v295_v33, %v295_v33 }
  0x36   : > { %507 = vmatpush.bf16.msra.mxu1 %v1097_v6  ;;  %533 = vmatpush.bf16.msra.mxu3 %v1105_v7  ;;  %v1311_v42 = vld [vmem:[#allocation6 + $0xe8] sm:$0xf]  ;;  %v1387_v43 = vld [vmem:[#allocation6 + $0xf4] sm:$0xf0]  ;;  %v1382_v46 = vld [vmem:[#allocation6 + $0xcc] sm:$0xf0]  ;;  %v1069_v51 = vor.u32 %v1327_v38, %v1068_v37 }
  0x37   : > { %v1380_v47 = vld [vmem:[#allocation6 + $0xc4] sm:$0xf]  ;;  %v1289_v48 = vld [vmem:[#allocation6 + $0xd0] sm:$0xf0]  ;;  %v1381_v49 = vld [vmem:[#allocation6 + $0xcc] sm:$0xf]  ;;  %v1312_v52 = vor.u32 %v1387_v43, %v1311_v42  ;;  %v1288_v53 = vor.u32 %v1382_v46, %v1287_v41 }
  0x38   : > { %v1297_v50 = vld [vmem:[#allocation6 + $0xd8] sm:$0xf0]  ;;  %v1292_v54 = vor.u32 %v1380_v47, %v1289_v48  ;;  %v1271_v55 = vld [vmem:[#allocation6 + $0xa0] sm:$0xf]  ;;  %v1295_v56 = vld [vmem:[#allocation6 + $0xc8] sm:$0xf] }
  0x39   : > { %495 = vmatpush.bf16.msra.mxu0 %v1077_v14  ;;  %520 = vmatpush.bf16.msra.mxu2 %v1101_v15  ;;  %v1383_v57 = vld [vmem:[#allocation6 + $0xd4] sm:$0xf0]  ;;  %v1300_v58 = vor.u32 %v1381_v49, %v1297_v50  ;;  %v1378_v59 = vld [vmem:[#allocation6 + $0xac] sm:$0xf0]  ;;  %v1376_v60 = vld [vmem:[#allocation6 + $0xa4] sm:$0xf] }
  0x3a   : > { %508 = vmatpush.bf16.msra.mxu1 %v1081_v19  ;;  %534 = vmatpush.bf16.msra.mxu3 %v1089_v20  ;;  %v1273_v61 = vld [vmem:[#allocation6 + $0xb0] sm:$0xf0]  ;;  %v1377_v62 = vld [vmem:[#allocation6 + $0xac] sm:$0xf]  ;;  %v1281_v63 = vld [vmem:[#allocation6 + $0xb8] sm:$0xf0]  ;;  %v1296_v0 = vor.u32 %v1383_v57, %v1295_v56  ;;  %v1272_v1 = vor.u32 %v1378_v59, %v1271_v55 }
  0x3b   : > { %v1276_v2 = vor.u32 %v1376_v60, %v1273_v61  ;;  %v1255_v3 = vld [vmem:[#allocation6 + $0x80] sm:$0xf]  ;;  %v1279_v4 = vld [vmem:[#allocation6 + $0xa8] sm:$0xf]  ;;  %v1379_v5 = vld [vmem:[#allocation6 + $0xb4] sm:$0xf0]  ;;  %v1284_v6 = vor.u32 %v1377_v62, %v1281_v63 }
  0x3c   : > { %v1374_v7 = vld [vmem:[#allocation6 + $0x8c] sm:$0xf0]  ;;  %v1372_v8 = vld [vmem:[#allocation6 + $0x84] sm:$0xf]  ;;  %v1257_v9 = vld [vmem:[#allocation6 + $0x90] sm:$0xf0]  ;;  %v1280_v12 = vor.u32 %v1379_v5, %v1279_v4 }
  0x3d   : > { %496 = vmatpush.bf16.msra.mxu0 %v1061_v30  ;;  %521 = vmatpush.bf16.msra.mxu2 %v1085_v34  ;;  %v1373_v10 = vld [vmem:[#allocation6 + $0x8c] sm:$0xf]  ;;  %v1265_v11 = vld [vmem:[#allocation6 + $0x98] sm:$0xf0]  ;;  %v1256_v13 = vor.u32 %v1374_v7, %v1255_v3  ;;  %v1260_v14 = vor.u32 %v1372_v8, %v1257_v9  ;;  %v1239_v15 = vld [vmem:[#allocation6 + $0x60] sm:$0xf] }
  0x3e   : > { %509 = vmatpush.bf16.msra.mxu1 %v1065_v35  ;;  %535 = vmatpush.bf16.msra.mxu3 %v1073_v36  ;;  %v1263_v16 = vld [vmem:[#allocation6 + $0x88] sm:$0xf]  ;;  %v1375_v17 = vld [vmem:[#allocation6 + $0x94] sm:$0xf0]  ;;  %v1268_v18 = vor.u32 %v1373_v10, %v1265_v11  ;;  %v1370_v19 = vld [vmem:[#allocation6 + $0x6c] sm:$0xf0] }
  0x3f   : > { %v1368_v20 = vld [vmem:[#allocation6 + $0x64] sm:$0xf]  ;;  %v1241_v21 = vld [vmem:[#allocation6 + $0x70] sm:$0xf0]  ;;  %v1369_v22 = vld [vmem:[#allocation6 + $0x6c] sm:$0xf]  ;;  %v1264_v24 = vor.u32 %v1375_v17, %v1263_v16  ;;  %v1240_v25 = vor.u32 %v1370_v19, %v1239_v15 }
  0x40   : > { %497 = vmatmul.bf16.vlgmr.msra.gmra.mxu0 %v296_v45  ;;  %v1249_v23 = vld [vmem:[#allocation6 + $0x78] sm:$0xf0]  ;;  %v1244_v26 = vor.u32 %v1368_v20, %v1241_v21  ;;  %v1223_v27 = vld [vmem:[#allocation6 + $0x40] sm:$0xf]  ;;  %v1247_v28 = vld [vmem:[#allocation6 + $0x68] sm:$0xf] }
  0x41   : > { %810 = vmatpush.bf16.msrb.mxu0 %v1304_v39  ;;  %510 = vmatmul.bf16.vlgmr.msra.gmra.mxu1 %v296_v45  ;;  %v1371_v29 = vld [vmem:[#allocation6 + $0x74] sm:$0xf0]  ;;  %v1252_v30 = vor.u32 %v1369_v22, %v1249_v23  ;;  %v1366_v31 = vld [vmem:[#allocation6 + $0x4c] sm:$0xf0]  ;;  %v1364_v32 = vld [vmem:[#allocation6 + $0x44] sm:$0xf] }
  0x42   : > { %823 = vmatpush.bf16.msrb.mxu1 %v1308_v40  ;;  %849 = vmatpush.bf16.msrb.mxu3 %v1316_v44  ;;  %v1225_v33 = vld [vmem:[#allocation6 + $0x50] sm:$0xf0]  ;;  %v1365_v34 = vld [vmem:[#allocation6 + $0x4c] sm:$0xf]  ;;  %v1233_v35 = vld [vmem:[#allocation6 + $0x58] sm:$0xf0]  ;;  %v1248_v36 = vor.u32 %v1371_v29, %v1247_v28  ;;  %v1224_v37 = vor.u32 %v1366_v31, %v1223_v27 }
  0x43   : > { %522 = vmatpush.bf16.msra.mxu2 %v1069_v51  ;;  %536 = vmatmul.bf16.vlgmr.msra.gmra.mxu3 %v296_v45  ;;  %v1228_v38 = vor.u32 %v1364_v32, %v1225_v33  ;;  %v1207_v39 = vld [vmem:[#allocation6 + $0x20] sm:$0xf]  ;;  %v1231_v40 = vld [vmem:[#allocation6 + $0x48] sm:$0xf]  ;;  %v1367_v41 = vld [vmem:[#allocation6 + $0x54] sm:$0xf0]  ;;  %v1236_v42 = vor.u32 %v1365_v34, %v1233_v35 }
  0x44   : > { %v1362_v43 = vld [vmem:[#allocation6 + $0x2c] sm:$0xf0]  ;;  %v1360_v44 = vld [vmem:[#allocation6 + $0x24] sm:$0xf]  ;;  %v1361_v46 = vld [vmem:[#allocation6 + $0x2c] sm:$0xf]  ;;  %v1232_v48 = vor.u32 %v1367_v41, %v1231_v40 }
  0x45   : > { %811 = vmatpush.bf16.msrb.mxu0 %v1288_v53  ;;  %v1217_v47 = vld [vmem:[#allocation6 + $0x38] sm:$0xf0]  ;;  %v1208_v49 = vor.u32 %v1362_v43, %v1207_v39  ;;  %v1191_v51 = vld [vmem:[#allocation6] sm:$0xf]  ;;  %v1363_v53 = vld [vmem:[#allocation6 + $0x34] sm:$0xf0] }
  0x46   : > { %824 = vmatpush.bf16.msrb.mxu1 %v1292_v54  ;;  %850 = vmatpush.bf16.msrb.mxu3 %v1300_v58  ;;  %v1220_v54 = vor.u32 %v1361_v46, %v1217_v47  ;;  %v1358_v55 = vld [vmem:[#allocation6 + $0xc] sm:$0xf0]  ;;  %v1356_v56 = vld [vmem:[#allocation6 + $0x4] sm:$0xf]  ;;  %v1193_v57 = vld [vmem:[#allocation6 + $0x10] sm:$0xf0] }
  0x47   : > { %836 = vmatpush.bf16.msrb.mxu2 %v1312_v52  ;;  %v1215_v52 = vld [vmem:[#allocation6 + $0x28] sm:$0xf]  ;;  %v1357_v58 = vld [vmem:[#allocation6 + $0xc] sm:$0xf]  ;;  %v1201_v59 = vld [vmem:[#allocation6 + $0x18] sm:$0xf0]  ;;  %v1192_v61 = vor.u32 %v1358_v55, %v1191_v51  ;;  %v1196_v62 = vor.u32 %v1356_v56, %v1193_v57 }
  0x48   : > { %523 = vmatmul.bf16.vlgmr.msra.gmra.mxu2 %v296_v45  ;;  %v1209_v45 = vld [vmem:[#allocation6 + $0x30] sm:$0xf0]  ;;  %v1216_v60 = vor.u32 %v1363_v53, %v1215_v52  ;;  %v291_v5 = vld [vmem:[%s1539_s8] sm:$0xff]  ;;  %v603_v53 = vld [vmem:[#allocation3] sm:$0xff] }
  0x49   : > { %812 = vmatpush.bf16.msrb.mxu0 %v1272_v1  ;;  %v1212_v50 = vor.u32 %v1360_v44, %v1209_v45  ;;  %v616_v63 = vld [vmem:[#allocation4] sm:$0xff]  ;;  %v1199_v1 = vld [vmem:[#allocation6 + $0x8] sm:$0xf] }
  0x4a   : > { %825 = vmatpush.bf16.msrb.mxu1 %v1276_v2  ;;  %851 = vmatpush.bf16.msrb.mxu3 %v1284_v6  ;;  %v1359_v2 = vld [vmem:[#allocation6 + $0x14] sm:$0xf0]  ;;  %v617_v3 = vpack.c.bf16 %v616_v63, %v616_v63  ;;  %v292_v6 = vld [vmem:[%s1539_s8 + $0x8] sm:$0xff] }
  0x4b   : > { %837 = vmatpush.bf16.msrb.mxu2 %v1296_v0  ;;  %v1204_v0 = vor.u32 %v1357_v58, %v1201_v59  ;;  %v1200_v4 = vor.u32 %v1359_v2, %v1199_v1 }
  0x4d   : > { %813 = vmatpush.bf16.msrb.mxu0 %v1256_v13  ;;  %v294_v13 = vld [vmem:[%s1539_s8 + $0x18] sm:$0xff] }
  0x4e   : > { %826 = vmatpush.bf16.msrb.mxu1 %v1260_v14  ;;  %852 = vmatpush.bf16.msrb.mxu3 %v1268_v18 }
  0x4f   : > { %838 = vmatpush.bf16.msrb.mxu2 %v1280_v12 }
  0x51   : > { %814 = vmatpush.bf16.msrb.mxu0 %v1240_v25 }
  0x52   : > { %827 = vmatpush.bf16.msrb.mxu1 %v1244_v26  ;;  %853 = vmatpush.bf16.msrb.mxu3 %v1252_v30 }
  0x53   : > { %839 = vmatpush.bf16.msrb.mxu2 %v1264_v24  ;;  %v293_v24 = vld [vmem:[%s1539_s8 + $0x10] sm:$0xff] }
  0x55   : > { %815 = vmatpush.bf16.msrb.mxu0 %v1224_v37 }
  0x56   : > { %828 = vmatpush.bf16.msrb.mxu1 %v1228_v38  ;;  %854 = vmatpush.bf16.msrb.mxu3 %v1236_v42 }
  0x57   : > { %840 = vmatpush.bf16.msrb.mxu2 %v1248_v36 }
  0x59   : > { %816 = vmatpush.bf16.msrb.mxu0 %v1208_v49 }
  0x5a   : > { %829 = vmatpush.bf16.msrb.mxu1 %v1212_v50  ;;  %855 = vmatpush.bf16.msrb.mxu3 %v1220_v54  ;;  %v612_v50 = vld [vmem:[%s1544_s12] sm:$0xff]  ;;  %v613_v54 = vld [vmem:[%s1544_s12 + $0x8] sm:$0xff] }
  0x5b   : > { %841 = vmatpush.bf16.msrb.mxu2 %v1232_v48 }
  0x5d   : > { %817 = vmatpush.bf16.msrb.mxu0 %v1192_v61 }
  0x5e   : > { %830 = vmatpush.bf16.msrb.mxu1 %v1196_v62  ;;  %856 = vmatpush.bf16.msrb.mxu3 %v1204_v0 }
  0x5f   : > { %842 = vmatpush.bf16.msrb.mxu2 %v1216_v60 }
  0x60   : > { %818 = vmatmul.bf16.vlgmr.msrb.gmra.mxu0 %v617_v3 }
  0x61   : > { %831 = vmatmul.bf16.vlgmr.msrb.gmra.mxu1 %v617_v3  ;;  %857 = vmatmul.bf16.vlgmr.msrb.gmra.mxu3 %v617_v3 }
  0x63   : > { %843 = vmatpush.bf16.msrb.mxu2 %v1200_v4 }
  0x66   : > { %844 = vmatmul.bf16.vlgmr.msrb.gmra.mxu2 %v617_v3 }
  0xbd   : > { %v498_v7 = vpop.f32.mrf.mxu0 }
  0xbe   : > { %v541_v8 = vadd.f32 %v498_v7, %v291_v5  ;;  %v511_v9 = vpop.f32.mrf.mxu1 }
  0xbf   : > { %v542_v10 = vadd.f32 %v511_v9, %v292_v6  ;;  %v615_v9 = vld [vmem:[%s1544_s12 + $0x18] sm:$0xff] }
  0xc0   : > { %v1186_v11 = vmul.f32 -1.442695, %v541_v8 }
  0xc1   : > { %v1187_v12 = vmul.f32 -1.442695, %v542_v10 }
  0xc2   : > { %1410 = vpow2.f32 %v1186_v11 }
  0xc3   : > { %1412 = vpow2.f32 %v1187_v12 }
  0xc5   : > { %v500_v15 = vpop.f32.mrf.mxu0 }
  0xc6   : > { %v537_v14 = vpop.f32.mrf.mxu3  ;;  %v513_v17 = vpop.f32.mrf.mxu1 }
  0xc7   : > { %v544_v16 = vadd.f32 %v537_v14, %v294_v13 }
  0xc8   : > { %v1411_v19 = vpop.eup %1410 }
  0xc9   : > { %v1188_v20 = vmul.f32 -1.442695, %v544_v16  ;;  %v1413_v21 = vpop.eup %1412  ;;  %v548_v22 = vadd.f32 1.0, %v1411_v19 }
  0xca   : > { %v567_v23 = vadd.f32 1.0, %v1413_v21 }
  0xcb   : > { %v524_v18 = vpop.f32.mrf.mxu2  ;;  %1414 = vpow2.f32 %v1188_v20  ;;  %vm554_vm0 = vweird.f32 %v548_v22  ;;  %v560_v34 = vand.u32 2147483648, %v548_v22  ;;  %v558_v37 = vand.u32 2147483647, %v548_v22 }
  0xcc   : > { %1416 = vrcp.f32 %v548_v22  ;;  %v543_v26 = vadd.f32 %v524_v18, %v293_v24  ;;  %v579_v36 = vand.u32 2147483648, %v567_v23  ;;  %vm573_vm2 = vweird.f32 %v567_v23 }
  0xcd   : > { %1418 = vrcp.f32 %v567_v23  ;;  %v577_v39 = vand.u32 2147483647, %v567_v23  ;;  %v561_v43 = vor.u32 1.1754944e-38, %v560_v34  ;;  %vm559_vm6 = vcmp.eq.f32.partialorder %v558_v37, 8.507059e+37 }
  0xce   : > { %v539_v25 = vpop.f32.mrf.mxu3  ;;  %1420 = vtanh.f32 %v543_v26  ;;  %v580_v46 = vor.u32 1.1754944e-38, %v579_v36 }
  0xcf   : > { %vm578_vm7 = vcmp.eq.f32.partialorder %v577_v39, 8.507059e+37  ;;  %v614_v25 = vld [vmem:[%s1544_s12 + $0x10] sm:$0xff] }
  0xd1   : > { %v1415_v28 = vpop.eup %1414 }
  0xd2   : > { %v1417_v29 = vpop.eup %1416  ;;  %v587_v30 = vadd.f32 1.0, %v1415_v28 }
  0xd3   : > { %v526_v27 = vpop.f32.mrf.mxu2  ;;  %v1419_v31 = vpop.eup %1418  ;;  %v550_v32 = vmul.f32 %v1417_v29, %v548_v22  ;;  %vm555_vm1 = vweird.f32 %v1417_v29 }
  0xd4   : > { %v569_v33 = vmul.f32 %v1419_v31, %v567_v23  ;;  %1422 = vrcp.f32 %v587_v30  ;;  %vm574_vm3 = vweird.f32 %v1419_v31  ;;  %vm1754_vm4 = vmor %vm554_vm0, %vm555_vm1  ;;  %v1421_v44 = vpop.eup %1420  ;;  %vm593_vm8 = vweird.f32 %v587_v30 }
  0xd5   : > { %v551_v35 = vsub.f32 1.0, %v550_v32  ;;  %vm1758_vm5 = vmor %vm573_vm2, %vm574_vm3  ;;  %v599_v63 = vand.u32 2147483648, %v587_v30  ;;  %v597_v3 = vand.u32 2147483647, %v587_v30 }
  0xd6   : > { %v570_v38 = vsub.f32 1.0, %v569_v33 }
  0xd7   : > { %v552_v40 = vmul.f32 %v1417_v29, %v551_v35  ;;  %v600_v10 = vor.u32 1.1754944e-38, %v599_v63  ;;  %vm598_vm11 = vcmp.eq.f32.partialorder %v597_v3, 8.507059e+37 }
  0xd8   : > { %v571_v41 = vmul.f32 %v1419_v31, %v570_v38 }
  0xd9   : > { %v553_v47 = vadd.f32 %v1417_v29, %v552_v40 }
  0xda   : > { %v1423_v48 = vpop.eup %1422  ;;  %v572_v49 = vadd.f32 %v1419_v31, %v571_v41 }
  0xdb   : > { %v589_v51 = vmul.f32 %v1423_v48, %v587_v30  ;;  %v557_v52 = vsel %vm1754_vm4, %v1417_v29, %v553_v47  ;;  %vm594_vm9 = vweird.f32 %v1423_v48 }
  0xdc   : > { %v562_v55 = vsel %vm559_vm6, %v561_v43, %v557_v52  ;;  %v576_v56 = vsel %vm1758_vm5, %v1419_v31, %v572_v49  ;;  %vm1770_vm10 = vmor %vm593_vm8, %vm594_vm9 }
  0xdd   : > { %v819_v57 = vpop.f32.mrf.mxu0  ;;  %v590_v59 = vsub.f32 1.0, %v589_v51  ;;  %v581_v60 = vsel %vm578_vm7, %v580_v46, %v576_v56  ;;  %v605_v61 = vmul.f32 %v1421_v44, %v562_v55 }
  0xde   : > { %v832_v58 = vpop.f32.mrf.mxu1  ;;  %v862_v62 = vadd.f32 %v819_v57, %v612_v50  ;;  %v604_v0 = vmul.f32 %v603_v53, %v581_v60  ;;  %v924_v53 = vld [vmem:[#allocation5] sm:$0xff] }
  0xdf   : > { %v863_v1 = vadd.f32 %v832_v58, %v613_v54  ;;  %v591_v2 = vmul.f32 %v1423_v48, %v590_v59 }
  0xe0   : > { %v1317_v4 = vmul.f32 -1.442695, %v862_v62  ;;  %v606_v6 = vadd.f32 %v605_v61, %v604_v0 }
  0xe1   : > { %v1318_v7 = vmul.f32 -1.442695, %v863_v1  ;;  %v592_v8 = vadd.f32 %v1423_v48, %v591_v2 }
  0xe2   : > { %1424 = vpow2.f32 %v1317_v4  ;;  %609 = vst [vmem:[#allocation3] sm:$0xff] %v606_v6 }
  0xe3   : > { %1426 = vtanh.f32 %v606_v6  ;;  %v596_v11 = vsel %vm1770_vm10, %v1423_v48, %v592_v8 }
  0xe4   : > { %1428 = vpow2.f32 %v1318_v7  ;;  %v858_v12 = vpop.f32.mrf.mxu3  ;;  %v601_v16 = vsel %vm598_vm11, %v600_v10, %v596_v11 }
  0xe5   : > { %v865_v13 = vadd.f32 %v858_v12, %v615_v9  ;;  %v821_v14 = vpop.f32.mrf.mxu0 }
  0xe6   : > { %v834_v15 = vpop.f32.mrf.mxu1 }
  0xe7   : > { %v1319_v17 = vmul.f32 -1.442695, %v865_v13 }
  0xe8   : > { %v1425_v19 = vpop.eup %1424 }
  0xe9   : > { %v845_v18 = vpop.f32.mrf.mxu2  ;;  %v1427_v20 = vpop.eup %1426  ;;  %v869_v21 = vadd.f32 1.0, %v1425_v19  ;;  %1430 = vpow2.f32 %v1319_v17 }
  0xea   : > { %v1429_v22 = vpop.eup %1428  ;;  %v608_v23 = vmul.f32 %v1427_v20, %v601_v16  ;;  %v864_v28 = vadd.f32 %v845_v18, %v614_v25 }
  0xeb   : > { %1432 = vrcp.f32 %v869_v21  ;;  %v888_v24 = vadd.f32 1.0, %v1429_v22  ;;  %v881_v36 = vand.u32 2147483648, %v869_v21  ;;  %v879_v39 = vand.u32 2147483647, %v869_v21 }
  0xec   : > { %610 = vst [vmem:[#allocation2] sm:$0xff] %v608_v23  ;;  %v860_v26 = vpop.f32.mrf.mxu3  ;;  %vm875_vm13 = vweird.f32 %v869_v21 }
  0xed   : > { %611 = vst [vmem:[%s1549_s15] sm:$0xff] %v608_v23  ;;  %1434 = vrcp.f32 %v888_v24  ;;  %v900_v40 = vand.u32 2147483648, %v888_v24  ;;  %v898_v44 = vand.u32 2147483647, %v888_v24  ;;  %v882_v47 = vor.u32 1.1754944e-38, %v881_v36 }
  0xee   : > { %vm894_vm0 = vweird.f32 %v888_v24  ;;  %vm880_vm1 = vcmp.eq.f32.partialorder %v879_v39, 8.507059e+37 }
  0xef   : > { %v1431_v27 = vpop.eup %1430  ;;  %v901_v50 = vor.u32 1.1754944e-38, %v900_v40  ;;  %vm899_vm3 = vcmp.eq.f32.partialorder %v898_v44, 8.507059e+37 }
  0xf0   : > { %v908_v30 = vadd.f32 1.0, %v1431_v27 }
  0xf1   : > { %v847_v29 = vpop.f32.mrf.mxu2  ;;  %v1433_v31 = vpop.eup %1432 }
  0xf2   : > { %v871_v32 = vmul.f32 %v1433_v31, %v869_v21  ;;  %1436 = vrcp.f32 %v908_v30  ;;  %vm876_vm12 = vweird.f32 %v1433_v31  ;;  %v920_v61 = vand.u32 2147483648, %v908_v30 }
  0xf3   : > { %v1435_v33 = vpop.eup %1434  ;;  %1438 = vtanh.f32 %v864_v28  ;;  %vm877_vm15 = vmor %vm875_vm13, %vm876_vm12  ;;  %vm914_vm5 = vweird.f32 %v908_v30  ;;  %v918_v62 = vand.u32 2147483647, %v908_v30 }
  0xf4   : > { %v872_v34 = vsub.f32 1.0, %v871_v32  ;;  %v890_v35 = vmul.f32 %v1435_v33, %v888_v24  ;;  %vm895_vm14 = vweird.f32 %v1435_v33  ;;  %v921_v0 = vor.u32 1.1754944e-38, %v920_v61 }
  0xf5   : > { %vm896_vm2 = vmor %vm894_vm0, %vm895_vm14  ;;  %vm919_vm7 = vcmp.eq.f32.partialorder %v918_v62, 8.507059e+37 }
  0xf6   : > { %v891_v37 = vsub.f32 1.0, %v890_v35  ;;  %v873_v38 = vmul.f32 %v1433_v31, %v872_v34 }
  0xf8   : > { %v1437_v41 = vpop.eup %1436  ;;  %v892_v42 = vmul.f32 %v1435_v33, %v891_v37  ;;  %v874_v43 = vadd.f32 %v1433_v31, %v873_v38 }
  0xf9   : > { %v1439_v45 = vpop.eup %1438  ;;  %v910_v46 = vmul.f32 %v1437_v41, %v908_v30  ;;  %vm915_vm4 = vweird.f32 %v1437_v41 }
  0xfa   : > { %v878_v48 = vsel %vm877_vm15, %v1433_v31, %v874_v43  ;;  %v893_v49 = vadd.f32 %v1435_v33, %v892_v42  ;;  %vm916_vm6 = vmor %vm914_vm5, %vm915_vm4 }
  0xfb   : > { %v911_v51 = vsub.f32 1.0, %v910_v46  ;;  %v883_v52 = vsel %vm880_vm1, %v882_v47, %v878_v48 }
  0xfc   : > { %v897_v54 = vsel %vm896_vm2, %v1435_v33, %v893_v49  ;;  %v926_v55 = vmul.f32 %v1439_v45, %v883_v52 }
  0xfd   : > { %v912_v56 = vmul.f32 %v1437_v41, %v911_v51  ;;  %v902_v57 = vsel %vm899_vm3, %v901_v50, %v897_v54 }
  0xfe   : > { %v925_v58 = vmul.f32 %v924_v53, %v902_v57 }
  0xff   : > { %v913_v60 = vadd.f32 %v1437_v41, %v912_v56 }
 0x100   : > { %v927_v59 = vadd.f32 %v926_v55, %v925_v58 }
 0x101   : > { %v917_v63 = vsel %vm916_vm6, %v1437_v41, %v913_v60 }
 0x102   : > { %1440 = vtanh.f32 %v927_v59  ;;  %930 = vst [vmem:[#allocation5] sm:$0xff] %v927_v59  ;;  %v922_v2 = vsel %vm919_vm7, %v921_v0, %v917_v63 }
 0x108   : > { %v1441_v1 = vpop.eup %1440 }
 0x109   : > { %v929_v3 = vmul.f32 %v1441_v1, %v922_v2 }
 0x10b   : > { %931 = vst [vmem:[#allocation4] sm:$0xff] %v929_v3 }
 0x10c   : > { %932 = vst [vmem:[%s1554_s20] sm:$0xff] %v929_v3 }
 0x10d PF: > { %s17_s18 = sadd.s32 1, %s1482_s18  }
 0x10e   : > { %p14_p9 = scmp.ge.s32.totalorder %s17_s18, 10  }
 0x110   :  { %16 = sbr.rel (!%p14_p9) target bundleno = 1 (0x1), region = 90 }
 0x115   :  { %969 = vsyncpa [#allocation7], 1 }
 0x116   :  { %971 = vsyncpa [#allocation7 + $0x1], 1 }

// kernel: model_forward.13
= control target key start
LH: loop header
LB: loop body
LE: loop exit
PB: predicated region body
PF: predicated region fallthrough
CT: control target
= control target key end

     0   :  { %10 = vsyncpa [#allocation4], 0  ;;  %s1026_s0 = inlined_call_operand.vmem [shape: f32[8,256], index: 0, kind: input, shape index: {}]   ;;  %s1027_s1 = inlined_call_operand.hbm [shape: bf16[256,256], index: 1, kind: input, shape index: {}]   ;;  %s1028_s2 = inlined_call_operand.vmem [shape: f32[1,256], index: 2, kind: input, shape index: {}]   ;;  %s1029_s3 = inlined_call_operand.vmem [shape: bf16[256,128], index: 3, kind: input, shape index: {}]   ;;  %s1030_s4 = inlined_call_operand.vmem [shape: f32[1,128], index: 4, kind: input, shape index: {}]   ;;  %s1031_s5 = inlined_call_operand.vmem [shape: f32[8,128], index: 5, kind: output, shape index: {}]  }
   0x1   :  { %12 = vsyncpa [#allocation4 + $0x1], 0  ;;  %s882_s18 = smov 0   ;;  %s884_s19 = smov 0  }
   0x2   :  { %s886_s20 = smov 0   ;;  %s888_s21 = smov 0  }
   0x3 LB: > { %s901_s22 = sadd.s32 4294967295, %s846_s21   ;;  %s904_s23 = sadd.s32 1, %s846_s21   ;;  %s846_s21 = sphi %s888_s21, %s1038_s21   ;;  %s842_s20 = sphi %s886_s20, %s1037_s20   ;;  %s838_s19 = sphi %s884_s19, %s1036_s19   ;;  %s834_s18 = sphi %s882_s18, %s1035_s18  }
   0x4   : > { %s43_s24 = ssub.s32 %s846_s21, %s904_s23  ;;  %s46_s25 = sadd.s32 1, %s842_s20 }
   0x5   : > { %p44_p0 = scmp.eq.s32.totalorder %s43_s24, 0  ;;  %p53_p1 = scmp.ne.s32.totalorder %s842_s20, %s838_s19 }
   0x6   : > { %p54_p2 = scmp.eq.s32.totalorder %s846_s21, 0  ;;  %p59_p3 = scmp.ne.s32.totalorder %s838_s19, %s834_s18 }
   0x7   : > { %s914_s26 = scalar_select %p44_p0, %s842_s20, %s46_s25  }
   0x8   : > { %p916_p4 = por %p54_p2, %p53_p1  ;;  %p60_p5 = scmp.eq.s32.totalorder %s901_s22, 0 }
   0x9   : > { %p737_p6 = scmp.lt.s32.totalorder %s846_s21, 2  ;;  %s183_s29 = sand.u32 1, %s842_s20  }
   0xa   : > { %p922_p7 = por %p60_p5, %p59_p3  ;;  %s601_s30 = sshll.u32 %s183_s29, 7 }
   0xb   : > { %s602_s6 = sshll.u32 %s846_s21, 2  ;;  %s187_s10 = scalar_lea.vmem [#allocation3], %s601_s30 }
   0xc   : > { %s191_s9 = scalar_lea.hbm %s1027_s1, %s602_s6  ;;  %s194_s11 = sshll.u32 %s187_s10, 4  ;;  %s195_s11 = int_to_ptr.vmem [resolvable:$true] %s194_s11 }
   0xd   : > { %s192_s12 = sshll.u32 %s191_s9, 4  ;;  %p933_p8 = pnand %p737_p6, %p916_p4  ;;  %s193_s12 = int_to_ptr.hbm [resolvable:$true] %s192_s12 }
   0xe   : > { %s184_s14 = scalar_lea.sflag [#allocation4], %s183_s29  ;;  %s782_s15 = sshra.s32 %s193_s12, 4  ;;  %s783_s15 = int_to_ptr.hbm [resolvable:$true] %s782_s15 }
   0xf   : > { %s784_s16 = scalar_lea.hbm %s783_s15, 128  ;;  %p786_p10 = pneg %p933_p8 }
  0x10   : > { %p785_p9 = scmp.ne.s32.totalorder %s783_s15, %s784_s16  ;;  %s789_s24 = scalar_lea.hbm %s1027_s1, 256 }
  0x11   : > { %p790_p13 = scmp.lt.s32.totalorder %s783_s15, %s1027_s1  ;;  %p791_p0 = scmp.lt.s32.totalorder %s789_s24, %s784_s16 }
  0x12   : > { %p787_p11 = pnand %p786_p10, %p785_p9 }
  0x13   : > { %p792_p1 = por %p791_p0, %p790_p13 }
  0x14   : > { %p788_p12 = pneg %p787_p11 }
  0x16   : > { %p793_p2 = pnand %p792_p1, %p788_p12 }
  0x18   : > { %796 = shalt.err (!%p793_p2)
}
  0x19   : > { %s848_s29 = smov 128   ;;  %s849_s30 = smov 64  }
  0x1a   : > { %s850_s6 = smov 4   ;;  %p603_p3 = scmp.ge.s32.totalorder %s846_s21, 1 }
  0x1b   : > { %736 = dma.hbm_to_vmem [thread:$0]  (!%p933_p8), %s193_s12, 2048, %s195_s11, %s184_s14, %s848_s29, %s849_s30, %s850_s6  }
  0x1c   : > { %p217_p4 = scmp.lt.s32.totalorder %s846_s21, 3 }
  0x1e   : > { %p218_p5 = pnand %p603_p3, %p217_p4 }
  0x1f   : > { %s223_s7 = sand.u32 (!%p218_p5), 1, %s838_s19  }
  0x20   : > { %221 = sbr.rel (%p218_p5) target bundleno = 620 (0x26c), region = 40  ;;  %s604_s8 = sshll.u32 (!%p218_p5), %s223_s7, 7 }
  0x21   : > { %s224_s9 = scalar_lea.sflag (!%p218_p5), [#allocation4], %s223_s7  ;;  %s950_s10 = scalar_lea.vmem (!%p218_p5), [#allocation3], %s604_s8 }
  0x25   : > { %829 = dma.done.wait (%p922_p7), %s224_s9, 2048  }
  0x26   : > { %831 = vsyncadd (%p922_p7), %s224_s9, 4294965248  ;;  %p258_p6 = scmp.lt.s32.totalorder %s901_s22, 1  ;;  %s605_s11 = sshll.u32 %s901_s22, 4 }
  0x27   : > { %p262_p8 = scmp.lt.s32.totalorder %s605_s11, 31  ;;  %p607_p7 = scmp.ne.s32.totalorder %s901_s22, 0 }
  0x28   : > { %s959_s21 = scalar_select %p258_p6, %s901_s22, 1 }
  0x29   : > { %s1040_s11 = smov (!%p262_p8, %s605_s11), 31  ;;  %270 = sbr.rel (%p607_p7) target bundleno = 48 (0x30), region = 48 }
  0x2a   : > { %s260_s14 = scalar_lea.vmem %s1028_s2, %s959_s21  ;;  %s606_s15 = sshll.u32 %s1040_s11, 2 }
  0x2b   : > { %s968_s28 = scalar_lea.vmem %s1029_s3, %s606_s15 }
  0x2e   : > { %v851_v0 = vmov 0.0  }
  0x2f   : > { %271 = vst [vmem:[#allocation2] sm:$0xff] %v851_v0 }
  0x30 PF: > { %v714_v1 = vld [vmem:[%s950_s10 + $0x38] sm:$0xff]  ;;  %v713_v3 = vld [vmem:[%s950_s10 + $0x30] sm:$0xff]  ;;  %v712_v5 = vld [vmem:[%s950_s10 + $0x28] sm:$0xff]  ;;  %p704_p9 = scmp.ne.s32.totalorder %s901_s22, 1 }
  0x31   : > { %v722_v2 = vld [vmem:[%s950_s10 + $0x78] sm:$0xff]  ;;  %408 = vmatpush.bf16.msra.mxu0 %v714_v1  ;;  %v721_v4 = vld [vmem:[%s950_s10 + $0x70] sm:$0xff]  ;;  %v720_v6 = vld [vmem:[%s950_s10 + $0x68] sm:$0xff] }
  0x32   : > { %421 = vmatpush.bf16.msra.mxu1 %v722_v2  ;;  %v730_v7 = vld [vmem:[%s968_s28 + $0x38] sm:$0xff]  ;;  %v729_v8 = vld [vmem:[%s968_s28 + $0x30] sm:$0xff]  ;;  %v711_v9 = vld [vmem:[%s950_s10 + $0x20] sm:$0xff] }
  0x33   : > { %501 = vmatpush.bf16.msra.mxu2 %v730_v7  ;;  %v719_v10 = vld [vmem:[%s950_s10 + $0x60] sm:$0xff]  ;;  %v710_v12 = vld [vmem:[%s950_s10 + $0x18] sm:$0xff]  ;;  %v709_v15 = vld [vmem:[%s950_s10 + $0x10] sm:$0xff] }
  0x34   : > { %v728_v11 = vld [vmem:[%s968_s28 + $0x28] sm:$0xff]  ;;  %v718_v13 = vld [vmem:[%s950_s10 + $0x58] sm:$0xff]  ;;  %v717_v16 = vld [vmem:[%s950_s10 + $0x50] sm:$0xff] }
  0x35   : > { %409 = vmatpush.bf16.msra.mxu0 %v713_v3  ;;  %v727_v14 = vld [vmem:[%s968_s28 + $0x20] sm:$0xff]  ;;  %v726_v17 = vld [vmem:[%s968_s28 + $0x18] sm:$0xff]  ;;  %v708_v18 = vld [vmem:[%s950_s10 + $0x8] sm:$0xff] }
  0x36   : > { %422 = vmatpush.bf16.msra.mxu1 %v721_v4  ;;  %v716_v19 = vld [vmem:[%s950_s10 + $0x48] sm:$0xff]  ;;  %v707_v20 = vld [vmem:[%s950_s10] sm:$0xff]  ;;  %v272_v22 = vld [vmem:[%s1026_s0] sm:$0xff] }
  0x37   : > { %502 = vmatpush.bf16.msra.mxu2 %v729_v8  ;;  %v715_v21 = vld [vmem:[%s950_s10 + $0x40] sm:$0xff]  ;;  %v274_v24 = vpack.c.bf16 %v272_v22, %v272_v22  ;;  %v725_v26 = vld [vmem:[%s968_s28 + $0x10] sm:$0xff]  ;;  %v723_v28 = vld [vmem:[%s968_s28] sm:$0xff] }
  0x38   : > { %v273_v23 = vld [vmem:[%s1026_s0 + $0x8] sm:$0xff]  ;;  %v774_v29 = vld [vmem:[%s260_s14] ss:$0 sm:$0xff] }
  0x39   : > { %410 = vmatpush.bf16.msra.mxu0 %v712_v5  ;;  %v275_v25 = vpack.c.bf16 %v273_v23, %v273_v23  ;;  %v724_v27 = vld [vmem:[%s968_s28 + $0x8] sm:$0xff]  ;;  %v435_v38 = vld [vmem:[#allocation2] sm:$0xff] }
  0x3a   : > { %423 = vmatpush.bf16.msra.mxu1 %v720_v6 }
  0x3b   : > { %503 = vmatpush.bf16.msra.mxu2 %v728_v11 }
  0x3d   : > { %411 = vmatpush.bf16.msra.mxu0 %v711_v9 }
  0x3e   : > { %424 = vmatpush.bf16.msra.mxu1 %v719_v10 }
  0x3f   : > { %504 = vmatpush.bf16.msra.mxu2 %v727_v14 }
  0x41   : > { %412 = vmatpush.bf16.msra.mxu0 %v710_v12 }
  0x42   : > { %425 = vmatpush.bf16.msra.mxu1 %v718_v13 }
  0x43   : > { %505 = vmatpush.bf16.msra.mxu2 %v726_v17 }
  0x45   : > { %413 = vmatpush.bf16.msra.mxu0 %v709_v15 }
  0x46   : > { %426 = vmatpush.bf16.msra.mxu1 %v717_v16 }
  0x47   : > { %506 = vmatpush.bf16.msra.mxu2 %v725_v26 }
  0x49   : > { %414 = vmatpush.bf16.msra.mxu0 %v708_v18 }
  0x4a   : > { %427 = vmatpush.bf16.msra.mxu1 %v716_v19 }
  0x4b   : > { %507 = vmatpush.bf16.msra.mxu2 %v724_v27 }
  0x4d   : > { %415 = vmatpush.bf16.msra.mxu0 %v707_v20 }
  0x4e   : > { %428 = vmatpush.bf16.msra.mxu1 %v715_v21 }
  0x4f   : > { %508 = vmatpush.bf16.msra.mxu2 %v723_v28 }
  0x50   : > { %416 = vmatmul.bf16.vlgmr.msra.gmra.mxu0 %v274_v24 }
  0x51   : > { %429 = vmatmul.bf16.vlgmr.msra.gmra.mxu1 %v275_v25 }
  0xcd   : > { %v417_v30 = vpop.f32.mrf.mxu0 }
  0xce   : > { %v430_v31 = vpop.f32.mrf.mxu1  ;;  %v418_v32 = vadd.f32 %v774_v29, %v417_v30 }
  0xd0   : > { %v431_v33 = vadd.f32 %v430_v31, %v418_v32 }
  0xd2   : > { %775 = vtanh.f32 %v431_v33 }
  0xd5   : > { %v419_v34 = vpop.f32.mrf.mxu0 }
  0xd6   : > { %v432_v35 = vpop.f32.mrf.mxu1 }
  0xd8   : > { %v776_v36 = vpop.eup %775 }
  0xd9   : > { %v436_v37 = vpack.c.bf16 %v776_v36, %v776_v36 }
  0xdb   : > { %509 = vmatmul.bf16.vlgmr.msra.gmra.mxu2 %v436_v37 }
 0x15e   : > { %v510_v39 = vpop.f32.mrf.mxu2 }
 0x15f   : > { %v514_v40 = vadd.f32 %v510_v39, %v435_v38 }
 0x161   : > { %515 = vst [vmem:[#allocation2] sm:$0xff] %v514_v40 }
 0x162   : > { %519 = sbr.rel (%p704_p9) target bundleno = 620 (0x26c), region = 52 }
 0x166   : > { %v512_v41 = vpop.f32.mrf.mxu2 }
 0x167   : > { %v777_v43 = vld [vmem:[%s1030_s4] ss:$0 sm:$0xff] }
 0x168   : > { %v520_v42 = vld [vmem:[#allocation2] sm:$0xff] }
 0x169   : > { %v525_v44 = vadd.f32 %v777_v43, %v520_v42 }
 0x16b   : > { %526 = vmax.xlane.f32.xlu0 %v525_v44 }
 0x1de   : > { %v527_v45 = vpop.xlane.xlu0 %526 }
 0x1df   : > { %v528_v46 = vsub.f32 %v525_v44, %v527_v45 }
 0x1e1   : > { %v529_v47 = vmul.f32 1.442695, %v528_v46 }
 0x1e3   : > { %778 = vpow2.f32 %v529_v47 }
 0x1e9   : > { %v779_v48 = vpop.eup %778 }
 0x1ea   : > { %531 = vadd.xlane.f32.xlu0 %v779_v48 }
 0x25d   : > { %v532_v49 = vpop.xlane.xlu0 %531 }
 0x25e   : > { %780 = vlog2.f32 %v532_v49 }
 0x264   : > { %v781_v50 = vpop.eup %780 }
 0x265   : > { %v534_v51 = vmul.f32 0.6931472, %v781_v50 }
 0x267   : > { %v535_v52 = vadd.f32 %v534_v51, %v527_v45 }
 0x269   : > { %v536_v53 = vsub.f32 %v525_v44, %v535_v52 }
 0x26b   : > { %537 = vst [vmem:[%s1031_s5] sm:$0xff] %v536_v53 }
 0x26c PF: > { %p15_p10 = scmp.ge.s32.totalorder %s904_s23, 4   ;;  %s1035_s18 = smov %s838_s19 }
 0x26d   : > { %s1036_s19 = smov %s842_s20  ;;  %s1037_s20 = smov %s914_s26 }
 0x26e   : > { %s1038_s21 = smov %s904_s23  ;;  %17 = sbr.rel (!%p15_p10) target bundleno = 3 (0x3), region = 90 }
 0x273   :  { %549 = vsyncpa [#allocation4], 1 }
 0x274   :  { %551 = vsyncpa [#allocation4 + $0x1], 1 }

</bundles_post_ra>
